<compile_context>
chip_gen: v5e
topology: v5e:2x2
jax: 0.10.0
libtpu: 0.0.40
codegen_flags: <defaults>
</compile_context>

<pallas_src>
import math

import jax
import jax.numpy as jnp
from jax import lax
from jax.experimental import pallas as pl
from jax.experimental.pallas import tpu as pltpu


# ------------------------------ fused decoder ------------------------------

def decoder_forward(params, x, memory, mask_bias, H):
    """Full N-layer decoder forward in a single pallas_call (batch folded into rows)."""
    B, T, D = x.shape
    S = memory.shape[1]
    N = params['w_attn'].shape[0]
    d_ff = params['w1'].shape[-1]
    BT, BS = B * T, B * S

    # Fold batch into the sublane axis.
    x2 = x.reshape(BT, D)
    mem2 = memory.reshape(BS, D)

    # Block-diagonal additive biases (folded batches must not attend across each
    # other), pre-tiled H times along rows to match the head-packed score layout.
    neg = jnp.float32(-1e9)
    eye_tt = jnp.kron(jnp.eye(B, dtype=jnp.float32), jnp.ones((T, T), jnp.float32))
    self_bias = jnp.where(eye_tt > 0,
                          jnp.tile(mask_bias.astype(jnp.float32), (B, B)), neg)
    eye_ts = jnp.kron(jnp.eye(B, dtype=jnp.float32), jnp.ones((T, S), jnp.float32))
    cross_bias = jnp.where(eye_ts > 0, jnp.float32(0.0), neg)
    self_bias_h = jnp.tile(self_bias, (H, 1))    # (H*BT, BT)
    cross_bias_h = jnp.tile(cross_bias, (H, 1))  # (H*BT, BS)

    def _layernorm(xv, a, b, eps=1e-6):
        # Torch-custom LayerNorm semantics: a*(x-mean)/(std_unbiased + eps) + b
        d = xv.shape[-1]
        mean = jnp.mean(xv, axis=-1, keepdims=True)
        xc = xv - mean
        var = jnp.sum(xc * xc, axis=-1, keepdims=True) * (1.0 / (d - 1))
        std = jnp.sqrt(var)
        return a * xc * pl.reciprocal(std + eps, approx=True) + b

    def _mha(q, k, v, bias, wo, bo):
        """q:(Tq,D)  k,v:(Tk,D)  bias:(H*Tq,Tk)  wo:(D,D)  bo:(1,D) -> (Tq,D)."""
        Tq = q.shape[0]
        dk = D // H
        scale = 1.0 / math.sqrt(dk)
        # All H score blocks packed head-major along sublanes -> ONE softmax pass.
        s = jnp.concatenate(
            [lax.dot_general(q[:, h * dk:(h + 1) * dk], k[:, h * dk:(h + 1) * dk],
                             (((1,), (1,)), ((), ())),
                             preferred_element_type=jnp.float32)
             for h in range(H)], axis=0) * scale                 # (H*Tq, Tk)
        s = s + bias
        s = s - jnp.max(s, axis=-1, keepdims=True)
        p = jnp.exp(s)
        p = p * pl.reciprocal(jnp.sum(p, axis=-1, keepdims=True), approx=True)
        # Per-head P@V, then ONE fused output projection (Tq,D)@(D,D).
        o = jnp.concatenate(
            [jnp.dot(p[h * Tq:(h + 1) * Tq, :], v[:, h * dk:(h + 1) * dk],
                     preferred_element_type=jnp.float32)
             for h in range(H)], axis=-1)                        # (Tq, D)
        return jnp.dot(o, wo, preferred_element_type=jnp.float32) + bo

    # Packed slab layouts (lane offsets, per layer):
    #   w_attn (D, 8D): wqkv[0:3D] | wo_s[3D:4D] | wq_c[4D:5D] | wkv_c[5D:7D] | wo_c[7D:8D]
    #   bias (1, 9D+dff): same order, then b1[8D:8D+dff], b2[8D+dff:9D+dff]
    #   ln (6, D): ln0_a, ln0_b, ln1_a, ln1_b, ln2_a, ln2_b
    def kernel(x_ref, mem_ref, sb_ref, cb_ref, wA_ref, w1_ref, w2_ref,
               b_ref, ln_ref, fn_ref, o_ref):
        xb = x_ref[...]
        mem = mem_ref[...]
        sb = sb_ref[...]
        cb = cb_ref[...]

        # Hoist src-attn K/V projections of memory (independent of the residual chain).
        kv_mem = [jnp.dot(mem, wA_ref[l, :, 5 * D:7 * D],
                          preferred_element_type=jnp.float32) + b_ref[l, :, 5 * D:7 * D]
                  for l in range(N)]

        for l in range(N):  # N is small & static -> unrolled
            # --- sublayer 0: x + self_attn(norm(x), tgt_mask) ---
            xn = _layernorm(xb, ln_ref[l, 0:1, :], ln_ref[l, 1:2, :])
            qkv = jnp.dot(xn, wA_ref[l, :, 0:3 * D],
                          preferred_element_type=jnp.float32) + b_ref[l, :, 0:3 * D]
            xb = xb + _mha(qkv[:, 0:D], qkv[:, D:2 * D], qkv[:, 2 * D:3 * D], sb,
                           wA_ref[l, :, 3 * D:4 * D], b_ref[l, :, 3 * D:4 * D])

            # --- sublayer 1: x + src_attn(norm(x), memory, memory) ---
            xn = _layernorm(xb, ln_ref[l, 2:3, :], ln_ref[l, 3:4, :])
            q = jnp.dot(xn, wA_ref[l, :, 4 * D:5 * D],
                        preferred_element_type=jnp.float32) + b_ref[l, :, 4 * D:5 * D]
            kv = kv_mem[l]
            xb = xb + _mha(q, kv[:, 0:D], kv[:, D:2 * D], cb,
                           wA_ref[l, :, 7 * D:8 * D], b_ref[l, :, 7 * D:8 * D])

            # --- sublayer 2: x + ffn(norm(x)) ---
            xn = _layernorm(xb, ln_ref[l, 4:5, :], ln_ref[l, 5:6, :])
            hdn = jnp.maximum(jnp.dot(xn, w1_ref[l],
                                      preferred_element_type=jnp.float32)
                              + b_ref[l, :, 8 * D:8 * D + d_ff], 0.0)
            xb = xb + jnp.dot(hdn, w2_ref[l],
                              preferred_element_type=jnp.float32) \
                    + b_ref[l, :, 8 * D + d_ff:9 * D + d_ff]

        o_ref[...] = _layernorm(xb, fn_ref[0:1, :], fn_ref[1:2, :]).astype(o_ref.dtype)

    vmem = pl.BlockSpec(memory_space=pltpu.MemorySpace.VMEM)  # whole array, resident in VMEM
    out = pl.pallas_call(
        kernel,
        out_shape=jax.ShapeDtypeStruct((BT, D), x.dtype),
        in_specs=[vmem] * 10,
        out_specs=vmem,
    )(x2, mem2, self_bias_h, cross_bias_h,
      params['w_attn'], params['w1'], params['w2'],
      params['bias'], params['ln'], params['final_ln'])
    return out.reshape(B, T, D)


# ------------------------------ parameter init (packed slabs) ------------------------------

def init_params(key, N, D, d_ff):
    def dense(k, din, dout, scale=0.05):
        kw, kb = jax.random.split(k)
        return (scale * jax.random.normal(kw, (din, dout), jnp.float32),
                scale * jax.random.normal(kb, (dout,), jnp.float32))

    wA, w1s, w2s, bs, lns = [], [], [], [], []
    keys = jax.random.split(key, N)
    for l in range(N):
        ks = jax.random.split(keys[l], 10)
        wq_s, bq_s = dense(ks[0], D, D)
        wk_s, bk_s = dense(ks[1], D, D)
        wv_s, bv_s = dense(ks[2], D, D)
        wo_s, bo_s = dense(ks[3], D, D)
        wq_c, bq_c = dense(ks[4], D, D)
        wk_c, bk_c = dense(ks[5], D, D)
        wv_c, bv_c = dense(ks[6], D, D)
        wo_c, bo_c = dense(ks[7], D, D)
        w1, b1 = dense(ks[8], D, d_ff)
        w2, b2 = dense(ks[9], d_ff, D)
        wA.append(jnp.concatenate(
            [wq_s, wk_s, wv_s, wo_s, wq_c, wk_c, wv_c, wo_c], axis=1))      # (D, 8D)
        w1s.append(w1)
        w2s.append(w2)
        bs.append(jnp.concatenate(
            [bq_s, bk_s, bv_s, bo_s, bq_c, bk_c, bv_c, bo_c, b1, b2])[None, :])  # (1, 9D+dff)
        lns.append(jnp.stack([jnp.ones(D, jnp.float32), jnp.zeros(D, jnp.float32)] * 3))  # (6, D)

    return {
        'w_attn': jnp.stack(wA),      # (N, D, 8D)
        'w1': jnp.stack(w1s),         # (N, D, d_ff)
        'w2': jnp.stack(w2s),         # (N, d_ff, D)
        'bias': jnp.stack(bs),        # (N, 1, 9D + d_ff)
        'ln': jnp.stack(lns),         # (N, 6, D)
        'final_ln': jnp.stack([jnp.ones(D, jnp.float32), jnp.zeros(D, jnp.float32)]),  # (2, D)
    }


# ------------------------------ pure-JAX reference ------------------------------

def reference_forward(params, x, memory, mask_bias, H, N):
    D = x.shape[-1]
    d_ff = params['w1'].shape[-1]

    def ln(z, a, b, eps=1e-6):
        mean = z.mean(-1, keepdims=True)
        zc = z - mean
        var = (zc * zc).sum(-1, keepdims=True) / (z.shape[-1] - 1)
        return a * zc / (jnp.sqrt(var) + eps) + b

    def mha(q, k, v, bias, wo, bo):
        Bq, Tq, _ = q.shape
        dk = D // H
        qh = q.reshape(Bq, Tq, H, dk).transpose(0, 2, 1, 3)
        kh = k.reshape(Bq, -1, H, dk).transpose(0, 2, 1, 3)
        vh = v.reshape(Bq, -1, H, dk).transpose(0, 2, 1, 3)
        s = jnp.einsum('bhtd,bhsd->bhts', qh, kh) / math.sqrt(dk)
        if bias is not None:
            s = s + bias
        p = jax.nn.softmax(s, axis=-1)
        o = jnp.einsum('bhts,bhsd->bhtd', p, vh).transpose(0, 2, 1, 3).reshape(Bq, Tq, D)
        return o @ wo + bo

    with jax.default_matmul_precision('highest'):
        for l in range(N):
            wA = params['w_attn'][l]
            bL = params['bias'][l, 0]
            lnp = params['ln'][l]
            wqkv, wo_s = wA[:, 0:3 * D], wA[:, 3 * D:4 * D]
            wq_c, wkv_c, wo_c = wA[:, 4 * D:5 * D], wA[:, 5 * D:7 * D], wA[:, 7 * D:8 * D]
            bqkv, bo_s = bL[0:3 * D], bL[3 * D:4 * D]
            bq_c, bkv_c, bo_c = bL[4 * D:5 * D], bL[5 * D:7 * D], bL[7 * D:8 * D]
            b1, b2 = bL[8 * D:8 * D + d_ff], bL[8 * D + d_ff:9 * D + d_ff]
            w1, w2 = params['w1'][l], params['w2'][l]

            xn = ln(x, lnp[0], lnp[1])
            qkv = xn @ wqkv + bqkv
            x = x + mha(qkv[..., :D], qkv[..., D:2 * D], qkv[..., 2 * D:],
                        mask_bias, wo_s, bo_s)
            xn = ln(x, lnp[2], lnp[3])
            q = xn @ wq_c + bq_c
            kv = memory @ wkv_c + bkv_c
            x = x + mha(q, kv[..., :D], kv[..., D:], None, wo_c, bo_c)
            xn = ln(x, lnp[4], lnp[5])
            h = jax.nn.relu(xn @ w1 + b1)
            x = x + h @ w2 + b2
        return ln(x, params['final_ln'][0], params['final_ln'][1])


# ------------------------------ main ------------------------------

if __name__ == "__main__":
    B, T, S, D, H, d_ff, N = 2, 8, 8, 32, 4, 64, 2

    key = jax.random.PRNGKey(0)
    kx, km, kp = jax.random.split(key, 3)
    x = jax.random.normal(kx, (B, T, D), jnp.float32)
    memory = jax.random.normal(km, (B, S, D), jnp.float32)
    # causal (subsequent) target mask as an additive bias: 0 = attend, -1e9 = masked
    tril = jnp.tril(jnp.ones((T, T), jnp.float32))
    mask_bias = (1.0 - tril) * (-1e9)

    params = init_params(kp, N, D, d_ff)

    fwd = jax.jit(lambda p, a, m, mb: decoder_forward(p, a, m, mb, H))
    out = fwd(params, x, memory, mask_bias)
    jax.block_until_ready(out)
    assert out.shape == (B, T, D)

    ref = reference_forward(params, x, memory, mask_bias, H, N)
    max_err = float(jnp.max(jnp.abs(out - ref)))
    assert jnp.allclose(out, ref, rtol=1e-2, atol=1e-2), f"max_err={max_err}"

    print("KERNEL_OK")
</pallas_src>

<mosaic_0001>
module attributes {stable_mosaic.version = 11 : i64} {
  func.func @kernel(%arg0: memref<16x32xf32, #tpu.memory_space<vmem>>, %arg1: memref<16x32xf32, #tpu.memory_space<vmem>>, %arg2: memref<64x16xf32, #tpu.memory_space<vmem>>, %arg3: memref<64x16xf32, #tpu.memory_space<vmem>>, %arg4: memref<2x32x256xf32, #tpu.memory_space<vmem>>, %arg5: memref<2x32x64xf32, #tpu.memory_space<vmem>>, %arg6: memref<2x64x32xf32, #tpu.memory_space<vmem>>, %arg7: memref<2x1x352xf32, #tpu.memory_space<vmem>>, %arg8: memref<2x6x32xf32, #tpu.memory_space<vmem>>, %arg9: memref<2x32xf32, #tpu.memory_space<vmem>>, %arg10: memref<16x32xf32, #tpu.memory_space<vmem>>) attributes {dimension_semantics = [], scalar_prefetch = 0 : i64, scratch_operands = 0 : i64, tpu.core_type = #tpu.core_type<tc>} {
    %c0 = arith.constant 0 : index
    %c0_0 = arith.constant 0 : index
    %0 = vector.load %arg0[%c0, %c0_0] : memref<16x32xf32, #tpu.memory_space<vmem>>, vector<16x32xf32>
    %c0_1 = arith.constant 0 : index
    %c0_2 = arith.constant 0 : index
    %1 = vector.load %arg1[%c0_1, %c0_2] : memref<16x32xf32, #tpu.memory_space<vmem>>, vector<16x32xf32>
    %c0_3 = arith.constant 0 : index
    %c0_4 = arith.constant 0 : index
    %2 = vector.load %arg2[%c0_3, %c0_4] : memref<64x16xf32, #tpu.memory_space<vmem>>, vector<64x16xf32>
    %c0_5 = arith.constant 0 : index
    %c0_6 = arith.constant 0 : index
    %3 = vector.load %arg3[%c0_5, %c0_6] : memref<64x16xf32, #tpu.memory_space<vmem>>, vector<64x16xf32>
    %c0_7 = arith.constant 0 : index
    %c0_8 = arith.constant 0 : index
    %c160 = arith.constant 160 : index
    %4 = vector.load %arg4[%c0_7, %c0_8, %c160] : memref<2x32x256xf32, #tpu.memory_space<vmem>>, vector<1x32x64xf32>
    %5 = vector.shape_cast %4 : vector<1x32x64xf32> to vector<32x64xf32>
    %cst = arith.constant dense<0.000000e+00> : vector<16x64xf32>
    %6 = tpu.matmul %1, %5, %cst {dimension_numbers = #tpu.dot_dimension_numbers<[1], [0], [0], [1], [0, 0, 1, 1], [], []>} : vector<16x32xf32>, vector<32x64xf32>, vector<16x64xf32> -> vector<16x64xf32>
    %c0_9 = arith.constant 0 : index
    %c0_10 = arith.constant 0 : index
    %c160_11 = arith.constant 160 : index
    %7 = vector.load %arg7[%c0_9, %c0_10, %c160_11] : memref<2x1x352xf32, #tpu.memory_space<vmem>>, vector<1x1x64xf32>
    %8 = vector.shape_cast %7 : vector<1x1x64xf32> to vector<1x64xf32>
    %9 = vector.broadcast %8 : vector<1x64xf32> to vector<16x64xf32>
    %10 = arith.addf %6, %9 : vector<16x64xf32>
    %c1 = arith.constant 1 : index
    %c0_12 = arith.constant 0 : index
    %c160_13 = arith.constant 160 : index
    %11 = vector.load %arg4[%c1, %c0_12, %c160_13] : memref<2x32x256xf32, #tpu.memory_space<vmem>>, vector<1x32x64xf32>
    %12 = vector.shape_cast %11 : vector<1x32x64xf32> to vector<32x64xf32>
    %cst_14 = arith.constant dense<0.000000e+00> : vector<16x64xf32>
    %13 = tpu.matmul %1, %12, %cst_14 {dimension_numbers = #tpu.dot_dimension_numbers<[1], [0], [0], [1], [0, 0, 1, 1], [], []>} : vector<16x32xf32>, vector<32x64xf32>, vector<16x64xf32> -> vector<16x64xf32>
    %c1_15 = arith.constant 1 : index
    %c0_16 = arith.constant 0 : index
    %c160_17 = arith.constant 160 : index
    %14 = vector.load %arg7[%c1_15, %c0_16, %c160_17] : memref<2x1x352xf32, #tpu.memory_space<vmem>>, vector<1x1x64xf32>
    %15 = vector.shape_cast %14 : vector<1x1x64xf32> to vector<1x64xf32>
    %16 = vector.broadcast %15 : vector<1x64xf32> to vector<16x64xf32>
    %17 = arith.addf %13, %16 : vector<16x64xf32>
    %c0_18 = arith.constant 0 : index
    %c0_19 = arith.constant 0 : index
    %c0_20 = arith.constant 0 : index
    %18 = vector.load %arg8[%c0_18, %c0_19, %c0_20] : memref<2x6x32xf32, #tpu.memory_space<vmem>>, vector<1x1x32xf32>
    %19 = vector.shape_cast %18 : vector<1x1x32xf32> to vector<1x32xf32>
    %c0_21 = arith.constant 0 : index
    %c1_22 = arith.constant 1 : index
    %c0_23 = arith.constant 0 : index
    %20 = vector.load %arg8[%c0_21, %c1_22, %c0_23] : memref<2x6x32xf32, #tpu.memory_space<vmem>>, vector<1x1x32xf32>
    %21 = vector.shape_cast %20 : vector<1x1x32xf32> to vector<1x32xf32>
    %cst_24 = arith.constant dense<0.000000e+00> : vector<16xf32>
    %22 = vector.multi_reduction <add>, %0, %cst_24 [1] : vector<16x32xf32> to vector<16xf32>
    %23 = vector.shape_cast %22 : vector<16xf32> to vector<16x1xf32>
    %cst_25 = arith.constant 3.200000e+01 : f32
    %24 = vector.broadcast %cst_25 : f32 to vector<16x1xf32>
    %25 = arith.divf %23, %24 : vector<16x1xf32>
    %26 = vector.broadcast %25 : vector<16x1xf32> to vector<16x32xf32>
    %27 = arith.subf %0, %26 : vector<16x32xf32>
    %28 = arith.mulf %27, %27 : vector<16x32xf32>
    %cst_26 = arith.constant dense<0.000000e+00> : vector<16xf32>
    %29 = vector.multi_reduction <add>, %28, %cst_26 [1] : vector<16x32xf32> to vector<16xf32>
    %30 = vector.shape_cast %29 : vector<16xf32> to vector<16x1xf32>
    %cst_27 = arith.constant 0.0322580636 : f32
    %31 = vector.broadcast %cst_27 : f32 to vector<16x1xf32>
    %32 = arith.mulf %30, %31 : vector<16x1xf32>
    %33 = math.sqrt %32 : vector<16x1xf32>
    %34 = vector.broadcast %19 : vector<1x32xf32> to vector<16x32xf32>
    %35 = arith.mulf %34, %27 : vector<16x32xf32>
    %cst_28 = arith.constant 9.99999997E-7 : f32
    %36 = vector.broadcast %cst_28 : f32 to vector<16x1xf32>
    %37 = arith.addf %33, %36 : vector<16x1xf32>
    %38 = tpu.reciprocal %37 {approx = true} : vector<16x1xf32> -> vector<16x1xf32>
    %39 = vector.broadcast %38 : vector<16x1xf32> to vector<16x32xf32>
    %40 = arith.mulf %35, %39 : vector<16x32xf32>
    %41 = vector.broadcast %21 : vector<1x32xf32> to vector<16x32xf32>
    %42 = arith.addf %40, %41 : vector<16x32xf32>
    %c0_29 = arith.constant 0 : index
    %c0_30 = arith.constant 0 : index
    %c0_31 = arith.constant 0 : index
    %43 = vector.load %arg4[%c0_29, %c0_30, %c0_31] : memref<2x32x256xf32, #tpu.memory_space<vmem>>, vector<1x32x96xf32>
    %44 = vector.shape_cast %43 : vector<1x32x96xf32> to vector<32x96xf32>
    %cst_32 = arith.constant dense<0.000000e+00> : vector<16x96xf32>
    %45 = tpu.matmul %42, %44, %cst_32 {dimension_numbers = #tpu.dot_dimension_numbers<[1], [0], [0], [1], [0, 0, 1, 1], [], []>} : vector<16x32xf32>, vector<32x96xf32>, vector<16x96xf32> -> vector<16x96xf32>
    %c0_33 = arith.constant 0 : index
    %c0_34 = arith.constant 0 : index
    %c0_35 = arith.constant 0 : index
    %46 = vector.load %arg7[%c0_33, %c0_34, %c0_35] : memref<2x1x352xf32, #tpu.memory_space<vmem>>, vector<1x1x96xf32>
    %47 = vector.shape_cast %46 : vector<1x1x96xf32> to vector<1x96xf32>
    %48 = vector.broadcast %47 : vector<1x96xf32> to vector<16x96xf32>
    %49 = arith.addf %45, %48 : vector<16x96xf32>
    %50 = vector.extract_strided_slice %49 {offsets = [0, 0], sizes = [16, 32], strides = [1, 1]} : vector<16x96xf32> to vector<16x32xf32>
    %51 = vector.extract_strided_slice %49 {offsets = [0, 32], sizes = [16, 32], strides = [1, 1]} : vector<16x96xf32> to vector<16x32xf32>
    %52 = vector.extract_strided_slice %49 {offsets = [0, 64], sizes = [16, 32], strides = [1, 1]} : vector<16x96xf32> to vector<16x32xf32>
    %c0_36 = arith.constant 0 : index
    %c0_37 = arith.constant 0 : index
    %c96 = arith.constant 96 : index
    %53 = vector.load %arg4[%c0_36, %c0_37, %c96] : memref<2x32x256xf32, #tpu.memory_space<vmem>>, vector<1x32x32xf32>
    %54 = vector.shape_cast %53 : vector<1x32x32xf32> to vector<32x32xf32>
    %c0_38 = arith.constant 0 : index
    %c0_39 = arith.constant 0 : index
    %c96_40 = arith.constant 96 : index
    %55 = vector.load %arg7[%c0_38, %c0_39, %c96_40] : memref<2x1x352xf32, #tpu.memory_space<vmem>>, vector<1x1x32xf32>
    %56 = vector.shape_cast %55 : vector<1x1x32xf32> to vector<1x32xf32>
    %57 = vector.extract_strided_slice %50 {offsets = [0, 0], sizes = [16, 8], strides = [1, 1]} : vector<16x32xf32> to vector<16x8xf32>
    %58 = vector.extract_strided_slice %51 {offsets = [0, 0], sizes = [16, 8], strides = [1, 1]} : vector<16x32xf32> to vector<16x8xf32>
    %cst_41 = arith.constant dense<0.000000e+00> : vector<16x16xf32>
    %59 = tpu.matmul %57, %58, %cst_41 {dimension_numbers = #tpu.dot_dimension_numbers<[1], [1], [0], [0], [0, 0, 1, 0], [], []>} : vector<16x8xf32>, vector<16x8xf32>, vector<16x16xf32> -> vector<16x16xf32>
    %60 = vector.extract_strided_slice %50 {offsets = [0, 8], sizes = [16, 8], strides = [1, 1]} : vector<16x32xf32> to vector<16x8xf32>
    %61 = vector.extract_strided_slice %51 {offsets = [0, 8], sizes = [16, 8], strides = [1, 1]} : vector<16x32xf32> to vector<16x8xf32>
    %cst_42 = arith.constant dense<0.000000e+00> : vector<16x16xf32>
    %62 = tpu.matmul %60, %61, %cst_42 {dimension_numbers = #tpu.dot_dimension_numbers<[1], [1], [0], [0], [0, 0, 1, 0], [], []>} : vector<16x8xf32>, vector<16x8xf32>, vector<16x16xf32> -> vector<16x16xf32>
    %63 = vector.extract_strided_slice %50 {offsets = [0, 16], sizes = [16, 8], strides = [1, 1]} : vector<16x32xf32> to vector<16x8xf32>
    %64 = vector.extract_strided_slice %51 {offsets = [0, 16], sizes = [16, 8], strides = [1, 1]} : vector<16x32xf32> to vector<16x8xf32>
    %cst_43 = arith.constant dense<0.000000e+00> : vector<16x16xf32>
    %65 = tpu.matmul %63, %64, %cst_43 {dimension_numbers = #tpu.dot_dimension_numbers<[1], [1], [0], [0], [0, 0, 1, 0], [], []>} : vector<16x8xf32>, vector<16x8xf32>, vector<16x16xf32> -> vector<16x16xf32>
    %66 = vector.extract_strided_slice %50 {offsets = [0, 24], sizes = [16, 8], strides = [1, 1]} : vector<16x32xf32> to vector<16x8xf32>
    %67 = vector.extract_strided_slice %51 {offsets = [0, 24], sizes = [16, 8], strides = [1, 1]} : vector<16x32xf32> to vector<16x8xf32>
    %cst_44 = arith.constant dense<0.000000e+00> : vector<16x16xf32>
    %68 = tpu.matmul %66, %67, %cst_44 {dimension_numbers = #tpu.dot_dimension_numbers<[1], [1], [0], [0], [0, 0, 1, 0], [], []>} : vector<16x8xf32>, vector<16x8xf32>, vector<16x16xf32> -> vector<16x16xf32>
    %69 = tpu.concatenate %59, %62, %65, %68 in 0 : vector<16x16xf32>, vector<16x16xf32>, vector<16x16xf32>, vector<16x16xf32> -> vector<64x16xf32>
    %cst_45 = arith.constant 0.353553385 : f32
    %70 = vector.broadcast %cst_45 : f32 to vector<64x16xf32>
    %71 = arith.mulf %69, %70 : vector<64x16xf32>
    %72 = arith.addf %71, %2 : vector<64x16xf32>
    %cst_46 = arith.constant dense<0xFF800000> : vector<64xf32>
    %73 = vector.multi_reduction <maximumf>, %72, %cst_46 [1] : vector<64x16xf32> to vector<64xf32>
    %74 = vector.shape_cast %73 : vector<64xf32> to vector<64x1xf32>
    %75 = vector.broadcast %74 : vector<64x1xf32> to vector<64x16xf32>
    %76 = arith.subf %72, %75 : vector<64x16xf32>
    %77 = math.exp %76 : vector<64x16xf32>
    %cst_47 = arith.constant dense<0.000000e+00> : vector<64xf32>
    %78 = vector.multi_reduction <add>, %77, %cst_47 [1] : vector<64x16xf32> to vector<64xf32>
    %79 = vector.shape_cast %78 : vector<64xf32> to vector<64x1xf32>
    %80 = tpu.reciprocal %79 {approx = true} : vector<64x1xf32> -> vector<64x1xf32>
    %81 = vector.broadcast %80 : vector<64x1xf32> to vector<64x16xf32>
    %82 = arith.mulf %77, %81 : vector<64x16xf32>
    %83 = vector.extract_strided_slice %82 {offsets = [0, 0], sizes = [16, 16], strides = [1, 1]} : vector<64x16xf32> to vector<16x16xf32>
    %84 = vector.extract_strided_slice %52 {offsets = [0, 0], sizes = [16, 8], strides = [1, 1]} : vector<16x32xf32> to vector<16x8xf32>
    %cst_48 = arith.constant dense<0.000000e+00> : vector<16x8xf32>
    %85 = tpu.matmul %83, %84, %cst_48 {dimension_numbers = #tpu.dot_dimension_numbers<[1], [0], [0], [1], [0, 0, 1, 1], [], []>} : vector<16x16xf32>, vector<16x8xf32>, vector<16x8xf32> -> vector<16x8xf32>
    %86 = vector.extract_strided_slice %82 {offsets = [16, 0], sizes = [16, 16], strides = [1, 1]} : vector<64x16xf32> to vector<16x16xf32>
    %87 = vector.extract_strided_slice %52 {offsets = [0, 8], sizes = [16, 8], strides = [1, 1]} : vector<16x32xf32> to vector<16x8xf32>
    %cst_49 = arith.constant dense<0.000000e+00> : vector<16x8xf32>
    %88 = tpu.matmul %86, %87, %cst_49 {dimension_numbers = #tpu.dot_dimension_numbers<[1], [0], [0], [1], [0, 0, 1, 1], [], []>} : vector<16x16xf32>, vector<16x8xf32>, vector<16x8xf32> -> vector<16x8xf32>
    %89 = vector.extract_strided_slice %82 {offsets = [32, 0], sizes = [16, 16], strides = [1, 1]} : vector<64x16xf32> to vector<16x16xf32>
    %90 = vector.extract_strided_slice %52 {offsets = [0, 16], sizes = [16, 8], strides = [1, 1]} : vector<16x32xf32> to vector<16x8xf32>
    %cst_50 = arith.constant dense<0.000000e+00> : vector<16x8xf32>
    %91 = tpu.matmul %89, %90, %cst_50 {dimension_numbers = #tpu.dot_dimension_numbers<[1], [0], [0], [1], [0, 0, 1, 1], [], []>} : vector<16x16xf32>, vector<16x8xf32>, vector<16x8xf32> -> vector<16x8xf32>
    %92 = vector.extract_strided_slice %82 {offsets = [48, 0], sizes = [16, 16], strides = [1, 1]} : vector<64x16xf32> to vector<16x16xf32>
    %93 = vector.extract_strided_slice %52 {offsets = [0, 24], sizes = [16, 8], strides = [1, 1]} : vector<16x32xf32> to vector<16x8xf32>
    %cst_51 = arith.constant dense<0.000000e+00> : vector<16x8xf32>
    %94 = tpu.matmul %92, %93, %cst_51 {dimension_numbers = #tpu.dot_dimension_numbers<[1], [0], [0], [1], [0, 0, 1, 1], [], []>} : vector<16x16xf32>, vector<16x8xf32>, vector<16x8xf32> -> vector<16x8xf32>
    %95 = tpu.concatenate %85, %88, %91, %94 in 1 : vector<16x8xf32>, vector<16x8xf32>, vector<16x8xf32>, vector<16x8xf32> -> vector<16x32xf32>
    %cst_52 = arith.constant dense<0.000000e+00> : vector<16x32xf32>
    %96 = tpu.matmul %95, %54, %cst_52 {dimension_numbers = #tpu.dot_dimension_numbers<[1], [0], [0], [1], [0, 0, 1, 1], [], []>} : vector<16x32xf32>, vector<32x32xf32>, vector<16x32xf32> -> vector<16x32xf32>
    %97 = vector.broadcast %56 : vector<1x32xf32> to vector<16x32xf32>
    %98 = arith.addf %96, %97 : vector<16x32xf32>
    %99 = arith.addf %0, %98 : vector<16x32xf32>
    %c0_53 = arith.constant 0 : index
    %c2 = arith.constant 2 : index
    %c0_54 = arith.constant 0 : index
    %100 = vector.load %arg8[%c0_53, %c2, %c0_54] : memref<2x6x32xf32, #tpu.memory_space<vmem>>, vector<1x1x32xf32>
    %101 = vector.shape_cast %100 : vector<1x1x32xf32> to vector<1x32xf32>
    %c0_55 = arith.constant 0 : index
    %c3 = arith.constant 3 : index
    %c0_56 = arith.constant 0 : index
    %102 = vector.load %arg8[%c0_55, %c3, %c0_56] : memref<2x6x32xf32, #tpu.memory_space<vmem>>, vector<1x1x32xf32>
    %103 = vector.shape_cast %102 : vector<1x1x32xf32> to vector<1x32xf32>
    %cst_57 = arith.constant dense<0.000000e+00> : vector<16xf32>
    %104 = vector.multi_reduction <add>, %99, %cst_57 [1] : vector<16x32xf32> to vector<16xf32>
    %105 = vector.shape_cast %104 : vector<16xf32> to vector<16x1xf32>
    %cst_58 = arith.constant 3.200000e+01 : f32
    %106 = vector.broadcast %cst_58 : f32 to vector<16x1xf32>
    %107 = arith.divf %105, %106 : vector<16x1xf32>
    %108 = vector.broadcast %107 : vector<16x1xf32> to vector<16x32xf32>
    %109 = arith.subf %99, %108 : vector<16x32xf32>
    %110 = arith.mulf %109, %109 : vector<16x32xf32>
    %cst_59 = arith.constant dense<0.000000e+00> : vector<16xf32>
    %111 = vector.multi_reduction <add>, %110, %cst_59 [1] : vector<16x32xf32> to vector<16xf32>
    %112 = vector.shape_cast %111 : vector<16xf32> to vector<16x1xf32>
    %cst_60 = arith.constant 0.0322580636 : f32
    %113 = vector.broadcast %cst_60 : f32 to vector<16x1xf32>
    %114 = arith.mulf %112, %113 : vector<16x1xf32>
    %115 = math.sqrt %114 : vector<16x1xf32>
    %116 = vector.broadcast %101 : vector<1x32xf32> to vector<16x32xf32>
    %117 = arith.mulf %116, %109 : vector<16x32xf32>
    %cst_61 = arith.constant 9.99999997E-7 : f32
    %118 = vector.broadcast %cst_61 : f32 to vector<16x1xf32>
    %119 = arith.addf %115, %118 : vector<16x1xf32>
    %120 = tpu.reciprocal %119 {approx = true} : vector<16x1xf32> -> vector<16x1xf32>
    %121 = vector.broadcast %120 : vector<16x1xf32> to vector<16x32xf32>
    %122 = arith.mulf %117, %121 : vector<16x32xf32>
    %123 = vector.broadcast %103 : vector<1x32xf32> to vector<16x32xf32>
    %124 = arith.addf %122, %123 : vector<16x32xf32>
    %c0_62 = arith.constant 0 : index
    %c0_63 = arith.constant 0 : index
    %c128 = arith.constant 128 : index
    %125 = vector.load %arg4[%c0_62, %c0_63, %c128] : memref<2x32x256xf32, #tpu.memory_space<vmem>>, vector<1x32x32xf32>
    %126 = vector.shape_cast %125 : vector<1x32x32xf32> to vector<32x32xf32>
    %cst_64 = arith.constant dense<0.000000e+00> : vector<16x32xf32>
    %127 = tpu.matmul %124, %126, %cst_64 {dimension_numbers = #tpu.dot_dimension_numbers<[1], [0], [0], [1], [0, 0, 1, 1], [], []>} : vector<16x32xf32>, vector<32x32xf32>, vector<16x32xf32> -> vector<16x32xf32>
    %c0_65 = arith.constant 0 : index
    %c0_66 = arith.constant 0 : index
    %c128_67 = arith.constant 128 : index
    %128 = vector.load %arg7[%c0_65, %c0_66, %c128_67] : memref<2x1x352xf32, #tpu.memory_space<vmem>>, vector<1x1x32xf32>
    %129 = vector.shape_cast %128 : vector<1x1x32xf32> to vector<1x32xf32>
    %130 = vector.broadcast %129 : vector<1x32xf32> to vector<16x32xf32>
    %131 = arith.addf %127, %130 : vector<16x32xf32>
    %132 = vector.extract_strided_slice %10 {offsets = [0, 0], sizes = [16, 32], strides = [1, 1]} : vector<16x64xf32> to vector<16x32xf32>
    %133 = vector.extract_strided_slice %10 {offsets = [0, 32], sizes = [16, 32], strides = [1, 1]} : vector<16x64xf32> to vector<16x32xf32>
    %c0_68 = arith.constant 0 : index
    %c0_69 = arith.constant 0 : index
    %c224 = arith.constant 224 : index
    %134 = vector.load %arg4[%c0_68, %c0_69, %c224] : memref<2x32x256xf32, #tpu.memory_space<vmem>>, vector<1x32x32xf32>
    %135 = vector.shape_cast %134 : vector<1x32x32xf32> to vector<32x32xf32>
    %c0_70 = arith.constant 0 : index
    %c0_71 = arith.constant 0 : index
    %c224_72 = arith.constant 224 : index
    %136 = vector.load %arg7[%c0_70, %c0_71, %c224_72] : memref<2x1x352xf32, #tpu.memory_space<vmem>>, vector<1x1x32xf32>
    %137 = vector.shape_cast %136 : vector<1x1x32xf32> to vector<1x32xf32>
    %138 = vector.extract_strided_slice %131 {offsets = [0, 0], sizes = [16, 8], strides = [1, 1]} : vector<16x32xf32> to vector<16x8xf32>
    %139 = vector.extract_strided_slice %132 {offsets = [0, 0], sizes = [16, 8], strides = [1, 1]} : vector<16x32xf32> to vector<16x8xf32>
    %cst_73 = arith.constant dense<0.000000e+00> : vector<16x16xf32>
    %140 = tpu.matmul %138, %139, %cst_73 {dimension_numbers = #tpu.dot_dimension_numbers<[1], [1], [0], [0], [0, 0, 1, 0], [], []>} : vector<16x8xf32>, vector<16x8xf32>, vector<16x16xf32> -> vector<16x16xf32>
    %141 = vector.extract_strided_slice %131 {offsets = [0, 8], sizes = [16, 8], strides = [1, 1]} : vector<16x32xf32> to vector<16x8xf32>
    %142 = vector.extract_strided_slice %132 {offsets = [0, 8], sizes = [16, 8], strides = [1, 1]} : vector<16x32xf32> to vector<16x8xf32>
    %cst_74 = arith.constant dense<0.000000e+00> : vector<16x16xf32>
    %143 = tpu.matmul %141, %142, %cst_74 {dimension_numbers = #tpu.dot_dimension_numbers<[1], [1], [0], [0], [0, 0, 1, 0], [], []>} : vector<16x8xf32>, vector<16x8xf32>, vector<16x16xf32> -> vector<16x16xf32>
    %144 = vector.extract_strided_slice %131 {offsets = [0, 16], sizes = [16, 8], strides = [1, 1]} : vector<16x32xf32> to vector<16x8xf32>
    %145 = vector.extract_strided_slice %132 {offsets = [0, 16], sizes = [16, 8], strides = [1, 1]} : vector<16x32xf32> to vector<16x8xf32>
    %cst_75 = arith.constant dense<0.000000e+00> : vector<16x16xf32>
    %146 = tpu.matmul %144, %145, %cst_75 {dimension_numbers = #tpu.dot_dimension_numbers<[1], [1], [0], [0], [0, 0, 1, 0], [], []>} : vector<16x8xf32>, vector<16x8xf32>, vector<16x16xf32> -> vector<16x16xf32>
    %147 = vector.extract_strided_slice %131 {offsets = [0, 24], sizes = [16, 8], strides = [1, 1]} : vector<16x32xf32> to vector<16x8xf32>
    %148 = vector.extract_strided_slice %132 {offsets = [0, 24], sizes = [16, 8], strides = [1, 1]} : vector<16x32xf32> to vector<16x8xf32>
    %cst_76 = arith.constant dense<0.000000e+00> : vector<16x16xf32>
    %149 = tpu.matmul %147, %148, %cst_76 {dimension_numbers = #tpu.dot_dimension_numbers<[1], [1], [0], [0], [0, 0, 1, 0], [], []>} : vector<16x8xf32>, vector<16x8xf32>, vector<16x16xf32> -> vector<16x16xf32>
    %150 = tpu.concatenate %140, %143, %146, %149 in 0 : vector<16x16xf32>, vector<16x16xf32>, vector<16x16xf32>, vector<16x16xf32> -> vector<64x16xf32>
    %cst_77 = arith.constant 0.353553385 : f32
    %151 = vector.broadcast %cst_77 : f32 to vector<64x16xf32>
    %152 = arith.mulf %150, %151 : vector<64x16xf32>
    %153 = arith.addf %152, %3 : vector<64x16xf32>
    %cst_78 = arith.constant dense<0xFF800000> : vector<64xf32>
    %154 = vector.multi_reduction <maximumf>, %153, %cst_78 [1] : vector<64x16xf32> to vector<64xf32>
    %155 = vector.shape_cast %154 : vector<64xf32> to vector<64x1xf32>
    %156 = vector.broadcast %155 : vector<64x1xf32> to vector<64x16xf32>
    %157 = arith.subf %153, %156 : vector<64x16xf32>
    %158 = math.exp %157 : vector<64x16xf32>
    %cst_79 = arith.constant dense<0.000000e+00> : vector<64xf32>
    %159 = vector.multi_reduction <add>, %158, %cst_79 [1] : vector<64x16xf32> to vector<64xf32>
    %160 = vector.shape_cast %159 : vector<64xf32> to vector<64x1xf32>
    %161 = tpu.reciprocal %160 {approx = true} : vector<64x1xf32> -> vector<64x1xf32>
    %162 = vector.broadcast %161 : vector<64x1xf32> to vector<64x16xf32>
    %163 = arith.mulf %158, %162 : vector<64x16xf32>
    %164 = vector.extract_strided_slice %163 {offsets = [0, 0], sizes = [16, 16], strides = [1, 1]} : vector<64x16xf32> to vector<16x16xf32>
    %165 = vector.extract_strided_slice %133 {offsets = [0, 0], sizes = [16, 8], strides = [1, 1]} : vector<16x32xf32> to vector<16x8xf32>
    %cst_80 = arith.constant dense<0.000000e+00> : vector<16x8xf32>
    %166 = tpu.matmul %164, %165, %cst_80 {dimension_numbers = #tpu.dot_dimension_numbers<[1], [0], [0], [1], [0, 0, 1, 1], [], []>} : vector<16x16xf32>, vector<16x8xf32>, vector<16x8xf32> -> vector<16x8xf32>
    %167 = vector.extract_strided_slice %163 {offsets = [16, 0], sizes = [16, 16], strides = [1, 1]} : vector<64x16xf32> to vector<16x16xf32>
    %168 = vector.extract_strided_slice %133 {offsets = [0, 8], sizes = [16, 8], strides = [1, 1]} : vector<16x32xf32> to vector<16x8xf32>
    %cst_81 = arith.constant dense<0.000000e+00> : vector<16x8xf32>
    %169 = tpu.matmul %167, %168, %cst_81 {dimension_numbers = #tpu.dot_dimension_numbers<[1], [0], [0], [1], [0, 0, 1, 1], [], []>} : vector<16x16xf32>, vector<16x8xf32>, vector<16x8xf32> -> vector<16x8xf32>
    %170 = vector.extract_strided_slice %163 {offsets = [32, 0], sizes = [16, 16], strides = [1, 1]} : vector<64x16xf32> to vector<16x16xf32>
    %171 = vector.extract_strided_slice %133 {offsets = [0, 16], sizes = [16, 8], strides = [1, 1]} : vector<16x32xf32> to vector<16x8xf32>
    %cst_82 = arith.constant dense<0.000000e+00> : vector<16x8xf32>
    %172 = tpu.matmul %170, %171, %cst_82 {dimension_numbers = #tpu.dot_dimension_numbers<[1], [0], [0], [1], [0, 0, 1, 1], [], []>} : vector<16x16xf32>, vector<16x8xf32>, vector<16x8xf32> -> vector<16x8xf32>
    %173 = vector.extract_strided_slice %163 {offsets = [48, 0], sizes = [16, 16], strides = [1, 1]} : vector<64x16xf32> to vector<16x16xf32>
    %174 = vector.extract_strided_slice %133 {offsets = [0, 24], sizes = [16, 8], strides = [1, 1]} : vector<16x32xf32> to vector<16x8xf32>
    %cst_83 = arith.constant dense<0.000000e+00> : vector<16x8xf32>
    %175 = tpu.matmul %173, %174, %cst_83 {dimension_numbers = #tpu.dot_dimension_numbers<[1], [0], [0], [1], [0, 0, 1, 1], [], []>} : vector<16x16xf32>, vector<16x8xf32>, vector<16x8xf32> -> vector<16x8xf32>
    %176 = tpu.concatenate %166, %169, %172, %175 in 1 : vector<16x8xf32>, vector<16x8xf32>, vector<16x8xf32>, vector<16x8xf32> -> vector<16x32xf32>
    %cst_84 = arith.constant dense<0.000000e+00> : vector<16x32xf32>
    %177 = tpu.matmul %176, %135, %cst_84 {dimension_numbers = #tpu.dot_dimension_numbers<[1], [0], [0], [1], [0, 0, 1, 1], [], []>} : vector<16x32xf32>, vector<32x32xf32>, vector<16x32xf32> -> vector<16x32xf32>
    %178 = vector.broadcast %137 : vector<1x32xf32> to vector<16x32xf32>
    %179 = arith.addf %177, %178 : vector<16x32xf32>
    %180 = arith.addf %99, %179 : vector<16x32xf32>
    %c0_85 = arith.constant 0 : index
    %c4 = arith.constant 4 : index
    %c0_86 = arith.constant 0 : index
    %181 = vector.load %arg8[%c0_85, %c4, %c0_86] : memref<2x6x32xf32, #tpu.memory_space<vmem>>, vector<1x1x32xf32>
    %182 = vector.shape_cast %181 : vector<1x1x32xf32> to vector<1x32xf32>
    %c0_87 = arith.constant 0 : index
    %c5 = arith.constant 5 : index
    %c0_88 = arith.constant 0 : index
    %183 = vector.load %arg8[%c0_87, %c5, %c0_88] : memref<2x6x32xf32, #tpu.memory_space<vmem>>, vector<1x1x32xf32>
    %184 = vector.shape_cast %183 : vector<1x1x32xf32> to vector<1x32xf32>
    %cst_89 = arith.constant dense<0.000000e+00> : vector<16xf32>
    %185 = vector.multi_reduction <add>, %180, %cst_89 [1] : vector<16x32xf32> to vector<16xf32>
    %186 = vector.shape_cast %185 : vector<16xf32> to vector<16x1xf32>
    %cst_90 = arith.constant 3.200000e+01 : f32
    %187 = vector.broadcast %cst_90 : f32 to vector<16x1xf32>
    %188 = arith.divf %186, %187 : vector<16x1xf32>
    %189 = vector.broadcast %188 : vector<16x1xf32> to vector<16x32xf32>
    %190 = arith.subf %180, %189 : vector<16x32xf32>
    %191 = arith.mulf %190, %190 : vector<16x32xf32>
    %cst_91 = arith.constant dense<0.000000e+00> : vector<16xf32>
    %192 = vector.multi_reduction <add>, %191, %cst_91 [1] : vector<16x32xf32> to vector<16xf32>
    %193 = vector.shape_cast %192 : vector<16xf32> to vector<16x1xf32>
    %cst_92 = arith.constant 0.0322580636 : f32
    %194 = vector.broadcast %cst_92 : f32 to vector<16x1xf32>
    %195 = arith.mulf %193, %194 : vector<16x1xf32>
    %196 = math.sqrt %195 : vector<16x1xf32>
    %197 = vector.broadcast %182 : vector<1x32xf32> to vector<16x32xf32>
    %198 = arith.mulf %197, %190 : vector<16x32xf32>
    %cst_93 = arith.constant 9.99999997E-7 : f32
    %199 = vector.broadcast %cst_93 : f32 to vector<16x1xf32>
    %200 = arith.addf %196, %199 : vector<16x1xf32>
    %201 = tpu.reciprocal %200 {approx = true} : vector<16x1xf32> -> vector<16x1xf32>
    %202 = vector.broadcast %201 : vector<16x1xf32> to vector<16x32xf32>
    %203 = arith.mulf %198, %202 : vector<16x32xf32>
    %204 = vector.broadcast %184 : vector<1x32xf32> to vector<16x32xf32>
    %205 = arith.addf %203, %204 : vector<16x32xf32>
    %c0_94 = arith.constant 0 : index
    %c0_95 = arith.constant 0 : index
    %c0_96 = arith.constant 0 : index
    %206 = vector.load %arg5[%c0_94, %c0_95, %c0_96] : memref<2x32x64xf32, #tpu.memory_space<vmem>>, vector<1x32x64xf32>
    %207 = vector.shape_cast %206 : vector<1x32x64xf32> to vector<32x64xf32>
    %cst_97 = arith.constant dense<0.000000e+00> : vector<16x64xf32>
    %208 = tpu.matmul %205, %207, %cst_97 {dimension_numbers = #tpu.dot_dimension_numbers<[1], [0], [0], [1], [0, 0, 1, 1], [], []>} : vector<16x32xf32>, vector<32x64xf32>, vector<16x64xf32> -> vector<16x64xf32>
    %c0_98 = arith.constant 0 : index
    %c0_99 = arith.constant 0 : index
    %c256 = arith.constant 256 : index
    %209 = vector.load %arg7[%c0_98, %c0_99, %c256] : memref<2x1x352xf32, #tpu.memory_space<vmem>>, vector<1x1x64xf32>
    %210 = vector.shape_cast %209 : vector<1x1x64xf32> to vector<1x64xf32>
    %211 = vector.broadcast %210 : vector<1x64xf32> to vector<16x64xf32>
    %212 = arith.addf %208, %211 : vector<16x64xf32>
    %cst_100 = arith.constant 0.000000e+00 : f32
    %213 = vector.broadcast %cst_100 : f32 to vector<16x64xf32>
    %214 = arith.maximumf %212, %213 : vector<16x64xf32>
    %c0_101 = arith.constant 0 : index
    %c0_102 = arith.constant 0 : index
    %c0_103 = arith.constant 0 : index
    %215 = vector.load %arg6[%c0_101, %c0_102, %c0_103] : memref<2x64x32xf32, #tpu.memory_space<vmem>>, vector<1x64x32xf32>
    %216 = vector.shape_cast %215 : vector<1x64x32xf32> to vector<64x32xf32>
    %cst_104 = arith.constant dense<0.000000e+00> : vector<16x32xf32>
    %217 = tpu.matmul %214, %216, %cst_104 {dimension_numbers = #tpu.dot_dimension_numbers<[1], [0], [0], [1], [0, 0, 1, 1], [], []>} : vector<16x64xf32>, vector<64x32xf32>, vector<16x32xf32> -> vector<16x32xf32>
    %218 = arith.addf %180, %217 : vector<16x32xf32>
    %c0_105 = arith.constant 0 : index
    %c0_106 = arith.constant 0 : index
    %c320 = arith.constant 320 : index
    %219 = vector.load %arg7[%c0_105, %c0_106, %c320] : memref<2x1x352xf32, #tpu.memory_space<vmem>>, vector<1x1x32xf32>
    %220 = vector.shape_cast %219 : vector<1x1x32xf32> to vector<1x32xf32>
    %221 = vector.broadcast %220 : vector<1x32xf32> to vector<16x32xf32>
    %222 = arith.addf %218, %221 : vector<16x32xf32>
    %c1_107 = arith.constant 1 : index
    %c0_108 = arith.constant 0 : index
    %c0_109 = arith.constant 0 : index
    %223 = vector.load %arg8[%c1_107, %c0_108, %c0_109] : memref<2x6x32xf32, #tpu.memory_space<vmem>>, vector<1x1x32xf32>
    %224 = vector.shape_cast %223 : vector<1x1x32xf32> to vector<1x32xf32>
    %c1_110 = arith.constant 1 : index
    %c1_111 = arith.constant 1 : index
    %c0_112 = arith.constant 0 : index
    %225 = vector.load %arg8[%c1_110, %c1_111, %c0_112] : memref<2x6x32xf32, #tpu.memory_space<vmem>>, vector<1x1x32xf32>
    %226 = vector.shape_cast %225 : vector<1x1x32xf32> to vector<1x32xf32>
    %cst_113 = arith.constant dense<0.000000e+00> : vector<16xf32>
    %227 = vector.multi_reduction <add>, %222, %cst_113 [1] : vector<16x32xf32> to vector<16xf32>
    %228 = vector.shape_cast %227 : vector<16xf32> to vector<16x1xf32>
    %cst_114 = arith.constant 3.200000e+01 : f32
    %229 = vector.broadcast %cst_114 : f32 to vector<16x1xf32>
    %230 = arith.divf %228, %229 : vector<16x1xf32>
    %231 = vector.broadcast %230 : vector<16x1xf32> to vector<16x32xf32>
    %232 = arith.subf %222, %231 : vector<16x32xf32>
    %233 = arith.mulf %232, %232 : vector<16x32xf32>
    %cst_115 = arith.constant dense<0.000000e+00> : vector<16xf32>
    %234 = vector.multi_reduction <add>, %233, %cst_115 [1] : vector<16x32xf32> to vector<16xf32>
    %235 = vector.shape_cast %234 : vector<16xf32> to vector<16x1xf32>
    %cst_116 = arith.constant 0.0322580636 : f32
    %236 = vector.broadcast %cst_116 : f32 to vector<16x1xf32>
    %237 = arith.mulf %235, %236 : vector<16x1xf32>
    %238 = math.sqrt %237 : vector<16x1xf32>
    %239 = vector.broadcast %224 : vector<1x32xf32> to vector<16x32xf32>
    %240 = arith.mulf %239, %232 : vector<16x32xf32>
    %cst_117 = arith.constant 9.99999997E-7 : f32
    %241 = vector.broadcast %cst_117 : f32 to vector<16x1xf32>
    %242 = arith.addf %238, %241 : vector<16x1xf32>
    %243 = tpu.reciprocal %242 {approx = true} : vector<16x1xf32> -> vector<16x1xf32>
    %244 = vector.broadcast %243 : vector<16x1xf32> to vector<16x32xf32>
    %245 = arith.mulf %240, %244 : vector<16x32xf32>
    %246 = vector.broadcast %226 : vector<1x32xf32> to vector<16x32xf32>
    %247 = arith.addf %245, %246 : vector<16x32xf32>
    %c1_118 = arith.constant 1 : index
    %c0_119 = arith.constant 0 : index
    %c0_120 = arith.constant 0 : index
    %248 = vector.load %arg4[%c1_118, %c0_119, %c0_120] : memref<2x32x256xf32, #tpu.memory_space<vmem>>, vector<1x32x96xf32>
    %249 = vector.shape_cast %248 : vector<1x32x96xf32> to vector<32x96xf32>
    %cst_121 = arith.constant dense<0.000000e+00> : vector<16x96xf32>
    %250 = tpu.matmul %247, %249, %cst_121 {dimension_numbers = #tpu.dot_dimension_numbers<[1], [0], [0], [1], [0, 0, 1, 1], [], []>} : vector<16x32xf32>, vector<32x96xf32>, vector<16x96xf32> -> vector<16x96xf32>
    %c1_122 = arith.constant 1 : index
    %c0_123 = arith.constant 0 : index
    %c0_124 = arith.constant 0 : index
    %251 = vector.load %arg7[%c1_122, %c0_123, %c0_124] : memref<2x1x352xf32, #tpu.memory_space<vmem>>, vector<1x1x96xf32>
    %252 = vector.shape_cast %251 : vector<1x1x96xf32> to vector<1x96xf32>
    %253 = vector.broadcast %252 : vector<1x96xf32> to vector<16x96xf32>
    %254 = arith.addf %250, %253 : vector<16x96xf32>
    %255 = vector.extract_strided_slice %254 {offsets = [0, 0], sizes = [16, 32], strides = [1, 1]} : vector<16x96xf32> to vector<16x32xf32>
    %256 = vector.extract_strided_slice %254 {offsets = [0, 32], sizes = [16, 32], strides = [1, 1]} : vector<16x96xf32> to vector<16x32xf32>
    %257 = vector.extract_strided_slice %254 {offsets = [0, 64], sizes = [16, 32], strides = [1, 1]} : vector<16x96xf32> to vector<16x32xf32>
    %c1_125 = arith.constant 1 : index
    %c0_126 = arith.constant 0 : index
    %c96_127 = arith.constant 96 : index
    %258 = vector.load %arg4[%c1_125, %c0_126, %c96_127] : memref<2x32x256xf32, #tpu.memory_space<vmem>>, vector<1x32x32xf32>
    %259 = vector.shape_cast %258 : vector<1x32x32xf32> to vector<32x32xf32>
    %c1_128 = arith.constant 1 : index
    %c0_129 = arith.constant 0 : index
    %c96_130 = arith.constant 96 : index
    %260 = vector.load %arg7[%c1_128, %c0_129, %c96_130] : memref<2x1x352xf32, #tpu.memory_space<vmem>>, vector<1x1x32xf32>
    %261 = vector.shape_cast %260 : vector<1x1x32xf32> to vector<1x32xf32>
    %262 = vector.extract_strided_slice %255 {offsets = [0, 0], sizes = [16, 8], strides = [1, 1]} : vector<16x32xf32> to vector<16x8xf32>
    %263 = vector.extract_strided_slice %256 {offsets = [0, 0], sizes = [16, 8], strides = [1, 1]} : vector<16x32xf32> to vector<16x8xf32>
    %cst_131 = arith.constant dense<0.000000e+00> : vector<16x16xf32>
    %264 = tpu.matmul %262, %263, %cst_131 {dimension_numbers = #tpu.dot_dimension_numbers<[1], [1], [0], [0], [0, 0, 1, 0], [], []>} : vector<16x8xf32>, vector<16x8xf32>, vector<16x16xf32> -> vector<16x16xf32>
    %265 = vector.extract_strided_slice %255 {offsets = [0, 8], sizes = [16, 8], strides = [1, 1]} : vector<16x32xf32> to vector<16x8xf32>
    %266 = vector.extract_strided_slice %256 {offsets = [0, 8], sizes = [16, 8], strides = [1, 1]} : vector<16x32xf32> to vector<16x8xf32>
    %cst_132 = arith.constant dense<0.000000e+00> : vector<16x16xf32>
    %267 = tpu.matmul %265, %266, %cst_132 {dimension_numbers = #tpu.dot_dimension_numbers<[1], [1], [0], [0], [0, 0, 1, 0], [], []>} : vector<16x8xf32>, vector<16x8xf32>, vector<16x16xf32> -> vector<16x16xf32>
    %268 = vector.extract_strided_slice %255 {offsets = [0, 16], sizes = [16, 8], strides = [1, 1]} : vector<16x32xf32> to vector<16x8xf32>
    %269 = vector.extract_strided_slice %256 {offsets = [0, 16], sizes = [16, 8], strides = [1, 1]} : vector<16x32xf32> to vector<16x8xf32>
    %cst_133 = arith.constant dense<0.000000e+00> : vector<16x16xf32>
    %270 = tpu.matmul %268, %269, %cst_133 {dimension_numbers = #tpu.dot_dimension_numbers<[1], [1], [0], [0], [0, 0, 1, 0], [], []>} : vector<16x8xf32>, vector<16x8xf32>, vector<16x16xf32> -> vector<16x16xf32>
    %271 = vector.extract_strided_slice %255 {offsets = [0, 24], sizes = [16, 8], strides = [1, 1]} : vector<16x32xf32> to vector<16x8xf32>
    %272 = vector.extract_strided_slice %256 {offsets = [0, 24], sizes = [16, 8], strides = [1, 1]} : vector<16x32xf32> to vector<16x8xf32>
    %cst_134 = arith.constant dense<0.000000e+00> : vector<16x16xf32>
    %273 = tpu.matmul %271, %272, %cst_134 {dimension_numbers = #tpu.dot_dimension_numbers<[1], [1], [0], [0], [0, 0, 1, 0], [], []>} : vector<16x8xf32>, vector<16x8xf32>, vector<16x16xf32> -> vector<16x16xf32>
    %274 = tpu.concatenate %264, %267, %270, %273 in 0 : vector<16x16xf32>, vector<16x16xf32>, vector<16x16xf32>, vector<16x16xf32> -> vector<64x16xf32>
    %cst_135 = arith.constant 0.353553385 : f32
    %275 = vector.broadcast %cst_135 : f32 to vector<64x16xf32>
    %276 = arith.mulf %274, %275 : vector<64x16xf32>
    %277 = arith.addf %276, %2 : vector<64x16xf32>
    %cst_136 = arith.constant dense<0xFF800000> : vector<64xf32>
    %278 = vector.multi_reduction <maximumf>, %277, %cst_136 [1] : vector<64x16xf32> to vector<64xf32>
    %279 = vector.shape_cast %278 : vector<64xf32> to vector<64x1xf32>
    %280 = vector.broadcast %279 : vector<64x1xf32> to vector<64x16xf32>
    %281 = arith.subf %277, %280 : vector<64x16xf32>
    %282 = math.exp %281 : vector<64x16xf32>
    %cst_137 = arith.constant dense<0.000000e+00> : vector<64xf32>
    %283 = vector.multi_reduction <add>, %282, %cst_137 [1] : vector<64x16xf32> to vector<64xf32>
    %284 = vector.shape_cast %283 : vector<64xf32> to vector<64x1xf32>
    %285 = tpu.reciprocal %284 {approx = true} : vector<64x1xf32> -> vector<64x1xf32>
    %286 = vector.broadcast %285 : vector<64x1xf32> to vector<64x16xf32>
    %287 = arith.mulf %282, %286 : vector<64x16xf32>
    %288 = vector.extract_strided_slice %287 {offsets = [0, 0], sizes = [16, 16], strides = [1, 1]} : vector<64x16xf32> to vector<16x16xf32>
    %289 = vector.extract_strided_slice %257 {offsets = [0, 0], sizes = [16, 8], strides = [1, 1]} : vector<16x32xf32> to vector<16x8xf32>
    %cst_138 = arith.constant dense<0.000000e+00> : vector<16x8xf32>
    %290 = tpu.matmul %288, %289, %cst_138 {dimension_numbers = #tpu.dot_dimension_numbers<[1], [0], [0], [1], [0, 0, 1, 1], [], []>} : vector<16x16xf32>, vector<16x8xf32>, vector<16x8xf32> -> vector<16x8xf32>
    %291 = vector.extract_strided_slice %287 {offsets = [16, 0], sizes = [16, 16], strides = [1, 1]} : vector<64x16xf32> to vector<16x16xf32>
    %292 = vector.extract_strided_slice %257 {offsets = [0, 8], sizes = [16, 8], strides = [1, 1]} : vector<16x32xf32> to vector<16x8xf32>
    %cst_139 = arith.constant dense<0.000000e+00> : vector<16x8xf32>
    %293 = tpu.matmul %291, %292, %cst_139 {dimension_numbers = #tpu.dot_dimension_numbers<[1], [0], [0], [1], [0, 0, 1, 1], [], []>} : vector<16x16xf32>, vector<16x8xf32>, vector<16x8xf32> -> vector<16x8xf32>
    %294 = vector.extract_strided_slice %287 {offsets = [32, 0], sizes = [16, 16], strides = [1, 1]} : vector<64x16xf32> to vector<16x16xf32>
    %295 = vector.extract_strided_slice %257 {offsets = [0, 16], sizes = [16, 8], strides = [1, 1]} : vector<16x32xf32> to vector<16x8xf32>
    %cst_140 = arith.constant dense<0.000000e+00> : vector<16x8xf32>
    %296 = tpu.matmul %294, %295, %cst_140 {dimension_numbers = #tpu.dot_dimension_numbers<[1], [0], [0], [1], [0, 0, 1, 1], [], []>} : vector<16x16xf32>, vector<16x8xf32>, vector<16x8xf32> -> vector<16x8xf32>
    %297 = vector.extract_strided_slice %287 {offsets = [48, 0], sizes = [16, 16], strides = [1, 1]} : vector<64x16xf32> to vector<16x16xf32>
    %298 = vector.extract_strided_slice %257 {offsets = [0, 24], sizes = [16, 8], strides = [1, 1]} : vector<16x32xf32> to vector<16x8xf32>
    %cst_141 = arith.constant dense<0.000000e+00> : vector<16x8xf32>
    %299 = tpu.matmul %297, %298, %cst_141 {dimension_numbers = #tpu.dot_dimension_numbers<[1], [0], [0], [1], [0, 0, 1, 1], [], []>} : vector<16x16xf32>, vector<16x8xf32>, vector<16x8xf32> -> vector<16x8xf32>
    %300 = tpu.concatenate %290, %293, %296, %299 in 1 : vector<16x8xf32>, vector<16x8xf32>, vector<16x8xf32>, vector<16x8xf32> -> vector<16x32xf32>
    %cst_142 = arith.constant dense<0.000000e+00> : vector<16x32xf32>
    %301 = tpu.matmul %300, %259, %cst_142 {dimension_numbers = #tpu.dot_dimension_numbers<[1], [0], [0], [1], [0, 0, 1, 1], [], []>} : vector<16x32xf32>, vector<32x32xf32>, vector<16x32xf32> -> vector<16x32xf32>
    %302 = vector.broadcast %261 : vector<1x32xf32> to vector<16x32xf32>
    %303 = arith.addf %301, %302 : vector<16x32xf32>
    %304 = arith.addf %222, %303 : vector<16x32xf32>
    %c1_143 = arith.constant 1 : index
    %c2_144 = arith.constant 2 : index
    %c0_145 = arith.constant 0 : index
    %305 = vector.load %arg8[%c1_143, %c2_144, %c0_145] : memref<2x6x32xf32, #tpu.memory_space<vmem>>, vector<1x1x32xf32>
    %306 = vector.shape_cast %305 : vector<1x1x32xf32> to vector<1x32xf32>
    %c1_146 = arith.constant 1 : index
    %c3_147 = arith.constant 3 : index
    %c0_148 = arith.constant 0 : index
    %307 = vector.load %arg8[%c1_146, %c3_147, %c0_148] : memref<2x6x32xf32, #tpu.memory_space<vmem>>, vector<1x1x32xf32>
    %308 = vector.shape_cast %307 : vector<1x1x32xf32> to vector<1x32xf32>
    %cst_149 = arith.constant dense<0.000000e+00> : vector<16xf32>
    %309 = vector.multi_reduction <add>, %304, %cst_149 [1] : vector<16x32xf32> to vector<16xf32>
    %310 = vector.shape_cast %309 : vector<16xf32> to vector<16x1xf32>
    %cst_150 = arith.constant 3.200000e+01 : f32
    %311 = vector.broadcast %cst_150 : f32 to vector<16x1xf32>
    %312 = arith.divf %310, %311 : vector<16x1xf32>
    %313 = vector.broadcast %312 : vector<16x1xf32> to vector<16x32xf32>
    %314 = arith.subf %304, %313 : vector<16x32xf32>
    %315 = arith.mulf %314, %314 : vector<16x32xf32>
    %cst_151 = arith.constant dense<0.000000e+00> : vector<16xf32>
    %316 = vector.multi_reduction <add>, %315, %cst_151 [1] : vector<16x32xf32> to vector<16xf32>
    %317 = vector.shape_cast %316 : vector<16xf32> to vector<16x1xf32>
    %cst_152 = arith.constant 0.0322580636 : f32
    %318 = vector.broadcast %cst_152 : f32 to vector<16x1xf32>
    %319 = arith.mulf %317, %318 : vector<16x1xf32>
    %320 = math.sqrt %319 : vector<16x1xf32>
    %321 = vector.broadcast %306 : vector<1x32xf32> to vector<16x32xf32>
    %322 = arith.mulf %321, %314 : vector<16x32xf32>
    %cst_153 = arith.constant 9.99999997E-7 : f32
    %323 = vector.broadcast %cst_153 : f32 to vector<16x1xf32>
    %324 = arith.addf %320, %323 : vector<16x1xf32>
    %325 = tpu.reciprocal %324 {approx = true} : vector<16x1xf32> -> vector<16x1xf32>
    %326 = vector.broadcast %325 : vector<16x1xf32> to vector<16x32xf32>
    %327 = arith.mulf %322, %326 : vector<16x32xf32>
    %328 = vector.broadcast %308 : vector<1x32xf32> to vector<16x32xf32>
    %329 = arith.addf %327, %328 : vector<16x32xf32>
    %c1_154 = arith.constant 1 : index
    %c0_155 = arith.constant 0 : index
    %c128_156 = arith.constant 128 : index
    %330 = vector.load %arg4[%c1_154, %c0_155, %c128_156] : memref<2x32x256xf32, #tpu.memory_space<vmem>>, vector<1x32x32xf32>
    %331 = vector.shape_cast %330 : vector<1x32x32xf32> to vector<32x32xf32>
    %cst_157 = arith.constant dense<0.000000e+00> : vector<16x32xf32>
    %332 = tpu.matmul %329, %331, %cst_157 {dimension_numbers = #tpu.dot_dimension_numbers<[1], [0], [0], [1], [0, 0, 1, 1], [], []>} : vector<16x32xf32>, vector<32x32xf32>, vector<16x32xf32> -> vector<16x32xf32>
    %c1_158 = arith.constant 1 : index
    %c0_159 = arith.constant 0 : index
    %c128_160 = arith.constant 128 : index
    %333 = vector.load %arg7[%c1_158, %c0_159, %c128_160] : memref<2x1x352xf32, #tpu.memory_space<vmem>>, vector<1x1x32xf32>
    %334 = vector.shape_cast %333 : vector<1x1x32xf32> to vector<1x32xf32>
    %335 = vector.broadcast %334 : vector<1x32xf32> to vector<16x32xf32>
    %336 = arith.addf %332, %335 : vector<16x32xf32>
    %337 = vector.extract_strided_slice %17 {offsets = [0, 0], sizes = [16, 32], strides = [1, 1]} : vector<16x64xf32> to vector<16x32xf32>
    %338 = vector.extract_strided_slice %17 {offsets = [0, 32], sizes = [16, 32], strides = [1, 1]} : vector<16x64xf32> to vector<16x32xf32>
    %c1_161 = arith.constant 1 : index
    %c0_162 = arith.constant 0 : index
    %c224_163 = arith.constant 224 : index
    %339 = vector.load %arg4[%c1_161, %c0_162, %c224_163] : memref<2x32x256xf32, #tpu.memory_space<vmem>>, vector<1x32x32xf32>
    %340 = vector.shape_cast %339 : vector<1x32x32xf32> to vector<32x32xf32>
    %c1_164 = arith.constant 1 : index
    %c0_165 = arith.constant 0 : index
    %c224_166 = arith.constant 224 : index
    %341 = vector.load %arg7[%c1_164, %c0_165, %c224_166] : memref<2x1x352xf32, #tpu.memory_space<vmem>>, vector<1x1x32xf32>
    %342 = vector.shape_cast %341 : vector<1x1x32xf32> to vector<1x32xf32>
    %343 = vector.extract_strided_slice %336 {offsets = [0, 0], sizes = [16, 8], strides = [1, 1]} : vector<16x32xf32> to vector<16x8xf32>
    %344 = vector.extract_strided_slice %337 {offsets = [0, 0], sizes = [16, 8], strides = [1, 1]} : vector<16x32xf32> to vector<16x8xf32>
    %cst_167 = arith.constant dense<0.000000e+00> : vector<16x16xf32>
    %345 = tpu.matmul %343, %344, %cst_167 {dimension_numbers = #tpu.dot_dimension_numbers<[1], [1], [0], [0], [0, 0, 1, 0], [], []>} : vector<16x8xf32>, vector<16x8xf32>, vector<16x16xf32> -> vector<16x16xf32>
    %346 = vector.extract_strided_slice %336 {offsets = [0, 8], sizes = [16, 8], strides = [1, 1]} : vector<16x32xf32> to vector<16x8xf32>
    %347 = vector.extract_strided_slice %337 {offsets = [0, 8], sizes = [16, 8], strides = [1, 1]} : vector<16x32xf32> to vector<16x8xf32>
    %cst_168 = arith.constant dense<0.000000e+00> : vector<16x16xf32>
    %348 = tpu.matmul %346, %347, %cst_168 {dimension_numbers = #tpu.dot_dimension_numbers<[1], [1], [0], [0], [0, 0, 1, 0], [], []>} : vector<16x8xf32>, vector<16x8xf32>, vector<16x16xf32> -> vector<16x16xf32>
    %349 = vector.extract_strided_slice %336 {offsets = [0, 16], sizes = [16, 8], strides = [1, 1]} : vector<16x32xf32> to vector<16x8xf32>
    %350 = vector.extract_strided_slice %337 {offsets = [0, 16], sizes = [16, 8], strides = [1, 1]} : vector<16x32xf32> to vector<16x8xf32>
    %cst_169 = arith.constant dense<0.000000e+00> : vector<16x16xf32>
    %351 = tpu.matmul %349, %350, %cst_169 {dimension_numbers = #tpu.dot_dimension_numbers<[1], [1], [0], [0], [0, 0, 1, 0], [], []>} : vector<16x8xf32>, vector<16x8xf32>, vector<16x16xf32> -> vector<16x16xf32>
    %352 = vector.extract_strided_slice %336 {offsets = [0, 24], sizes = [16, 8], strides = [1, 1]} : vector<16x32xf32> to vector<16x8xf32>
    %353 = vector.extract_strided_slice %337 {offsets = [0, 24], sizes = [16, 8], strides = [1, 1]} : vector<16x32xf32> to vector<16x8xf32>
    %cst_170 = arith.constant dense<0.000000e+00> : vector<16x16xf32>
    %354 = tpu.matmul %352, %353, %cst_170 {dimension_numbers = #tpu.dot_dimension_numbers<[1], [1], [0], [0], [0, 0, 1, 0], [], []>} : vector<16x8xf32>, vector<16x8xf32>, vector<16x16xf32> -> vector<16x16xf32>
    %355 = tpu.concatenate %345, %348, %351, %354 in 0 : vector<16x16xf32>, vector<16x16xf32>, vector<16x16xf32>, vector<16x16xf32> -> vector<64x16xf32>
    %cst_171 = arith.constant 0.353553385 : f32
    %356 = vector.broadcast %cst_171 : f32 to vector<64x16xf32>
    %357 = arith.mulf %355, %356 : vector<64x16xf32>
    %358 = arith.addf %357, %3 : vector<64x16xf32>
    %cst_172 = arith.constant dense<0xFF800000> : vector<64xf32>
    %359 = vector.multi_reduction <maximumf>, %358, %cst_172 [1] : vector<64x16xf32> to vector<64xf32>
    %360 = vector.shape_cast %359 : vector<64xf32> to vector<64x1xf32>
    %361 = vector.broadcast %360 : vector<64x1xf32> to vector<64x16xf32>
    %362 = arith.subf %358, %361 : vector<64x16xf32>
    %363 = math.exp %362 : vector<64x16xf32>
    %cst_173 = arith.constant dense<0.000000e+00> : vector<64xf32>
    %364 = vector.multi_reduction <add>, %363, %cst_173 [1] : vector<64x16xf32> to vector<64xf32>
    %365 = vector.shape_cast %364 : vector<64xf32> to vector<64x1xf32>
    %366 = tpu.reciprocal %365 {approx = true} : vector<64x1xf32> -> vector<64x1xf32>
    %367 = vector.broadcast %366 : vector<64x1xf32> to vector<64x16xf32>
    %368 = arith.mulf %363, %367 : vector<64x16xf32>
    %369 = vector.extract_strided_slice %368 {offsets = [0, 0], sizes = [16, 16], strides = [1, 1]} : vector<64x16xf32> to vector<16x16xf32>
    %370 = vector.extract_strided_slice %338 {offsets = [0, 0], sizes = [16, 8], strides = [1, 1]} : vector<16x32xf32> to vector<16x8xf32>
    %cst_174 = arith.constant dense<0.000000e+00> : vector<16x8xf32>
    %371 = tpu.matmul %369, %370, %cst_174 {dimension_numbers = #tpu.dot_dimension_numbers<[1], [0], [0], [1], [0, 0, 1, 1], [], []>} : vector<16x16xf32>, vector<16x8xf32>, vector<16x8xf32> -> vector<16x8xf32>
    %372 = vector.extract_strided_slice %368 {offsets = [16, 0], sizes = [16, 16], strides = [1, 1]} : vector<64x16xf32> to vector<16x16xf32>
    %373 = vector.extract_strided_slice %338 {offsets = [0, 8], sizes = [16, 8], strides = [1, 1]} : vector<16x32xf32> to vector<16x8xf32>
    %cst_175 = arith.constant dense<0.000000e+00> : vector<16x8xf32>
    %374 = tpu.matmul %372, %373, %cst_175 {dimension_numbers = #tpu.dot_dimension_numbers<[1], [0], [0], [1], [0, 0, 1, 1], [], []>} : vector<16x16xf32>, vector<16x8xf32>, vector<16x8xf32> -> vector<16x8xf32>
    %375 = vector.extract_strided_slice %368 {offsets = [32, 0], sizes = [16, 16], strides = [1, 1]} : vector<64x16xf32> to vector<16x16xf32>
    %376 = vector.extract_strided_slice %338 {offsets = [0, 16], sizes = [16, 8], strides = [1, 1]} : vector<16x32xf32> to vector<16x8xf32>
    %cst_176 = arith.constant dense<0.000000e+00> : vector<16x8xf32>
    %377 = tpu.matmul %375, %376, %cst_176 {dimension_numbers = #tpu.dot_dimension_numbers<[1], [0], [0], [1], [0, 0, 1, 1], [], []>} : vector<16x16xf32>, vector<16x8xf32>, vector<16x8xf32> -> vector<16x8xf32>
    %378 = vector.extract_strided_slice %368 {offsets = [48, 0], sizes = [16, 16], strides = [1, 1]} : vector<64x16xf32> to vector<16x16xf32>
    %379 = vector.extract_strided_slice %338 {offsets = [0, 24], sizes = [16, 8], strides = [1, 1]} : vector<16x32xf32> to vector<16x8xf32>
    %cst_177 = arith.constant dense<0.000000e+00> : vector<16x8xf32>
    %380 = tpu.matmul %378, %379, %cst_177 {dimension_numbers = #tpu.dot_dimension_numbers<[1], [0], [0], [1], [0, 0, 1, 1], [], []>} : vector<16x16xf32>, vector<16x8xf32>, vector<16x8xf32> -> vector<16x8xf32>
    %381 = tpu.concatenate %371, %374, %377, %380 in 1 : vector<16x8xf32>, vector<16x8xf32>, vector<16x8xf32>, vector<16x8xf32> -> vector<16x32xf32>
    %cst_178 = arith.constant dense<0.000000e+00> : vector<16x32xf32>
    %382 = tpu.matmul %381, %340, %cst_178 {dimension_numbers = #tpu.dot_dimension_numbers<[1], [0], [0], [1], [0, 0, 1, 1], [], []>} : vector<16x32xf32>, vector<32x32xf32>, vector<16x32xf32> -> vector<16x32xf32>
    %383 = vector.broadcast %342 : vector<1x32xf32> to vector<16x32xf32>
    %384 = arith.addf %382, %383 : vector<16x32xf32>
    %385 = arith.addf %304, %384 : vector<16x32xf32>
    %c1_179 = arith.constant 1 : index
    %c4_180 = arith.constant 4 : index
    %c0_181 = arith.constant 0 : index
    %386 = vector.load %arg8[%c1_179, %c4_180, %c0_181] : memref<2x6x32xf32, #tpu.memory_space<vmem>>, vector<1x1x32xf32>
    %387 = vector.shape_cast %386 : vector<1x1x32xf32> to vector<1x32xf32>
    %c1_182 = arith.constant 1 : index
    %c5_183 = arith.constant 5 : index
    %c0_184 = arith.constant 0 : index
    %388 = vector.load %arg8[%c1_182, %c5_183, %c0_184] : memref<2x6x32xf32, #tpu.memory_space<vmem>>, vector<1x1x32xf32>
    %389 = vector.shape_cast %388 : vector<1x1x32xf32> to vector<1x32xf32>
    %cst_185 = arith.constant dense<0.000000e+00> : vector<16xf32>
    %390 = vector.multi_reduction <add>, %385, %cst_185 [1] : vector<16x32xf32> to vector<16xf32>
    %391 = vector.shape_cast %390 : vector<16xf32> to vector<16x1xf32>
    %cst_186 = arith.constant 3.200000e+01 : f32
    %392 = vector.broadcast %cst_186 : f32 to vector<16x1xf32>
    %393 = arith.divf %391, %392 : vector<16x1xf32>
    %394 = vector.broadcast %393 : vector<16x1xf32> to vector<16x32xf32>
    %395 = arith.subf %385, %394 : vector<16x32xf32>
    %396 = arith.mulf %395, %395 : vector<16x32xf32>
    %cst_187 = arith.constant dense<0.000000e+00> : vector<16xf32>
    %397 = vector.multi_reduction <add>, %396, %cst_187 [1] : vector<16x32xf32> to vector<16xf32>
    %398 = vector.shape_cast %397 : vector<16xf32> to vector<16x1xf32>
    %cst_188 = arith.constant 0.0322580636 : f32
    %399 = vector.broadcast %cst_188 : f32 to vector<16x1xf32>
    %400 = arith.mulf %398, %399 : vector<16x1xf32>
    %401 = math.sqrt %400 : vector<16x1xf32>
    %402 = vector.broadcast %387 : vector<1x32xf32> to vector<16x32xf32>
    %403 = arith.mulf %402, %395 : vector<16x32xf32>
    %cst_189 = arith.constant 9.99999997E-7 : f32
    %404 = vector.broadcast %cst_189 : f32 to vector<16x1xf32>
    %405 = arith.addf %401, %404 : vector<16x1xf32>
    %406 = tpu.reciprocal %405 {approx = true} : vector<16x1xf32> -> vector<16x1xf32>
    %407 = vector.broadcast %406 : vector<16x1xf32> to vector<16x32xf32>
    %408 = arith.mulf %403, %407 : vector<16x32xf32>
    %409 = vector.broadcast %389 : vector<1x32xf32> to vector<16x32xf32>
    %410 = arith.addf %408, %409 : vector<16x32xf32>
    %c1_190 = arith.constant 1 : index
    %c0_191 = arith.constant 0 : index
    %c0_192 = arith.constant 0 : index
    %411 = vector.load %arg5[%c1_190, %c0_191, %c0_192] : memref<2x32x64xf32, #tpu.memory_space<vmem>>, vector<1x32x64xf32>
    %412 = vector.shape_cast %411 : vector<1x32x64xf32> to vector<32x64xf32>
    %cst_193 = arith.constant dense<0.000000e+00> : vector<16x64xf32>
    %413 = tpu.matmul %410, %412, %cst_193 {dimension_numbers = #tpu.dot_dimension_numbers<[1], [0], [0], [1], [0, 0, 1, 1], [], []>} : vector<16x32xf32>, vector<32x64xf32>, vector<16x64xf32> -> vector<16x64xf32>
    %c1_194 = arith.constant 1 : index
    %c0_195 = arith.constant 0 : index
    %c256_196 = arith.constant 256 : index
    %414 = vector.load %arg7[%c1_194, %c0_195, %c256_196] : memref<2x1x352xf32, #tpu.memory_space<vmem>>, vector<1x1x64xf32>
    %415 = vector.shape_cast %414 : vector<1x1x64xf32> to vector<1x64xf32>
    %416 = vector.broadcast %415 : vector<1x64xf32> to vector<16x64xf32>
    %417 = arith.addf %413, %416 : vector<16x64xf32>
    %cst_197 = arith.constant 0.000000e+00 : f32
    %418 = vector.broadcast %cst_197 : f32 to vector<16x64xf32>
    %419 = arith.maximumf %417, %418 : vector<16x64xf32>
    %c1_198 = arith.constant 1 : index
    %c0_199 = arith.constant 0 : index
    %c0_200 = arith.constant 0 : index
    %420 = vector.load %arg6[%c1_198, %c0_199, %c0_200] : memref<2x64x32xf32, #tpu.memory_space<vmem>>, vector<1x64x32xf32>
    %421 = vector.shape_cast %420 : vector<1x64x32xf32> to vector<64x32xf32>
    %cst_201 = arith.constant dense<0.000000e+00> : vector<16x32xf32>
    %422 = tpu.matmul %419, %421, %cst_201 {dimension_numbers = #tpu.dot_dimension_numbers<[1], [0], [0], [1], [0, 0, 1, 1], [], []>} : vector<16x64xf32>, vector<64x32xf32>, vector<16x32xf32> -> vector<16x32xf32>
    %423 = arith.addf %385, %422 : vector<16x32xf32>
    %c1_202 = arith.constant 1 : index
    %c0_203 = arith.constant 0 : index
    %c320_204 = arith.constant 320 : index
    %424 = vector.load %arg7[%c1_202, %c0_203, %c320_204] : memref<2x1x352xf32, #tpu.memory_space<vmem>>, vector<1x1x32xf32>
    %425 = vector.shape_cast %424 : vector<1x1x32xf32> to vector<1x32xf32>
    %426 = vector.broadcast %425 : vector<1x32xf32> to vector<16x32xf32>
    %427 = arith.addf %423, %426 : vector<16x32xf32>
    %c0_205 = arith.constant 0 : index
    %c0_206 = arith.constant 0 : index
    %428 = vector.load %arg9[%c0_205, %c0_206] : memref<2x32xf32, #tpu.memory_space<vmem>>, vector<1x32xf32>
    %c1_207 = arith.constant 1 : index
    %c0_208 = arith.constant 0 : index
    %429 = vector.load %arg9[%c1_207, %c0_208] : memref<2x32xf32, #tpu.memory_space<vmem>>, vector<1x32xf32>
    %cst_209 = arith.constant dense<0.000000e+00> : vector<16xf32>
    %430 = vector.multi_reduction <add>, %427, %cst_209 [1] : vector<16x32xf32> to vector<16xf32>
    %431 = vector.shape_cast %430 : vector<16xf32> to vector<16x1xf32>
    %cst_210 = arith.constant 3.200000e+01 : f32
    %432 = vector.broadcast %cst_210 : f32 to vector<16x1xf32>
    %433 = arith.divf %431, %432 : vector<16x1xf32>
    %434 = vector.broadcast %433 : vector<16x1xf32> to vector<16x32xf32>
    %435 = arith.subf %427, %434 : vector<16x32xf32>
    %436 = arith.mulf %435, %435 : vector<16x32xf32>
    %cst_211 = arith.constant dense<0.000000e+00> : vector<16xf32>
    %437 = vector.multi_reduction <add>, %436, %cst_211 [1] : vector<16x32xf32> to vector<16xf32>
    %438 = vector.shape_cast %437 : vector<16xf32> to vector<16x1xf32>
    %cst_212 = arith.constant 0.0322580636 : f32
    %439 = vector.broadcast %cst_212 : f32 to vector<16x1xf32>
    %440 = arith.mulf %438, %439 : vector<16x1xf32>
    %441 = math.sqrt %440 : vector<16x1xf32>
    %442 = vector.broadcast %428 : vector<1x32xf32> to vector<16x32xf32>
    %443 = arith.mulf %442, %435 : vector<16x32xf32>
    %cst_213 = arith.constant 9.99999997E-7 : f32
    %444 = vector.broadcast %cst_213 : f32 to vector<16x1xf32>
    %445 = arith.addf %441, %444 : vector<16x1xf32>
    %446 = tpu.reciprocal %445 {approx = true} : vector<16x1xf32> -> vector<16x1xf32>
    %447 = vector.broadcast %446 : vector<16x1xf32> to vector<16x32xf32>
    %448 = arith.mulf %443, %447 : vector<16x32xf32>
    %449 = vector.broadcast %429 : vector<1x32xf32> to vector<16x32xf32>
    %450 = arith.addf %448, %449 : vector<16x32xf32>
    %c0_214 = arith.constant 0 : index
    %c0_215 = arith.constant 0 : index
    %451 = vector.load %arg10[%c0_214, %c0_215] : memref<16x32xf32, #tpu.memory_space<vmem>>, vector<16x32xf32>
    tpu.vector_store %arg10[%c0_214, %c0_215], %450 {strides = array<i32>} : memref<16x32xf32, #tpu.memory_space<vmem>>, vector<16x32xf32>,
    return
  }
}

</mosaic_0001>

<bundles_post_ra>
// kernel: _lambda_.1
= control target key start
LH: loop header
LB: loop body
LE: loop exit
PB: predicated region body
PF: predicated region fallthrough
CT: control target
= control target key end

     0   :  { %vm82_vm0 = vcmask 261120   ;;  %s4511_s0 = inlined_call_operand.vmem [shape: f32[16,32], index: 0, kind: input, shape index: {}]   ;;  %s4512_s1 = inlined_call_operand.vmem [shape: f32[16,32], index: 1, kind: input, shape index: {}]   ;;  %s4513_s2 = inlined_call_operand.vmem [shape: f32[64,16], index: 2, kind: input, shape index: {}]   ;;  %s4514_s3 = inlined_call_operand.vmem [shape: f32[64,16], index: 3, kind: input, shape index: {}]   ;;  %s4515_s4 = inlined_call_operand.vmem [shape: f32[2,32,256], index: 4, kind: input, shape index: {}]   ;;  %s4516_s5 = inlined_call_operand.vmem [shape: f32[2,32,64], index: 5, kind: input, shape index: {}]   ;;  %s4517_s6 = inlined_call_operand.vmem [shape: f32[2,64,32], index: 6, kind: input, shape index: {}]   ;;  %s4518_s7 = inlined_call_operand.vmem [shape: f32[2,1,352], index: 7, kind: input, shape index: {}]   ;;  %s4519_s8 = inlined_call_operand.vmem [shape: f32[2,6,32], index: 8, kind: input, shape index: {}]   ;;  %s4520_s9 = inlined_call_operand.vmem [shape: f32[2,32], index: 9, kind: input, shape index: {}]   ;;  %s4521_s10 = inlined_call_operand.hbm [shape: f32[16,32], index: 10, kind: output, shape index: {}]  }
   0x1   :  { %v3454_v0 = vld [vmem:[%s4511_s0] sm:$0xff]  ;;  %v3461_v2 = vld [vmem:[%s4511_s0 + $0x8] sm:$0xff] }
   0x2   :  { %v165_v1 = vsel %vm82_vm0, %v3454_v0, 0.0  ;;  %v168_v3 = vsel %vm82_vm0, %v3461_v2, 0.0 }
   0x3   :  { %166 = vadd.xlane.f32.xlu0 %v165_v1 }
   0x4   :  { %15 = vsyncpa [#allocation3], 0  ;;  %v3378_v4 = vmov 32.0   ;;  %v3468_v7 = vld [vmem:[%s4515_s4 + $0x28] sm:$0xff]  ;;  %v3473_v8 = vld [vmem:[%s4515_s4 + $0x38] sm:$0xff]  ;;  %s3379_s0 = smov 96  }
   0x5   :  { %3142 = vrcp.f32 %v3378_v4  ;;  %v2982_v9 = vpack.i.bf16 %v3468_v7, %v3473_v8  ;;  %v3481_v11 = vld [vmem:[%s4515_s4 + $0x8] sm:$0xff]  ;;  %v3486_v12 = vld [vmem:[%s4515_s4 + $0x18] sm:$0xff]  ;;  %v3510_v30 = vld [vmem:[%s4515_s4 + $0x30] sm:$0xff]  ;;  %s3380_s29 = smov 72   ;;  %s3381_s30 = smov 88   ;;  %vm271_vm6 = vcmask 64512  }
   0x6   :  { %v2987_v14 = vpack.i.bf16 %v3481_v11, %v3486_v12  ;;  %v3515_v31 = vld [vmem:[%s4515_s4 + $0x20] sm:$0xff]  ;;  %v3522_v33 = vld [vmem:[%s4515_s4 + $0x10] sm:$0xff]  ;;  %v3534_v39 = vld [vmem:[%s4512_s1 + $0x8] sm:$0xff]  ;;  %s3382_s11 = smov 104   ;;  %s3383_s12 = smov 120   ;;  %vm436_vm7 = vcmask 130048  }
   0x7   :  { %2983 = vrot.lane.b32.xlu2 %v2982_v9, %s3379_s0  ;;  %v3022_v32 = vpack.i.bf16 %v3515_v31, %v3510_v30  ;;  %v3527_v34 = vld [vmem:[%s4515_s4] sm:$0xff]  ;;  %v2807_v47 = vld [vmem:[%s4515_s4 + $0x68] sm:$0xff]  ;;  %v2808_v48 = vld [vmem:[%s4515_s4 + $0x78] sm:$0xff]  ;;  %s3384_s13 = smov 112   ;;  %s3385_s14 = smov 80   ;;  %vm693_vm8 = vcmask 195584  }
   0x8   :  { %v3027_v35 = vpack.i.bf16 %v3527_v34, %v3522_v33  ;;  %v2992_v50 = vpack.i.bf16 %v2807_v47, %v2808_v48  ;;  %v3122_v1 = vld [vmem:[%s4519_s8] ss:$0 sm:$0xff]  ;;  %v3123_v9 = vld [vmem:[%s4519_s8 + $0x1] ss:$0 sm:$0xff]  ;;  %s3386_s17 = smov 40   ;;  %s4522_s18 = smov 56  }
   0x9   :  { %s3388_s19 = smov 48   ;;  %s3389_s20 = smov 64  }
   0xa   :  { %s3390_s21 = smov 32   ;;  %s3391_s22 = smov 24  }
   0xb   :  { %169 = vadd.xlane.f32.xlu0 %v168_v3  ;;  %v3143_v5 = vpop.eup %3142  ;;  %s3392_s23 = smov 8   ;;  %s4523_s24 = smov 16  }
   0xc   :  { %v172_v6 = vmul.f32 32.0, %v3143_v5  ;;  %vm176_vm1 = vweird.f32 %v3143_v5  ;;  %s2791_s25 = sshll.u32 %s4521_s10, 4  ;;  %s2792_s25 = int_to_ptr.hbm [resolvable:$true] %s2791_s25 }
   0xe   :  { %v173_v10 = vsub.f32 1.0, %v172_v6 }
   0xf   :  { %2988 = vrot.lane.b32.xlu2 %v2987_v14, %s3379_s0 }
  0x10   :  { %v174_v13 = vmul.f32 %v3143_v5, %v173_v10 }
  0x12   :  { %v175_v15 = vadd.f32 %v3143_v5, %v174_v13 }
  0x14   :  { %v3491_v16 = vsel %vm176_vm1, %v3143_v5, %v175_v15 }
  0x61   :  { %v2984_v27 = vpop.permute.xlu2 %2983 }
  0x62   :  { %v2985_v28 = vunpack.i.l.bf16 %v2984_v27  ;;  %v2986_v29 = vunpack.i.h.bf16 %v2984_v27 }
  0x64   :  { %101 = vmatpush.msra.mxu0 %v2985_v28  ;;  %2956 = vmatpush.msra.mxu2 %v2985_v28 }
  0x66   :  { %102 = vmatpush.msra.mxu0 %v2986_v29  ;;  %2957 = vmatpush.msra.mxu2 %v2986_v29 }
  0x69   :  { %v2989_v36 = vpop.permute.xlu2 %2988 }
  0x6a   :  { %v2990_v37 = vunpack.i.l.bf16 %v2989_v36  ;;  %v2991_v38 = vunpack.i.h.bf16 %v2989_v36 }
  0x6c   :  { %103 = vmatpush.msra.mxu0 %v2990_v37  ;;  %2958 = vmatpush.msra.mxu2 %v2990_v37 }
  0x6e   :  { %104 = vmatpush.msra.mxu0 %v2991_v38  ;;  %2959 = vmatpush.msra.mxu2 %v2991_v38 }
  0x6f   :  { %2804 = vmatmul.msk.f32.vlgmr.msra.gmra.mxu2 %vm82_vm0, %v3534_v39 }
  0x70   :  { %254 = vmatpush.msrb.mxu2 %v3510_v30 }
  0x72   :  { %255 = vmatpush.msrb.mxu2 %v3515_v31 }
  0x74   :  { %256 = vmatpush.msrb.mxu2 %v3522_v33 }
  0x76   :  { %v167_v17 = vpop.xlane.xlu0 %166  ;;  %257 = vmatpush.msrb.mxu2 %v3527_v34 }
  0x77   :  { %v178_v18 = vmul.f32 %v3491_v16, %v167_v17 }
  0x79   :  { %v3495_v19 = vsub.f32 %v3454_v0, %v178_v18 }
  0x7b   :  { %v182_v20 = vmul.f32 %v3495_v19, %v3495_v19  ;;  %v217_v6 = vmul.f32 %v3122_v1, %v3495_v19  ;;  %v2805_v19 = vld [vmem:[%s4515_s4 + $0x48] sm:$0xff] }
  0x7d   :  { %v184_v21 = vsel %vm82_vm0, %v182_v20, 0.0 }
  0x7e   :  { %185 = vadd.xlane.f32.xlu1 %v184_v21  ;;  %v170_v22 = vpop.xlane.xlu0 %169 }
  0x7f   :  { %v179_v23 = vmul.f32 %v3491_v16, %v170_v22 }
  0x81   :  { %v3502_v24 = vsub.f32 %v3461_v2, %v179_v23  ;;  %v2806_v23 = vld [vmem:[%s4515_s4 + $0x58] sm:$0xff] }
  0x83   :  { %v183_v25 = vmul.f32 %v3502_v24, %v3502_v24  ;;  %v218_v18 = vmul.f32 %v3122_v1, %v3502_v24  ;;  %v3571_v24 = vld [vmem:[%s4518_s7] ss:$0 sm:$0xff] }
  0x85   :  { %v187_v26 = vsel %vm82_vm0, %v183_v25, 0.0  ;;  %v2997_v25 = vpack.i.bf16 %v2805_v19, %v2806_v23  ;;  %v45_v19 = vld [vmem:[%s4513_s2 + $0x28] sm:$0xff] }
  0x86   :  { %188 = vadd.xlane.f32.xlu1 %v187_v26 }
  0x87   :  { %2998 = vrot.lane.b32.xlu2 %v2997_v25, %s3379_s0 }
  0x9f   :  { %2993 = vrot.lane.b32.xlu1 %v2992_v50, %s3379_s0 }
  0xf1   :  { %v186_v40 = vpop.xlane.xlu1 %185 }
  0xf2   :  { %v190_v41 = vmul.f32 0.032258064, %v186_v40  ;;  %v3566_v26 = vpop.f32.mrf.mxu2 }
  0xf4   :  { %3144 = vrsqrt.f32 %v190_v41  ;;  %vm199_vm2 = vcmp.eq.f32.partialorder %v190_v41, inf  ;;  %v202_v57 = vand.u32 2147483648, %v190_v41  ;;  %vm201_vm3 = vcmp.eq.f32.partialorder %v190_v41, 0.0 }
  0xf9   :  { %v189_v42 = vpop.xlane.xlu1 %188 }
  0xfa   :  { %v3145_v43 = vpop.eup %3144  ;;  %v191_v44 = vmul.f32 0.032258064, %v189_v42 }
  0xfb   :  { %v193_v45 = vmul.f32 %v3145_v43, %v190_v41 }
  0xfc   :  { %3146 = vrsqrt.f32 %v191_v44  ;;  %vm211_vm4 = vcmp.eq.f32.partialorder %v191_v44, inf  ;;  %v214_v4 = vand.u32 2147483648, %v191_v44  ;;  %vm213_vm5 = vcmp.eq.f32.partialorder %v191_v44, 0.0 }
  0xfd   :  { %v194_v46 = vmul.f32 %v3145_v43, %v193_v45 }
  0xff   :  { %v195_v49 = vmul.f32 0.5, %v194_v46  ;;  %v38_v46 = vld [vmem:[%s4512_s1] sm:$0xff] }
 0x100   :  { %2803 = vmatmul.msk.f32.vlgmr.msra.gmra.mxu0 %vm82_vm0, %v38_v46 }
 0x101   :  { %v196_v51 = vsub.f32 1.5, %v195_v49 }
 0x102   :  { %v3147_v52 = vpop.eup %3146 }
 0x103   :  { %v205_v53 = vmul.f32 %v3147_v52, %v191_v44  ;;  %v197_v54 = vmul.f32 %v3145_v43, %v196_v51 }
 0x105   :  { %v198_v55 = vmul.f32 %v197_v54, %v190_v41  ;;  %v206_v56 = vmul.f32 %v3147_v52, %v205_v53 }
 0x107   :  { %v200_v58 = vsel %vm199_vm2, %v190_v41, %v198_v55  ;;  %v207_v59 = vmul.f32 0.5, %v206_v56  ;;  %v2999_v41 = vpop.permute.xlu2 %2998  ;;  %vm1411_vm2 = vcmask 523264  }
 0x108   :  { %v203_v60 = vsel %vm201_vm3, %v202_v57, %v200_v58  ;;  %v3000_v42 = vunpack.i.l.bf16 %v2999_v41  ;;  %v3001_v43 = vunpack.i.h.bf16 %v2999_v41  ;;  %v40_v41 = vld [vmem:[%s4513_s2] sm:$0xff] }
 0x109   :  { %v219_v61 = vadd.f32 1e-06, %v203_v60  ;;  %v208_v62 = vsub.f32 1.5, %v207_v59  ;;  %v46_v60 = vld [vmem:[%s4513_s2 + $0x30] sm:$0xff] }
 0x10b   :  { %3148 = vrcp.f32 %v219_v61  ;;  %v209_v63 = vmul.f32 %v3147_v52, %v208_v62 }
 0x10d   :  { %v210_v3 = vmul.f32 %v209_v63, %v191_v44 }
 0x10f   :  { %v212_v5 = vsel %vm211_vm4, %v191_v44, %v210_v3 }
 0x110   :  { %v215_v10 = vsel %vm213_vm5, %v214_v4, %v212_v5  ;;  %v42_v4 = vld [vmem:[%s4513_s2 + $0x10] sm:$0xff] }
 0x111   :  { %v3149_v13 = vpop.eup %3148  ;;  %v220_v14 = vadd.f32 1e-06, %v215_v10  ;;  %v2994_v37 = vpop.permute.xlu1 %2993 }
 0x112   :  { %v223_v15 = vmul.f32 %v3149_v13, %v217_v6  ;;  %v2995_v38 = vunpack.i.l.bf16 %v2994_v37  ;;  %v2996_v40 = vunpack.i.h.bf16 %v2994_v37 }
 0x113   :  { %3150 = vrcp.f32 %v220_v14 }
 0x114   :  { %v226_v17 = vadd.f32 %v3123_v9, %v223_v15  ;;  %152 = vmatpush.msra.mxu1 %v2995_v38  ;;  %2960 = vmatpush.msra.mxu3 %v2995_v38 }
 0x116   :  { %2812 = vmatmul.msk.f32.vlgmr.msrb.gmra.mxu2 %vm82_vm0, %v226_v17  ;;  %153 = vmatpush.msra.mxu1 %v2996_v40 }
 0x117   :  { %2961 = vmatpush.msra.mxu3 %v2996_v40 }
 0x118   :  { %154 = vmatpush.msra.mxu1 %v3000_v42 }
 0x119   :  { %v3151_v20 = vpop.eup %3150  ;;  %2962 = vmatpush.msra.mxu3 %v3000_v42 }
 0x11a   :  { %v224_v21 = vmul.f32 %v3151_v20, %v218_v18  ;;  %155 = vmatpush.msra.mxu1 %v3001_v43  ;;  %v43_v20 = vld [vmem:[%s4513_s2 + $0x18] sm:$0xff] }
 0x11b   :  { %2963 = vmatpush.msra.mxu3 %v3001_v43  ;;  %2810 = vmatmul.msk.f32.vlgmr.msra.gmra.mxu1 %vm82_vm0, %v38_v46 }
 0x11c   :  { %v227_v22 = vadd.f32 %v3123_v9, %v224_v21  ;;  %2811 = vmatmul.msk.f32.vlgmr.msra.gmra.mxu3 %vm82_vm0, %v3534_v39  ;;  %v44_v9 = vld [vmem:[%s4513_s2 + $0x20] sm:$0xff] }
 0x11e   :  { %2813 = vmatmul.msk.f32.gmra.mxu2 %vm82_vm0, %v227_v22 }
 0x17d   :  { %v3632_v59 = vpop.f32.mrf.mxu0 }
 0x198   :  { %v3637_v62 = vpop.f32.mrf.mxu1 }
 0x199   :  { %v259_v27 = vpop.f32.mrf.mxu2 }
 0x19a   :  { %v3574_v28 = vadd.f32 %v3571_v24, %v259_v27 }
 0x19c   :  { %385 = vrot.lane.b32.xlu2 %v3574_v28, %s3380_s29  ;;  %307 = vrot.lane.b32.xlu1 %v3574_v28, %s3381_s30 }
 0x19f   :  { %v3656_v27 = vpop.f32.mrf.mxu3 }
 0x1a1   :  { %v262_v29 = vpop.f32.mrf.mxu2 }
 0x1a2   :  { %v3581_v36 = vadd.f32 %v3571_v24, %v262_v29 }
 0x1a4   :  { %381 = vrot.lane.b32.xlu2 %v3574_v28, %s3382_s11  ;;  %303 = vrot.lane.b32.xlu1 %v3574_v28, %s3383_s12 }
 0x1a5   :  { %387 = vrot.lane.b32.xlu0 %v3581_v36, %s3380_s29 }
 0x1ac   :  { %344 = vrot.lane.b32.xlu1 %v3581_v36, %s3384_s13  ;;  %348 = vrot.lane.b32.xlu2 %v3581_v36, %s3385_s14 }
 0x1ad   :  { %346 = vrot.lane.b32.xlu0 %v3574_v28, %s3385_s14 }
 0x1b4   :  { %383 = vrot.lane.b32.xlu2 %v3581_v36, %s3382_s11 }
 0x1b5   :  { %309 = vrot.lane.b32.xlu0 %v3581_v36, %s3381_s30 }
 0x1bc   :  { %305 = vrot.lane.b32.xlu2 %v3581_v36, %s3383_s12 }
 0x1bd   :  { %342 = vrot.lane.b32.xlu0 %v3574_v28, %s3384_s13 }
 0x1c4   :  { %267 = vrot.lane.b32.xlu2 %v3574_v28, %s3379_s0 }
 0x1c5   :  { %269 = vrot.lane.b32.xlu0 %v3581_v36, %s3379_s0 }
 0x1f6   :  { %v386_v44 = vpop.permute.xlu2 %385 }
 0x1fe   :  { %v382_v45 = vpop.permute.xlu2 %381 }
 0x206   :  { %v349_v47 = vpop.permute.xlu2 %348 }
 0x207   :  { %2822 = vmatpush.xpose.msk.msrb.mxu1 %vm271_vm6, %v349_v47  ;;  %v47_v47 = vld [vmem:[%s4513_s2 + $0x38] sm:$0xff] }
 0x20e   :  { %v308_v49 = vpop.permute.xlu1 %307  ;;  %v384_v50 = vpop.permute.xlu2 %383 }
 0x216   :  { %v304_v52 = vpop.permute.xlu1 %303  ;;  %v306_v54 = vpop.permute.xlu2 %305 }
 0x217   :  { %v388_v48 = vpop.permute.xlu0 %387 }
 0x218   :  { %2826 = vmatpush.xpose.msk.msra.mxu2 %vm271_vm6, %v388_v48 }
 0x21c   :  { %2827 = vmatpush.xpose.msk.msra.mxu2 %vm271_vm6, %v386_v44 }
 0x21e   :  { %v345_v55 = vpop.permute.xlu1 %344  ;;  %v268_v57 = vpop.permute.xlu2 %267 }
 0x21f   :  { %2828 = vmatmul.msk.f32.vlgmr.msra.gmra.mxu2 %vm271_vm6, %v382_v45  ;;  %v347_v39 = vpop.permute.xlu0 %346 }
 0x220   :  { %2823 = vmatpush.xpose.msk.msrb.mxu1 %vm271_vm6, %v347_v39  ;;  %v41_v39 = vld [vmem:[%s4513_s2 + $0x8] sm:$0xff] }
 0x227   :  { %2829 = vmatmul.msk.f32.gmra.mxu2 %vm271_vm6, %v384_v50  ;;  %v310_v51 = vpop.permute.xlu0 %309 }
 0x228   :  { %2818 = vmatpush.xpose.msk.msrb.mxu0 %vm271_vm6, %v310_v51 }
 0x22c   :  { %2819 = vmatpush.xpose.msk.msrb.mxu0 %vm271_vm6, %v308_v49 }
 0x22f   :  { %v343_v53 = vpop.permute.xlu0 %342  ;;  %2820 = vmatmul.msk.f32.vlgmr.msrb.gmra.mxu0 %vm271_vm6, %v304_v52 }
 0x230   :  { %2824 = vmatmul.msk.f32.vlgmr.msrb.gmra.mxu1 %vm271_vm6, %v343_v53 }
 0x237   :  { %v270_v56 = vpop.permute.xlu0 %269  ;;  %2821 = vmatmul.msk.f32.gmra.mxu0 %vm271_vm6, %v306_v54 }
 0x238   :  { %2814 = vmatpush.xpose.msk.msrb.mxu3 %vm271_vm6, %v270_v56  ;;  %2825 = vmatmul.msk.f32.gmra.mxu1 %vm271_vm6, %v345_v55 }
 0x23c   :  { %2815 = vmatpush.xpose.msk.msrb.mxu3 %vm271_vm6, %v268_v57 }
 0x23f   :  { %2816 = vmatmul.msk.f32.vlgmr.msrb.gmra.mxu3 %vm271_vm6, %v3574_v28 }
 0x247   :  { %2817 = vmatmul.msk.f32.gmra.mxu3 %vm271_vm6, %v3581_v36 }
 0x2a2   :  { %v414_v58 = vpop.f32.mrf.mxu2 }
 0x2a3   :  { %v426_v61 = vmul.f32 0.35355338, %v414_v58 }
 0x2a5   :  { %v434_v63 = vadd.f32 %v426_v61, %v46_v60 }
 0x2a7   :  { %v455_v1 = vsel %vm436_vm7, %v434_v63, -inf }
 0x2a8   :  { %456 = vmax.xlane.f32.xlu1 %v455_v1 }
 0x2aa   :  { %v417_v43 = vpop.f32.mrf.mxu2 }
 0x2ab   :  { %v427_v45 = vmul.f32 0.35355338, %v417_v43 }
 0x2ac   :  { %v336_v3 = vpop.f32.mrf.mxu0 }
 0x2ad   :  { %v422_v5 = vmul.f32 0.35355338, %v336_v3  ;;  %v375_v6 = vpop.f32.mrf.mxu1  ;;  %v435_v50 = vadd.f32 %v427_v45, %v47_v47 }
 0x2ae   :  { %v424_v10 = vmul.f32 0.35355338, %v375_v6 }
 0x2af   :  { %v430_v13 = vadd.f32 %v422_v5, %v42_v4  ;;  %v458_v52 = vsel %vm436_vm7, %v435_v50, -inf }
 0x2b0   :  { %v432_v14 = vadd.f32 %v424_v10, %v44_v9 }
 0x2b1   :  { %v443_v15 = vsel %vm436_vm7, %v430_v13, -inf }
 0x2b2   :  { %444 = vmax.xlane.f32.xlu0 %v443_v15  ;;  %v449_v17 = vsel %vm436_vm7, %v432_v14, -inf }
 0x2b3   :  { %450 = vmax.xlane.f32.xlu2 %v449_v17 }
 0x2b4   :  { %v339_v18 = vpop.f32.mrf.mxu0 }
 0x2b5   :  { %v423_v21 = vmul.f32 0.35355338, %v339_v18  ;;  %v378_v22 = vpop.f32.mrf.mxu1 }
 0x2b6   :  { %v425_v23 = vmul.f32 0.35355338, %v378_v22 }
 0x2b7   :  { %v3654_v25 = vadd.f32 %v423_v21, %v43_v20 }
 0x2b8   :  { %v433_v29 = vadd.f32 %v425_v23, %v45_v19 }
 0x2b9   :  { %v446_v37 = vsel %vm436_vm7, %v3654_v25, -inf }
 0x2ba   :  { %447 = vmax.xlane.f32.xlu0 %v446_v37  ;;  %v452_v38 = vsel %vm436_vm7, %v433_v29, -inf }
 0x2bb   :  { %453 = vmax.xlane.f32.xlu2 %v452_v38 }
 0x2c2   :  { %v297_v40 = vpop.f32.mrf.mxu3 }
 0x2c3   :  { %v420_v42 = vmul.f32 0.35355338, %v297_v40 }
 0x2c5   :  { %v428_v44 = vadd.f32 %v420_v42, %v40_v41 }
 0x2c7   :  { %v437_v46 = vsel %vm436_vm7, %v428_v44, -inf }
 0x2c8   :  { %438 = vmax.xlane.f32.xlu1 %v437_v46 }
 0x2ca   :  { %v300_v48 = vpop.f32.mrf.mxu3 }
 0x2cb   :  { %v421_v49 = vmul.f32 0.35355338, %v300_v48 }
 0x2cd   :  { %v3671_v51 = vadd.f32 %v421_v49, %v41_v39 }
 0x2cf   :  { %v440_v53 = vsel %vm436_vm7, %v3671_v51, -inf }
 0x2d0   :  { %459 = vmax.xlane.f32.xlu1 %v458_v52  ;;  %441 = vmax.xlane.f32.xlu0 %v440_v53 }
 0x31b   :  { %v457_v54 = vpop.xlane.xlu1 %456 }
 0x31c   :  { %v467_v55 = vsub.f32 %v434_v63, %v457_v54 }
 0x31e   :  { %v481_v56 = vmul.f32 1.442695, %v467_v55 }
 0x320   :  { %3152 = vpow2.f32 %v481_v56 }
 0x325   :  { %v445_v57 = vpop.xlane.xlu0 %444 }
 0x326   :  { %v3153_v58 = vpop.eup %3152  ;;  %v463_v60 = vsub.f32 %v430_v13, %v445_v57  ;;  %v451_v61 = vpop.xlane.xlu2 %450  ;;  %v3002_v13 = vpack.i.bf16 %v3574_v28, %v3581_v36 }
 0x327   :  { %v465_v1 = vsub.f32 %v432_v14, %v451_v61  ;;  %v503_v3 = vsel %vm436_vm7, %v3153_v58, 0.0 }
 0x328   :  { %v473_v4 = vmul.f32 1.442695, %v463_v60  ;;  %504 = vadd.xlane.f32.xlu2 %v503_v3 }
 0x329   :  { %v477_v5 = vmul.f32 1.442695, %v465_v1 }
 0x32a   :  { %3154 = vpow2.f32 %v473_v4 }
 0x32b   :  { %3156 = vpow2.f32 %v477_v5 }
 0x32d   :  { %v448_v21 = vpop.xlane.xlu0 %447 }
 0x32e   :  { %v454_v14 = vpop.xlane.xlu2 %453  ;;  %v464_v22 = vsub.f32 %v3654_v25, %v448_v21 }
 0x32f   :  { %v466_v15 = vsub.f32 %v433_v29, %v454_v14 }
 0x330   :  { %v3677_v6 = vpop.eup %3154  ;;  %v475_v36 = vmul.f32 1.442695, %v464_v22 }
 0x331   :  { %v3679_v9 = vpop.eup %3156  ;;  %v491_v63 = vsel %vm436_vm7, %v3677_v6, 0.0  ;;  %v479_v17 = vmul.f32 1.442695, %v466_v15 }
 0x332   :  { %492 = vadd.xlane.f32.xlu1 %v491_v63  ;;  %v497_v10 = vsel %vm436_vm7, %v3679_v9, 0.0 }
 0x333   :  { %498 = vadd.xlane.f32.xlu0 %v497_v10  ;;  %3158 = vpow2.f32 %v479_v17 }
 0x339   :  { %v3691_v28 = vpop.eup %3158 }
 0x33a   :  { %v500_v37 = vsel %vm436_vm7, %v3691_v28, 0.0 }
 0x33b   :  { %v439_v18 = vpop.xlane.xlu1 %438 }
 0x33c   :  { %v461_v20 = vsub.f32 %v428_v44, %v439_v18 }
 0x33e   :  { %v469_v19 = vmul.f32 1.442695, %v461_v20 }
 0x340   :  { %3003 = vrot.lane.b32.xlu2 %v3002_v13, %s3386_s17  ;;  %3160 = vpow2.f32 %v469_v19 }
 0x341   :  { %3162 = vpow2.f32 %v475_v36 }
 0x343   :  { %v460_v23 = vpop.xlane.xlu1 %459 }
 0x344   :  { %v468_v38 = vsub.f32 %v435_v50, %v460_v23  ;;  %v442_v50 = vpop.xlane.xlu0 %441 }
 0x345   :  { %v462_v52 = vsub.f32 %v3671_v51, %v442_v50 }
 0x346   :  { %v3695_v29 = vpop.eup %3160  ;;  %v483_v40 = vmul.f32 1.442695, %v468_v38 }
 0x347   :  { %3008 = vrot.lane.b32.xlu0 %v3002_v13, %s4522_s18  ;;  %v485_v41 = vsel %vm436_vm7, %v3695_v29, 0.0  ;;  %v3699_v42 = vpop.eup %3162  ;;  %v471_v55 = vmul.f32 1.442695, %v462_v52 }
 0x348   :  { %3164 = vpow2.f32 %v483_v40  ;;  %v494_v25 = vsel %vm436_vm7, %v3699_v42, 0.0 }
 0x34b   :  { %3013 = vrot.lane.b32.xlu1 %v3002_v13, %s3388_s19 }
 0x34e   :  { %v3165_v43 = vpop.eup %3164 }
 0x34f   :  { %v506_v44 = vsel %vm436_vm7, %v3165_v43, 0.0 }
 0x369   :  { %501 = vadd.xlane.f32.xlu2 %v500_v37 }
 0x371   :  { %486 = vadd.xlane.f32.xlu0 %v485_v41 }
 0x375   :  { %495 = vadd.xlane.f32.xlu1 %v494_v25 }
 0x37d   :  { %507 = vadd.xlane.f32.xlu1 %v506_v44 }
 0x381   :  { %3023 = vrot.lane.b32.xlu2 %v3022_v32, %s3390_s21 }
 0x385   :  { %3028 = vrot.lane.b32.xlu0 %v3027_v35, %s3390_s21 }
 0x396   :  { %3018 = vrot.lane.b32.xlu1 %v3002_v13, %s3389_s20 }
 0x39b   :  { %v505_v45 = vpop.xlane.xlu2 %504 }
 0x39c   :  { %3166 = vrcp.f32 %v505_v45 }
 0x3a2   :  { %v3167_v47 = vpop.eup %3166 }
 0x3a3   :  { %v3004_v46 = vpop.permute.xlu2 %3003  ;;  %v523_v49 = vmul.f32 %v3167_v47, %v3153_v58 }
 0x3a4   :  { %v3005_v48 = vunpack.i.l.bf16 %v3004_v46  ;;  %v3006_v39 = vunpack.i.h.bf16 %v3004_v46 }
 0x3a5   :  { %v493_v53 = vpop.xlane.xlu1 %492 }
 0x3a6   :  { %656 = vmatpush.msrb.mxu2 %v3005_v48  ;;  %v499_v54 = vpop.xlane.xlu0 %498  ;;  %3168 = vrcp.f32 %v493_v53 }
 0x3a7   :  { %3170 = vpow2.f32 %v471_v55 }
 0x3a8   :  { %657 = vmatpush.msrb.mxu2 %v3006_v39  ;;  %3172 = vrcp.f32 %v499_v54 }
 0x3a9   :  { %2836 = vmatmul.msk.f32.vlgmr.msrb.gmra.mxu2 %vm436_vm7, %v523_v49 }
 0x3ac   :  { %v3169_v57 = vpop.eup %3168 }
 0x3ad   :  { %v3171_v58 = vpop.eup %3170  ;;  %v519_v61 = vmul.f32 %v3169_v57, %v3677_v6 }
 0x3ae   :  { %v3173_v3 = vpop.eup %3172  ;;  %v488_v33 = vsel %vm436_vm7, %v3171_v58, 0.0 }
 0x3af   :  { %v521_v31 = vmul.f32 %v3173_v3, %v3679_v9 }
 0x3b9   :  { %v3009_v56 = vpop.permute.xlu0 %3008 }
 0x3ba   :  { %v3010_v51 = vunpack.i.l.bf16 %v3009_v56  ;;  %v3011_v60 = vunpack.i.h.bf16 %v3009_v56 }
 0x3bc   :  { %586 = vmatpush.msra.mxu0 %v3010_v51 }
 0x3bd   :  { %v3014_v1 = vpop.permute.xlu1 %3013 }
 0x3be   :  { %v3015_v4 = vunpack.i.l.bf16 %v3014_v1  ;;  %587 = vmatpush.msra.mxu0 %v3011_v60  ;;  %v3016_v30 = vunpack.i.h.bf16 %v3014_v1 }
 0x3bf   :  { %2832 = vmatmul.msk.f32.vlgmr.msra.gmra.mxu0 %vm436_vm7, %v519_v61 }
 0x3c0   :  { %489 = vadd.xlane.f32.xlu1 %v488_v33  ;;  %621 = vmatpush.msra.mxu1 %v3015_v4  ;;  %v3761_v4 = vld [vmem:[%s4518_s7 + $0x1] ss:$0 sm:$0xff] }
 0x3c1   :  { %823 = vmatpush.msrb.mxu0 %v3473_v8 }
 0x3c2   :  { %622 = vmatpush.msra.mxu1 %v3016_v30 }
 0x3c3   :  { %2834 = vmatmul.msk.f32.vlgmr.msra.gmra.mxu1 %vm436_vm7, %v521_v31  ;;  %824 = vmatpush.msrb.mxu0 %v3468_v7 }
 0x3c5   :  { %825 = vmatpush.msrb.mxu0 %v3486_v12 }
 0x3c7   :  { %826 = vmatpush.msrb.mxu0 %v3481_v11 }
 0x3dc   :  { %v502_v32 = vpop.xlane.xlu2 %501 }
 0x3dd   :  { %3174 = vrcp.f32 %v502_v32 }
 0x3e3   :  { %v3175_v34 = vpop.eup %3174 }
 0x3e4   :  { %v522_v35 = vmul.f32 %v3175_v34, %v3691_v28  ;;  %v487_v11 = vpop.xlane.xlu0 %486  ;;  %v3024_v23 = vpop.permute.xlu2 %3023 }
 0x3e5   :  { %v3026_v37 = vunpack.i.h.bf16 %v3024_v23  ;;  %v3025_v38 = vunpack.i.l.bf16 %v3024_v23  ;;  %v3127_v23 = vld [vmem:[%s4519_s8 + $0x3] ss:$0 sm:$0xff] }
 0x3e6   :  { %2835 = vmatmul.msk.f32.gmra.mxu1 %vm436_vm7, %v522_v35  ;;  %v3126_v35 = vld [vmem:[%s4519_s8 + $0x2] ss:$0 sm:$0xff] }
 0x3e8   :  { %v496_v5 = vpop.xlane.xlu1 %495 }
 0x3e9   :  { %3176 = vrcp.f32 %v496_v5 }
 0x3ef   :  { %v3177_v6 = vpop.eup %3176 }
 0x3f0   :  { %v508_v8 = vpop.xlane.xlu1 %507  ;;  %v520_v9 = vmul.f32 %v3177_v6, %v3699_v42 }
 0x3f1   :  { %3178 = vrcp.f32 %v508_v8 }
 0x3f2   :  { %2833 = vmatmul.msk.f32.gmra.mxu0 %vm436_vm7, %v520_v9  ;;  %3180 = vrcp.f32 %v487_v11 }
 0x3f7   :  { %v3179_v7 = vpop.eup %3178  ;;  %v3029_v40 = vpop.permute.xlu0 %3028 }
 0x3f8   :  { %v524_v12 = vmul.f32 %v3179_v7, %v3165_v43  ;;  %v3181_v10 = vpop.eup %3180  ;;  %v3031_v41 = vunpack.i.h.bf16 %v3029_v40  ;;  %v3030_v42 = vunpack.i.l.bf16 %v3029_v40 }
 0x3f9   :  { %v517_v15 = vmul.f32 %v3181_v10, %v3695_v29 }
 0x3fa   :  { %2837 = vmatmul.msk.f32.gmra.mxu2 %vm436_vm7, %v524_v12 }
 0x408   :  { %v3019_v63 = vpop.permute.xlu1 %3018 }
 0x409   :  { %v3020_v13 = vunpack.i.l.bf16 %v3019_v63  ;;  %v3021_v14 = vunpack.i.h.bf16 %v3019_v63 }
 0x40b   :  { %551 = vmatpush.msra.mxu3 %v3020_v13 }
 0x40d   :  { %552 = vmatpush.msra.mxu3 %v3021_v14 }
 0x40e   :  { %2830 = vmatmul.msk.f32.vlgmr.msra.gmra.mxu3 %vm436_vm7, %v517_v15 }
 0x40f   :  { %733 = vmatpush.msrb.mxu3 %v3025_v38 }
 0x411   :  { %734 = vmatpush.msrb.mxu3 %v3026_v37 }
 0x413   :  { %735 = vmatpush.msrb.mxu3 %v3030_v42 }
 0x415   :  { %736 = vmatpush.msrb.mxu3 %v3031_v41 }
 0x42c   :  { %v659_v17 = vpop.f32.mrf.mxu2 }
 0x42d   :  { %683 = vrot.lane.b32.xlu1 %v659_v17, %s3391_s22 }
 0x433   :  { %v490_v18 = vpop.xlane.xlu1 %489 }
 0x434   :  { %3182 = vrcp.f32 %v490_v18 }
 0x43a   :  { %v3183_v20 = vpop.eup %3182 }
 0x43b   :  { %v518_v21 = vmul.f32 %v3183_v20, %v3171_v58 }
 0x43c   :  { %v589_v22 = vpop.f32.mrf.mxu0 }
 0x43d   :  { %2831 = vmatmul.msk.f32.gmra.mxu3 %vm436_vm7, %v518_v21  ;;  %667 = vrot.lane.b32.xlu0 %v589_v22, %s3392_s23 }
 0x440   :  { %v624_v19 = vpop.f32.mrf.mxu1 }
 0x441   :  { %675 = vrot.lane.b32.xlu2 %v624_v19, %s4523_s24 }
 0x463   :  { %v627_v28 = vpop.f32.mrf.mxu1 }
 0x464   :  { %677 = vrot.lane.b32.xlu2 %v627_v28, %s4523_s24 }
 0x46c   :  { %712 = vrot.lane.b32.xlu2 %v3571_v24, %s3390_s21 }
 0x46f   :  { %v592_v36 = vpop.f32.mrf.mxu0 }
 0x470   :  { %669 = vrot.lane.b32.xlu0 %v592_v36, %s3392_s23 }
 0x47d   :  { %v662_v29 = vpop.f32.mrf.mxu2 }
 0x47e   :  { %685 = vrot.lane.b32.xlu0 %v662_v29, %s3391_s22 }
 0x491   :  { %v554_v25 = vpop.f32.mrf.mxu3 }
 0x49b   :  { %v676_v24 = vpop.permute.xlu2 %675 }
 0x49f   :  { %v684_v45 = vpop.permute.xlu1 %683 }
 0x4af   :  { %v668_v43 = vpop.permute.xlu0 %667 }
 0x4b0   :  { %v689_v44 = vsel %vm271_vm6, %v554_v25, %v668_v43 }
 0x4b1   :  { %v691_v46 = vsel %vm436_vm7, %v689_v44, %v676_v24 }
 0x4b2   :  { %v694_v47 = vsel %vm693_vm8, %v691_v46, %v684_v45 }
 0x4b3   :  { %2838 = vmatmul.msk.f32.vlgmr.msrb.gmra.mxu3 %vm82_vm0, %v694_v47 }
 0x4be   :  { %v678_v50 = vpop.permute.xlu2 %677 }
 0x4c0   :  { %v557_v39 = vpop.f32.mrf.mxu3 }
 0x4c6   :  { %v713_v55 = vpop.permute.xlu2 %712 }
 0x4e2   :  { %v670_v48 = vpop.permute.xlu0 %669 }
 0x4e3   :  { %v690_v49 = vsel %vm271_vm6, %v557_v39, %v670_v48 }
 0x4e4   :  { %v692_v53 = vsel %vm436_vm7, %v690_v49, %v678_v50 }
 0x4f0   :  { %v686_v52 = vpop.permute.xlu0 %685 }
 0x4f1   :  { %v695_v54 = vsel %vm693_vm8, %v692_v53, %v686_v52 }
 0x4f2   :  { %2839 = vmatmul.msk.f32.gmra.mxu3 %vm82_vm0, %v695_v54 }
 0x536   :  { %v738_v56 = vpop.f32.mrf.mxu3 }
 0x537   :  { %v739_v57 = vadd.f32 %v738_v56, %v713_v55 }
 0x539   :  { %v3749_v51 = vadd.f32 %v739_v57, %v3454_v0 }
 0x53b   :  { %v748_v58 = vsel %vm82_vm0, %v3749_v51, 0.0 }
 0x53c   :  { %749 = vadd.xlane.f32.xlu0 %v748_v58 }
 0x575   :  { %v741_v60 = vpop.f32.mrf.mxu3 }
 0x576   :  { %v742_v61 = vadd.f32 %v741_v60, %v713_v55 }
 0x578   :  { %v3754_v1 = vadd.f32 %v742_v61, %v3461_v2 }
 0x57a   :  { %v751_v3 = vsel %vm82_vm0, %v3754_v1, 0.0 }
 0x57b   :  { %752 = vadd.xlane.f32.xlu2 %v751_v3 }
 0x593   :  { %79 = vrot.lane.b32.xlu2 %v3761_v4, %s3379_s0 }
 0x5af   :  { %v750_v0 = vpop.xlane.xlu0 %749 }
 0x5b0   :  { %v754_v33 = vmul.f32 %v750_v0, %v3491_v16 }
 0x5b2   :  { %v756_v30 = vsub.f32 %v3749_v51, %v754_v33 }
 0x5b4   :  { %v758_v31 = vmul.f32 %v756_v30, %v756_v30  ;;  %v793_v36 = vmul.f32 %v3126_v35, %v756_v30 }
 0x5b6   :  { %v760_v2 = vsel %vm82_vm0, %v758_v31, 0.0 }
 0x5b7   :  { %761 = vadd.xlane.f32.xlu1 %v760_v2 }
 0x5ee   :  { %v753_v32 = vpop.xlane.xlu2 %752 }
 0x5ef   :  { %v755_v34 = vmul.f32 %v753_v32, %v3491_v16  ;;  %v48_v32 = vld [vmem:[%s4514_s3] sm:$0xff] }
 0x5f1   :  { %v757_v5 = vsub.f32 %v3754_v1, %v755_v34 }
 0x5f3   :  { %v3773_v6 = vmul.f32 %v3126_v35, %v757_v5  ;;  %v759_v8 = vmul.f32 %v757_v5, %v757_v5 }
 0x5f5   :  { %v763_v9 = vsel %vm82_vm0, %v759_v8, 0.0 }
 0x5f6   :  { %764 = vadd.xlane.f32.xlu0 %v763_v9  ;;  %v80_v7 = vpop.permute.xlu2 %79 }
 0x5f7   :  { %v107_v12 = vadd.f32 %v3632_v59, %v80_v7  ;;  %v110_v11 = vadd.f32 %v3566_v26, %v80_v7 }
 0x5f9   :  { %2842 = vmatpush.xpose.msk.msrb.mxu1 %vm271_vm6, %v110_v11  ;;  %873 = vrot.lane.b32.xlu2 %v107_v12, %s3383_s12  ;;  %v3780_v63 = vpack.i.bf16 %v107_v12, %v110_v11 }
 0x5fa   :  { %875 = vrot.lane.b32.xlu1 %v110_v11, %s3383_s12 }
 0x5fd   :  { %2843 = vmatpush.xpose.msk.msrb.mxu1 %vm271_vm6, %v107_v12 }
 0x60a   :  { %914 = vrot.lane.b32.xlu0 %v110_v11, %s3384_s13 }
 0x612   :  { %912 = vrot.lane.b32.xlu0 %v107_v12, %s3384_s13 }
 0x61a   :  { %953 = vrot.lane.b32.xlu0 %v110_v11, %s3382_s11  ;;  %v52_v11 = vld [vmem:[%s4514_s3 + $0x20] sm:$0xff] }
 0x622   :  { %951 = vrot.lane.b32.xlu0 %v107_v12, %s3382_s11 }
 0x62a   :  { %v762_v59 = vpop.xlane.xlu1 %761 }
 0x62b   :  { %v766_v26 = vmul.f32 0.032258064, %v762_v59 }
 0x62d   :  { %3184 = vrsqrt.f32 %v766_v26  ;;  %vm775_vm9 = vcmp.eq.f32.partialorder %v766_v26, inf  ;;  %v778_v21 = vand.u32 2147483648, %v766_v26  ;;  %vm777_vm10 = vcmp.eq.f32.partialorder %v766_v26, 0.0 }
 0x633   :  { %v3185_v10 = vpop.eup %3184 }
 0x634   :  { %v769_v13 = vmul.f32 %v3185_v10, %v766_v26 }
 0x636   :  { %v770_v14 = vmul.f32 %v3185_v10, %v769_v13 }
 0x638   :  { %v771_v15 = vmul.f32 0.5, %v770_v14  ;;  %v53_v14 = vld [vmem:[%s4514_s3 + $0x28] sm:$0xff] }
 0x63a   :  { %v772_v17 = vsub.f32 1.5, %v771_v15 }
 0x63c   :  { %v773_v18 = vmul.f32 %v3185_v10, %v772_v17 }
 0x63e   :  { %v774_v20 = vmul.f32 %v773_v18, %v766_v26 }
 0x640   :  { %v776_v22 = vsel %vm775_vm9, %v766_v26, %v774_v20 }
 0x641   :  { %v779_v19 = vsel %vm777_vm10, %v778_v21, %v776_v22  ;;  %v54_v21 = vld [vmem:[%s4514_s3 + $0x30] sm:$0xff] }
 0x642   :  { %v795_v28 = vadd.f32 1e-06, %v779_v19 }
 0x644   :  { %3186 = vrcp.f32 %v795_v28 }
 0x64a   :  { %v3187_v37 = vpop.eup %3186 }
 0x64b   :  { %v799_v38 = vmul.f32 %v3187_v37, %v793_v36  ;;  %v50_v37 = vld [vmem:[%s4514_s3 + $0x10] sm:$0xff] }
 0x64d   :  { %v802_v29 = vadd.f32 %v3127_v23, %v799_v38 }
 0x64f   :  { %2840 = vmatmul.msk.f32.vlgmr.msrb.gmra.mxu0 %vm82_vm0, %v802_v29  ;;  %v55_v29 = vld [vmem:[%s4514_s3 + $0x38] sm:$0xff] }
 0x653   :  { %v874_v25 = vpop.permute.xlu2 %873 }
 0x669   :  { %v765_v40 = vpop.xlane.xlu0 %764 }
 0x66a   :  { %v767_v41 = vmul.f32 0.032258064, %v765_v40 }
 0x66c   :  { %3188 = vrsqrt.f32 %v767_v41  ;;  %v876_v42 = vpop.permute.xlu1 %875  ;;  %vm787_vm11 = vcmp.eq.f32.partialorder %v767_v41, inf  ;;  %v790_v49 = vand.u32 2147483648, %v767_v41  ;;  %vm789_vm12 = vcmp.eq.f32.partialorder %v767_v41, 0.0 }
 0x66d   :  { %2846 = vmatpush.xpose.msk.msra.mxu2 %vm271_vm6, %v876_v42 }
 0x671   :  { %2847 = vmatpush.xpose.msk.msra.mxu2 %vm271_vm6, %v874_v25 }
 0x672   :  { %v3189_v43 = vpop.eup %3188 }
 0x673   :  { %v781_v24 = vmul.f32 %v3189_v43, %v767_v41 }
 0x675   :  { %v782_v44 = vmul.f32 %v3189_v43, %v781_v24 }
 0x677   :  { %v783_v45 = vmul.f32 0.5, %v782_v44 }
 0x679   :  { %v784_v46 = vsub.f32 1.5, %v783_v45  ;;  %v51_v45 = vld [vmem:[%s4514_s3 + $0x18] sm:$0xff] }
 0x67b   :  { %v785_v47 = vmul.f32 %v3189_v43, %v784_v46 }
 0x67c   :  { %v915_v48 = vpop.permute.xlu0 %914 }
 0x67d   :  { %2850 = vmatpush.xpose.msk.msra.mxu3 %vm271_vm6, %v915_v48  ;;  %v786_v39 = vmul.f32 %v785_v47, %v767_v41 }
 0x67f   :  { %v788_v50 = vsel %vm787_vm11, %v767_v41, %v786_v39 }
 0x680   :  { %v791_v52 = vsel %vm789_vm12, %v790_v49, %v788_v50  ;;  %v49_v49 = vld [vmem:[%s4514_s3 + $0x8] sm:$0xff] }
 0x681   :  { %v796_v53 = vadd.f32 1e-06, %v791_v52 }
 0x683   :  { %3190 = vrcp.f32 %v796_v53 }
 0x684   :  { %v913_v54 = vpop.permute.xlu0 %912 }
 0x685   :  { %2851 = vmatpush.xpose.msk.msra.mxu3 %vm271_vm6, %v913_v54 }
 0x689   :  { %v3191_v55 = vpop.eup %3190 }
 0x68a   :  { %v800_v56 = vmul.f32 %v3191_v55, %v3773_v6 }
 0x68c   :  { %v954_v57 = vpop.permute.xlu0 %953  ;;  %v803_v58 = vadd.f32 %v3127_v23, %v800_v56 }
 0x68d   :  { %2854 = vmatpush.xpose.msk.msra.mxu0 %vm271_vm6, %v954_v57 }
 0x68e   :  { %2841 = vmatmul.msk.f32.gmra.mxu0 %vm82_vm0, %v803_v58 }
 0x694   :  { %v952_v60 = vpop.permute.xlu0 %951 }
 0x695   :  { %2855 = vmatpush.xpose.msk.msra.mxu0 %vm271_vm6, %v952_v60 }
 0x6cc   :  { %v828_v61 = vpop.f32.mrf.mxu0 }
 0x6cd   :  { %v829_v3 = vadd.f32 %v3761_v4, %v828_v61 }
 0x6cf   :  { %908 = vrot.lane.b32.xlu2 %v829_v3, %s3384_s13  ;;  %869 = vrot.lane.b32.xlu1 %v829_v3, %s3383_s12 }
 0x6d0   :  { %2844 = vmatmul.msk.f32.vlgmr.msrb.gmra.mxu1 %vm271_vm6, %v829_v3 }
 0x70b   :  { %v831_v0 = vpop.f32.mrf.mxu0 }
 0x70c   :  { %v832_v33 = vadd.f32 %v3761_v4, %v831_v0 }
 0x70e   :  { %910 = vrot.lane.b32.xlu2 %v832_v33, %s3384_s13  ;;  %871 = vrot.lane.b32.xlu1 %v832_v33, %s3383_s12 }
 0x70f   :  { %2845 = vmatmul.msk.f32.gmra.mxu1 %vm271_vm6, %v832_v33 }
 0x716   :  { %949 = vrot.lane.b32.xlu2 %v832_v33, %s3382_s11  ;;  %947 = vrot.lane.b32.xlu1 %v829_v3, %s3382_s11 }
 0x729   :  { %v909_v30 = vpop.permute.xlu2 %908 }
 0x72a   :  { %2852 = vmatmul.msk.f32.vlgmr.msra.gmra.mxu3 %vm271_vm6, %v909_v30 }
 0x741   :  { %v870_v31 = vpop.permute.xlu1 %869 }
 0x742   :  { %2848 = vmatmul.msk.f32.vlgmr.msra.gmra.mxu2 %vm271_vm6, %v870_v31 }
 0x74d   :  { %v863_v2 = vpop.f32.mrf.mxu1 }
 0x74e   :  { %v986_v34 = vmul.f32 0.35355338, %v863_v2 }
 0x750   :  { %v3815_v35 = vadd.f32 %v986_v34, %v48_v32 }
 0x752   :  { %v1002_v5 = vsel %vm436_vm7, %v3815_v35, -inf }
 0x753   :  { %1003 = vmax.xlane.f32.xlu0 %v1002_v5 }
 0x768   :  { %v911_v6 = vpop.permute.xlu2 %910 }
 0x769   :  { %2853 = vmatmul.msk.f32.gmra.mxu3 %vm271_vm6, %v911_v6 }
 0x770   :  { %v950_v7 = vpop.permute.xlu2 %949 }
 0x780   :  { %v872_v8 = vpop.permute.xlu1 %871 }
 0x781   :  { %2849 = vmatmul.msk.f32.gmra.mxu2 %vm271_vm6, %v872_v8 }
 0x788   :  { %v948_v9 = vpop.permute.xlu1 %947 }
 0x789   :  { %2856 = vmatmul.msk.f32.vlgmr.msra.gmra.mxu0 %vm271_vm6, %v948_v9 }
 0x78c   :  { %v866_v47 = vpop.f32.mrf.mxu1 }
 0x78d   :  { %v987_v48 = vmul.f32 0.35355338, %v866_v47 }
 0x78f   :  { %v995_v50 = vadd.f32 %v987_v48, %v49_v49 }
 0x791   :  { %2857 = vmatmul.msk.f32.gmra.mxu0 %vm271_vm6, %v950_v7  ;;  %v1005_v52 = vsel %vm436_vm7, %v995_v50, -inf }
 0x7ad   :  { %v941_v12 = vpop.f32.mrf.mxu3 }
 0x7ae   :  { %v990_v59 = vmul.f32 0.35355338, %v941_v12 }
 0x7b0   :  { %v998_v26 = vadd.f32 %v990_v59, %v52_v11 }
 0x7b2   :  { %v1014_v10 = vsel %vm436_vm7, %v998_v26, -inf }
 0x7b3   :  { %1015 = vmax.xlane.f32.xlu1 %v1014_v10 }
 0x7c5   :  { %v902_v19 = vpop.f32.mrf.mxu2 }
 0x7c6   :  { %v988_v36 = vmul.f32 0.35355338, %v902_v19  ;;  %v1004_v53 = vpop.xlane.xlu0 %1003 }
 0x7c8   :  { %v996_v41 = vadd.f32 %v988_v36, %v50_v37 }
 0x7ca   :  { %v1008_v24 = vsel %vm436_vm7, %v996_v41, -inf }
 0x7ec   :  { %v944_v13 = vpop.f32.mrf.mxu3 }
 0x7ed   :  { %v991_v15 = vmul.f32 0.35355338, %v944_v13 }
 0x7ef   :  { %v3830_v17 = vadd.f32 %v991_v15, %v53_v14  ;;  %v1026_v14 = vsub.f32 %v3815_v35, %v1004_v53 }
 0x7f1   :  { %v1017_v18 = vsel %vm436_vm7, %v3830_v17, -inf }
 0x7f2   :  { %1018 = vmax.xlane.f32.xlu1 %v1017_v18  ;;  %v1034_v18 = vmul.f32 1.442695, %v1026_v14 }
 0x804   :  { %v905_v42 = vpop.f32.mrf.mxu2 }
 0x805   :  { %v989_v43 = vmul.f32 0.35355338, %v905_v42 }
 0x806   :  { %v980_v20 = vpop.f32.mrf.mxu0 }
 0x807   :  { %v992_v22 = vmul.f32 0.35355338, %v980_v20  ;;  %v997_v46 = vadd.f32 %v989_v43, %v51_v45 }
 0x809   :  { %v1000_v28 = vadd.f32 %v992_v22, %v54_v21  ;;  %v1011_v39 = vsel %vm436_vm7, %v997_v46, -inf }
 0x80b   :  { %v1020_v23 = vsel %vm436_vm7, %v1000_v28, -inf }
 0x80c   :  { %1021 = vmax.xlane.f32.xlu0 %v1020_v23 }
 0x80e   :  { %v983_v38 = vpop.f32.mrf.mxu0 }
 0x80f   :  { %v993_v40 = vmul.f32 0.35355338, %v983_v38 }
 0x811   :  { %v1001_v25 = vadd.f32 %v993_v40, %v55_v29 }
 0x813   :  { %v1023_v44 = vsel %vm436_vm7, %v1001_v25, -inf }
 0x814   :  { %1009 = vmax.xlane.f32.xlu0 %v1008_v24  ;;  %1024 = vmax.xlane.f32.xlu2 %v1023_v44 }
 0x81c   :  { %1012 = vmax.xlane.f32.xlu2 %v1011_v39 }
 0x824   :  { %1006 = vmax.xlane.f32.xlu2 %v1005_v52 }
 0x826   :  { %v1016_v54 = vpop.xlane.xlu1 %1015 }
 0x827   :  { %v1030_v57 = vsub.f32 %v998_v26, %v1016_v54 }
 0x829   :  { %v1042_v60 = vmul.f32 1.442695, %v1030_v57 }
 0x865   :  { %v1019_v11 = vpop.xlane.xlu1 %1018 }
 0x866   :  { %v1031_v59 = vsub.f32 %v3830_v17, %v1019_v11 }
 0x868   :  { %v1044_v26 = vmul.f32 1.442695, %v1031_v59 }
 0x87f   :  { %v1022_v55 = vpop.xlane.xlu0 %1021 }
 0x880   :  { %v1032_v56 = vsub.f32 %v1000_v28, %v1022_v55 }
 0x882   :  { %v1046_v58 = vmul.f32 1.442695, %v1032_v56 }
 0x884   :  { %3192 = vpow2.f32 %v1046_v58 }
 0x885   :  { %3194 = vpow2.f32 %v1042_v60 }
 0x887   :  { %v1025_v61 = vpop.xlane.xlu2 %1024  ;;  %v1010_v3 = vpop.xlane.xlu0 %1009 }
 0x888   :  { %v1028_v0 = vsub.f32 %v996_v41, %v1010_v3  ;;  %v1033_v10 = vsub.f32 %v1001_v25, %v1025_v61 }
 0x88a   :  { %v3854_v33 = vpop.eup %3192  ;;  %v1038_v30 = vmul.f32 1.442695, %v1028_v0  ;;  %v1048_v13 = vmul.f32 1.442695, %v1033_v10 }
 0x88b   :  { %v1068_v31 = vsel %vm436_vm7, %v3854_v33, 0.0  ;;  %v3195_v32 = vpop.eup %3194 }
 0x88c   :  { %1069 = vadd.xlane.f32.xlu0 %v1068_v31  ;;  %3196 = vpow2.f32 %v1038_v30  ;;  %v1062_v8 = vsel %vm436_vm7, %v3195_v32, 0.0 }
 0x88f   :  { %v1013_v2 = vpop.xlane.xlu2 %1012 }
 0x890   :  { %v1029_v34 = vsub.f32 %v997_v46, %v1013_v2 }
 0x892   :  { %v1040_v5 = vmul.f32 1.442695, %v1029_v34  ;;  %v3858_v6 = vpop.eup %3196  ;;  %v3328_v34 = vld [vmem:[%s4515_s4 + $0x28] sm:$0xff] }
 0x893   :  { %v1056_v9 = vsel %vm436_vm7, %v3858_v6, 0.0 }
 0x894   :  { %3198 = vpow2.f32 %v1040_v5  ;;  %1063 = vadd.xlane.f32.xlu0 %v1062_v8  ;;  %1057 = vadd.xlane.f32.xlu1 %v1056_v9  ;;  %v3329_v5 = vld [vmem:[%s4515_s4 + $0x38] sm:$0xff]  ;;  %v3330_v8 = vld [vmem:[%s4515_s4 + $0x8] sm:$0xff] }
 0x895   :  { %3200 = vpow2.f32 %v1044_v26  ;;  %v3331_v9 = vld [vmem:[%s4515_s4 + $0x18] sm:$0xff] }
 0x896   :  { %3202 = vpow2.f32 %v1048_v13 }
 0x897   :  { %3204 = vpow2.f32 %v1034_v18  ;;  %v1007_v35 = vpop.xlane.xlu2 %1006 }
 0x898   :  { %v1027_v28 = vsub.f32 %v995_v50, %v1007_v35 }
 0x89a   :  { %v3863_v7 = vpop.eup %3198  ;;  %v1036_v36 = vmul.f32 1.442695, %v1027_v28 }
 0x89b   :  { %v1059_v12 = vsel %vm436_vm7, %v3863_v7, 0.0  ;;  %v3201_v15 = vpop.eup %3200 }
 0x89c   :  { %1060 = vadd.xlane.f32.xlu2 %v1059_v12  ;;  %v1065_v20 = vsel %vm436_vm7, %v3201_v15, 0.0  ;;  %v3203_v21 = vpop.eup %3202  ;;  %3206 = vpow2.f32 %v1036_v36 }
 0x89d   :  { %v1071_v22 = vsel %vm436_vm7, %v3203_v21, 0.0  ;;  %v3877_v19 = vpop.eup %3204 }
 0x89e   :  { %v1050_v17 = vsel %vm436_vm7, %v3877_v19, 0.0 }
 0x8a2   :  { %v3883_v37 = vpop.eup %3206 }
 0x8a3   :  { %v1053_v40 = vsel %vm436_vm7, %v3883_v37, 0.0 }
 0x8a8   :  { %3043 = vrot.lane.b32.xlu0 %v3780_v63, %s3380_s29 }
 0x8ad   :  { %3033 = vrot.lane.b32.xlu1 %v3780_v63, %s3381_s30 }
 0x8b4   :  { %3038 = vrot.lane.b32.xlu2 %v3780_v63, %s3385_s14 }
 0x8d2   :  { %1066 = vadd.xlane.f32.xlu0 %v1065_v20 }
 0x8d7   :  { %1072 = vadd.xlane.f32.xlu1 %v1071_v22 }
 0x8dd   :  { %1051 = vadd.xlane.f32.xlu2 %v1050_v17 }
 0x8e6   :  { %3048 = vrot.lane.b32.xlu0 %v3780_v63, %s3379_s0 }
 0x8ff   :  { %v1070_v23 = vpop.xlane.xlu0 %1069 }
 0x907   :  { %v1064_v38 = vpop.xlane.xlu0 %1063  ;;  %v1058_v25 = vpop.xlane.xlu1 %1057 }
 0x908   :  { %3208 = vrcp.f32 %v1064_v38 }
 0x909   :  { %3210 = vrcp.f32 %v1070_v23 }
 0x90a   :  { %3212 = vrcp.f32 %v1058_v25 }
 0x90e   :  { %v3209_v42 = vpop.eup %3208 }
 0x90f   :  { %v1061_v29 = vpop.xlane.xlu2 %1060  ;;  %v3211_v44 = vpop.eup %3210  ;;  %v1086_v45 = vmul.f32 %v3209_v42, %v3195_v32 }
 0x910   :  { %1054 = vadd.xlane.f32.xlu0 %v1053_v40  ;;  %v1088_v48 = vmul.f32 %v3211_v44, %v3854_v33  ;;  %v3213_v49 = vpop.eup %3212  ;;  %3214 = vrcp.f32 %v1061_v29 }
 0x911   :  { %v1084_v53 = vmul.f32 %v3213_v49, %v3858_v6  ;;  %v3052_v6 = vpack.i.bf16 %v3328_v34, %v3329_v5 }
 0x913   :  { %3053 = vrot.lane.b32.xlu1 %v3052_v6, %s3390_s21 }
 0x916   :  { %v3215_v54 = vpop.eup %3214 }
 0x917   :  { %v3039_v41 = vpop.permute.xlu2 %3038  ;;  %v1085_v55 = vmul.f32 %v3215_v54, %v3863_v7  ;;  %v3057_v7 = vpack.i.bf16 %v3330_v8, %v3331_v9 }
 0x918   :  { %v3040_v43 = vunpack.i.l.bf16 %v3039_v41  ;;  %v3041_v63 = vunpack.i.h.bf16 %v3039_v41 }
 0x91a   :  { %1186 = vmatpush.msrb.mxu3 %v3040_v43  ;;  %v3044_v24 = vpop.permute.xlu0 %3043 }
 0x91b   :  { %v3045_v46 = vunpack.i.l.bf16 %v3044_v24  ;;  %v3046_v47 = vunpack.i.h.bf16 %v3044_v24 }
 0x91c   :  { %1187 = vmatpush.msrb.mxu3 %v3041_v63 }
 0x91d   :  { %2862 = vmatmul.msk.f32.vlgmr.msrb.gmra.mxu3 %vm436_vm7, %v1086_v45  ;;  %1221 = vmatpush.msrb.mxu0 %v3045_v46 }
 0x91f   :  { %1222 = vmatpush.msrb.mxu0 %v3046_v47  ;;  %v3034_v39 = vpop.permute.xlu1 %3033 }
 0x920   :  { %2864 = vmatmul.msk.f32.vlgmr.msrb.gmra.mxu0 %vm436_vm7, %v1088_v48  ;;  %v3035_v50 = vunpack.i.l.bf16 %v3034_v39  ;;  %v3036_v52 = vunpack.i.h.bf16 %v3034_v39 }
 0x922   :  { %1151 = vmatpush.msrb.mxu2 %v3035_v50 }
 0x924   :  { %1152 = vmatpush.msrb.mxu2 %v3036_v52  ;;  %3058 = vrot.lane.b32.xlu0 %v3057_v7, %s3390_s21 }
 0x925   :  { %2860 = vmatmul.msk.f32.vlgmr.msrb.gmra.mxu2 %vm436_vm7, %v1084_v53 }
 0x92c   :  { %1272 = vrot.lane.b32.xlu0 %v3761_v4, %s3390_s21 }
 0x92d   :  { %2861 = vmatmul.msk.f32.gmra.mxu2 %vm436_vm7, %v1085_v55 }
 0x945   :  { %v1067_v56 = vpop.xlane.xlu0 %1066 }
 0x946   :  { %3216 = vrcp.f32 %v1067_v56 }
 0x94a   :  { %v1073_v57 = vpop.xlane.xlu1 %1072 }
 0x94b   :  { %3218 = vrcp.f32 %v1073_v57 }
 0x94c   :  { %v3217_v58 = vpop.eup %3216 }
 0x94d   :  { %v1087_v60 = vmul.f32 %v3217_v58, %v3201_v15 }
 0x94f   :  { %2863 = vmatmul.msk.f32.gmra.mxu3 %vm436_vm7, %v1087_v60 }
 0x950   :  { %v1052_v61 = vpop.xlane.xlu2 %1051 }
 0x951   :  { %v3219_v3 = vpop.eup %3218  ;;  %3220 = vrcp.f32 %v1052_v61 }
 0x952   :  { %v1089_v0 = vmul.f32 %v3219_v3, %v3203_v21  ;;  %v1367_v3 = vld [vmem:[%s4516_s5 + $0x18] sm:$0xff] }
 0x953   :  { %1390 = vmatpush.msra.mxu2 %v1367_v3 }
 0x954   :  { %2865 = vmatmul.msk.f32.gmra.mxu0 %vm436_vm7, %v1089_v0  ;;  %v1366_v0 = vld [vmem:[%s4516_s5 + $0x10] sm:$0xff] }
 0x955   :  { %1391 = vmatpush.msra.mxu2 %v1366_v0 }
 0x957   :  { %v3221_v30 = vpop.eup %3220 }
 0x958   :  { %v3049_v33 = vpop.permute.xlu0 %3048  ;;  %v1082_v32 = vmul.f32 %v3221_v30, %v3877_v19  ;;  %v1364_v30 = vld [vmem:[%s4516_s5] sm:$0xff] }
 0x959   :  { %v3050_v31 = vunpack.i.l.bf16 %v3049_v33  ;;  %v3051_v2 = vunpack.i.h.bf16 %v3049_v33  ;;  %v1365_v33 = vld [vmem:[%s4516_s5 + $0x8] sm:$0xff] }
 0x95a   :  { %1392 = vmatpush.msra.mxu2 %v1365_v33 }
 0x95b   :  { %1116 = vmatpush.msra.mxu1 %v3050_v31 }
 0x95c   :  { %1393 = vmatpush.msra.mxu2 %v1364_v30 }
 0x95d   :  { %1117 = vmatpush.msra.mxu1 %v3051_v2 }
 0x95e   :  { %2858 = vmatmul.msk.f32.vlgmr.msra.gmra.mxu1 %vm436_vm7, %v1082_v32 }
 0x983   :  { %v1055_v12 = vpop.xlane.xlu0 %1054 }
 0x984   :  { %3222 = vrcp.f32 %v1055_v12 }
 0x985   :  { %v3054_v4 = vpop.permute.xlu1 %3053 }
 0x986   :  { %v3056_v20 = vunpack.i.h.bf16 %v3054_v4  ;;  %v3055_v21 = vunpack.i.l.bf16 %v3054_v4 }
 0x988   :  { %1293 = vmatpush.msrb.mxu1 %v3055_v21 }
 0x98a   :  { %v3223_v11 = vpop.eup %3222  ;;  %1294 = vmatpush.msrb.mxu1 %v3056_v20 }
 0x98b   :  { %v1083_v59 = vmul.f32 %v3223_v11, %v3883_v37 }
 0x98d   :  { %2859 = vmatmul.msk.f32.gmra.mxu1 %vm436_vm7, %v1083_v59 }
 0x996   :  { %v3059_v22 = vpop.permute.xlu0 %3058 }
 0x997   :  { %v3061_v19 = vunpack.i.h.bf16 %v3059_v22  ;;  %v3060_v17 = vunpack.i.l.bf16 %v3059_v22  ;;  %v1410_v22 = vld [vmem:[%s4517_s6 + $0x38] sm:$0xff] }
 0x998   :  { %1426 = vmatpush.msra.mxu3 %v1410_v22 }
 0x999   :  { %1295 = vmatpush.msrb.mxu1 %v3060_v17  ;;  %v3130_v17 = vld [vmem:[%s4518_s7 + $0x2] ss:$0 sm:$0xff] }
 0x99b   :  { %1296 = vmatpush.msrb.mxu1 %v3061_v19  ;;  %v1409_v19 = vld [vmem:[%s4517_s6 + $0x30] sm:$0xff] }
 0x99c   :  { %1427 = vmatpush.msra.mxu3 %v1409_v19 }
 0x99d   :  { %v1224_v13 = vpop.f32.mrf.mxu0 }
 0x99e   :  { %v1273_v44 = vpop.permute.xlu0 %1272 }
 0x9a0   :  { %v1189_v26 = vpop.f32.mrf.mxu3 }
 0x9a1   :  { %1240 = vrot.lane.b32.xlu1 %v1189_v26, %s4523_s24 }
 0x9a8   :  { %v1154_v10 = vpop.f32.mrf.mxu2 }
 0x9a9   :  { %1232 = vrot.lane.b32.xlu2 %v1154_v10, %s3392_s23  ;;  %v3128_v10 = vld [vmem:[%s4519_s8 + $0x4] ss:$0 sm:$0xff] }
 0x9b0   :  { %v1157_v14 = vpop.f32.mrf.mxu2 }
 0x9b1   :  { %1234 = vrot.lane.b32.xlu1 %v1157_v14, %s3392_s23  ;;  %1248 = vrot.lane.b32.xlu2 %v1224_v13, %s3391_s22  ;;  %v3129_v14 = vld [vmem:[%s4519_s8 + $0x5] ss:$0 sm:$0xff] }
 0x9d1   :  { %v1227_v15 = vpop.f32.mrf.mxu0 }
 0x9d2   :  { %v1192_v18 = vpop.f32.mrf.mxu3  ;;  %1250 = vrot.lane.b32.xlu1 %v1227_v15, %s3391_s22 }
 0x9d3   :  { %1242 = vrot.lane.b32.xlu2 %v1192_v18, %s4523_s24 }
 0x9db   :  { %v1119_v28 = vpop.f32.mrf.mxu1 }
 0xa03   :  { %v1233_v35 = vpop.permute.xlu2 %1232 }
 0xa04   :  { %v1254_v36 = vsel %vm271_vm6, %v1119_v28, %v1233_v35  ;;  %v1408_v35 = vld [vmem:[%s4517_s6 + $0x28] sm:$0xff] }
 0xa05   :  { %1428 = vmatpush.msra.mxu3 %v1408_v35 }
 0xa0a   :  { %v1122_v42 = vpop.f32.mrf.mxu1 }
 0xa0b   :  { %v1249_v37 = vpop.permute.xlu2 %1248 }
 0xa13   :  { %v1241_v23 = vpop.permute.xlu1 %1240 }
 0xa14   :  { %v1256_v38 = vsel %vm436_vm7, %v1254_v36, %v1241_v23  ;;  %v1407_v36 = vld [vmem:[%s4517_s6 + $0x20] sm:$0xff] }
 0xa15   :  { %v1258_v29 = vsel %vm693_vm8, %v1256_v38, %v1249_v37  ;;  %v1406_v37 = vld [vmem:[%s4517_s6 + $0x18] sm:$0xff]  ;;  %1429 = vmatpush.msra.mxu3 %v1407_v36 }
 0xa16   :  { %2866 = vmatmul.msk.f32.vlgmr.msrb.gmra.mxu1 %vm82_vm0, %v1258_v29 }
 0xa17   :  { %1430 = vmatpush.msra.mxu3 %v1406_v37  ;;  %v3131_v37 = vld [vmem:[%s4519_s8 + $0x8] ss:$0 sm:$0xff] }
 0xa23   :  { %v1235_v40 = vpop.permute.xlu1 %1234 }
 0xa24   :  { %v1255_v25 = vsel %vm271_vm6, %v1122_v42, %v1235_v40 }
 0xa2d   :  { %v1243_v41 = vpop.permute.xlu2 %1242 }
 0xa2e   :  { %v1257_v43 = vsel %vm436_vm7, %v1255_v25, %v1243_v41 }
 0xa44   :  { %v1251_v63 = vpop.permute.xlu1 %1250 }
 0xa45   :  { %v1259_v24 = vsel %vm693_vm8, %v1257_v43, %v1251_v63 }
 0xa46   :  { %2867 = vmatmul.msk.f32.gmra.mxu1 %vm82_vm0, %v1259_v24 }
 0xa93   :  { %v1298_v45 = vpop.f32.mrf.mxu1 }
 0xa94   :  { %v1299_v46 = vadd.f32 %v1298_v45, %v1273_v44 }
 0xa96   :  { %v3931_v47 = vadd.f32 %v1299_v46, %v3749_v51 }
 0xa98   :  { %v1308_v48 = vsel %vm82_vm0, %v3931_v47, 0.0 }
 0xa99   :  { %1309 = vadd.xlane.f32.xlu2 %v1308_v48 }
 0xac3   :  { %v1301_v39 = vpop.f32.mrf.mxu1 }
 0xac4   :  { %v1302_v49 = vadd.f32 %v1301_v39, %v1273_v44  ;;  %v1405_v39 = vld [vmem:[%s4517_s6 + $0x10] sm:$0xff] }
 0xac5   :  { %1431 = vmatpush.msra.mxu3 %v1405_v39 }
 0xac6   :  { %v3936_v50 = vadd.f32 %v1302_v49, %v3754_v1  ;;  %v1404_v49 = vld [vmem:[%s4517_s6 + $0x8] sm:$0xff] }
 0xac7   :  { %1432 = vmatpush.msra.mxu3 %v1404_v49 }
 0xac8   :  { %v1311_v52 = vsel %vm82_vm0, %v3936_v50, 0.0 }
 0xac9   :  { %1312 = vadd.xlane.f32.xlu1 %v1311_v52  ;;  %v1403_v52 = vld [vmem:[%s4517_s6] sm:$0xff] }
 0xaca   :  { %1433 = vmatpush.msra.mxu3 %v1403_v52 }
 0xae2   :  { %1443 = vrot.lane.b32.xlu1 %v3130_v17, %s3389_s20 }
 0xb0c   :  { %v1310_v53 = vpop.xlane.xlu2 %1309 }
 0xb0d   :  { %v1314_v54 = vmul.f32 %v1310_v53, %v3491_v16 }
 0xb0f   :  { %v1316_v55 = vsub.f32 %v3931_v47, %v1314_v54 }
 0xb11   :  { %v1318_v51 = vmul.f32 %v1316_v55, %v1316_v55  ;;  %v1353_v13 = vmul.f32 %v3128_v10, %v1316_v55 }
 0xb13   :  { %v1320_v56 = vsel %vm82_vm0, %v1318_v51, 0.0 }
 0xb14   :  { %1321 = vadd.xlane.f32.xlu0 %v1320_v56 }
 0xb3c   :  { %v1313_v57 = vpop.xlane.xlu1 %1312 }
 0xb3d   :  { %v1315_v58 = vmul.f32 %v1313_v57, %v3491_v16 }
 0xb3f   :  { %v3945_v60 = vsub.f32 %v3936_v50, %v1315_v58 }
 0xb41   :  { %v1319_v1 = vmul.f32 %v3945_v60, %v3945_v60  ;;  %v1354_v44 = vmul.f32 %v3128_v10, %v3945_v60  ;;  %v4038_v10 = vld [vmem:[%s4515_s4 + $0x40] sm:$0xff] }
 0xb43   :  { %v1323_v61 = vsel %vm82_vm0, %v1319_v1, 0.0 }
 0xb44   :  { %1324 = vadd.xlane.f32.xlu2 %v1323_v61 }
 0xb54   :  { %v1444_v60 = vpop.permute.xlu1 %1443 }
 0xb87   :  { %v1322_v31 = vpop.xlane.xlu0 %1321 }
 0xb88   :  { %v1326_v2 = vmul.f32 0.032258064, %v1322_v31 }
 0xb8a   :  { %3224 = vrsqrt.f32 %v1326_v2  ;;  %vm1335_vm13 = vcmp.eq.f32.partialorder %v1326_v2, inf  ;;  %v1338_v12 = vand.u32 2147483648, %v1326_v2  ;;  %vm1337_vm14 = vcmp.eq.f32.partialorder %v1326_v2, 0.0 }
 0xb90   :  { %v3225_v32 = vpop.eup %3224 }
 0xb91   :  { %v1329_v34 = vmul.f32 %v3225_v32, %v1326_v2 }
 0xb93   :  { %v1330_v5 = vmul.f32 %v3225_v32, %v1329_v34 }
 0xb95   :  { %v1331_v6 = vmul.f32 0.5, %v1330_v5 }
 0xb97   :  { %v1332_v8 = vsub.f32 1.5, %v1331_v6 }
 0xb99   :  { %v1333_v9 = vmul.f32 %v3225_v32, %v1332_v8 }
 0xb9b   :  { %v1334_v7 = vmul.f32 %v1333_v9, %v1326_v2 }
 0xb9d   :  { %v1336_v11 = vsel %vm1335_vm13, %v1326_v2, %v1334_v7 }
 0xb9e   :  { %v1339_v59 = vsel %vm1337_vm14, %v1338_v12, %v1336_v11  ;;  %v4020_v12 = vld [vmem:[%s4515_s4 + $0x70] sm:$0xff]  ;;  %v4025_v11 = vld [vmem:[%s4515_s4 + $0x60] sm:$0xff] }
 0xb9f   :  { %v1355_v26 = vadd.f32 1e-06, %v1339_v59  ;;  %1533 = vmatpush.msra.mxu0 %v4020_v12  ;;  %v3082_v59 = vpack.i.bf16 %v4025_v11, %v4020_v12 }
 0xba1   :  { %3226 = vrcp.f32 %v1355_v26  ;;  %v4033_v26 = vld [vmem:[%s4515_s4 + $0x50] sm:$0xff]  ;;  %1534 = vmatpush.msra.mxu0 %v4025_v11 }
 0xba3   :  { %1535 = vmatpush.msra.mxu0 %v4033_v26 }
 0xba5   :  { %1536 = vmatpush.msra.mxu0 %v4038_v10 }
 0xba7   :  { %v3227_v15 = vpop.eup %3226 }
 0xba8   :  { %v1359_v18 = vmul.f32 %v3227_v15, %v1353_v13  ;;  %v3087_v13 = vpack.i.bf16 %v4038_v10, %v4033_v26 }
 0xbaa   :  { %v1362_v4 = vadd.f32 %v3129_v14, %v1359_v18 }
 0xbac   :  { %2868 = vmatmul.msk.f32.vlgmr.msra.gmra.mxu2 %vm82_vm0, %v1362_v4 }
 0xbb7   :  { %v1325_v20 = vpop.xlane.xlu2 %1324 }
 0xbb8   :  { %v1327_v21 = vmul.f32 0.032258064, %v1325_v20 }
 0xbba   :  { %3228 = vrsqrt.f32 %v1327_v21  ;;  %vm1347_vm15 = vcmp.eq.f32.partialorder %v1327_v21, inf  ;;  %v1350_v25 = vand.u32 2147483648, %v1327_v21  ;;  %vm1349_vm1 = vcmp.eq.f32.partialorder %v1327_v21, 0.0 }
 0xbc0   :  { %v3229_v28 = vpop.eup %3228 }
 0xbc1   :  { %v1341_v23 = vmul.f32 %v3229_v28, %v1327_v21 }
 0xbc3   :  { %v1342_v38 = vmul.f32 %v3229_v28, %v1341_v23 }
 0xbc5   :  { %v1343_v29 = vmul.f32 0.5, %v1342_v38 }
 0xbc7   :  { %v1344_v40 = vsub.f32 1.5, %v1343_v29  ;;  %v3132_v29 = vld [vmem:[%s4519_s8 + $0x9] ss:$0 sm:$0xff] }
 0xbc9   :  { %v1345_v41 = vmul.f32 %v3229_v28, %v1344_v40 }
 0xbcb   :  { %v1346_v42 = vmul.f32 %v1345_v41, %v1327_v21 }
 0xbcd   :  { %v1348_v43 = vsel %vm1347_vm15, %v1327_v21, %v1346_v42 }
 0xbce   :  { %v1351_v63 = vsel %vm1349_vm1, %v1350_v25, %v1348_v43 }
 0xbcf   :  { %v1356_v24 = vadd.f32 1e-06, %v1351_v63 }
 0xbd1   :  { %3230 = vrcp.f32 %v1356_v24 }
 0xbd7   :  { %v3231_v45 = vpop.eup %3230 }
 0xbd8   :  { %v1360_v46 = vmul.f32 %v3231_v45, %v1354_v44 }
 0xbda   :  { %v1363_v48 = vadd.f32 %v3129_v14, %v1360_v46 }
 0xbdc   :  { %2869 = vmatmul.msk.f32.gmra.mxu2 %vm82_vm0, %v1363_v48 }
 0xc2f   :  { %v1395_v53 = vpop.f32.mrf.mxu2 }
 0xc30   :  { %v1396_v54 = vadd.f32 %v3130_v17, %v1395_v53 }
 0xc32   :  { %v1401_v55 = vmax.f32 %v1396_v54, 0.0 }
 0xc34   :  { %2870 = vmatmul.msk.f32.vlgmr.msra.gmra.mxu3 %vm1411_vm2, %v1401_v55 }
 0xc5f   :  { %v1398_v51 = vpop.f32.mrf.mxu2 }
 0xc60   :  { %v1399_v56 = vadd.f32 %v3130_v17, %v1398_v51 }
 0xc62   :  { %v1402_v57 = vmax.f32 %v1399_v56, 0.0 }
 0xc64   :  { %2871 = vmatmul.msk.f32.gmra.mxu3 %vm1411_vm2, %v1402_v57 }
 0xcb7   :  { %v1435_v58 = vpop.f32.mrf.mxu3 }
 0xcb8   :  { %v1441_v1 = vadd.f32 %v1435_v58, %v3931_v47  ;;  %v4056_v58 = vld [vmem:[%s4518_s7 + $0x3] ss:$0 sm:$0xff] }
 0xcba   :  { %v4002_v61 = vadd.f32 %v1444_v60, %v1441_v1 }
 0xcbc   :  { %v1451_v3 = vsel %vm82_vm0, %v4002_v61, 0.0 }
 0xcbd   :  { %1452 = vadd.xlane.f32.xlu0 %v1451_v3 }
 0xce7   :  { %v1438_v0 = vpop.f32.mrf.mxu3 }
 0xce8   :  { %v1442_v33 = vadd.f32 %v1438_v0, %v3936_v50 }
 0xcea   :  { %v4007_v30 = vadd.f32 %v1444_v60, %v1442_v33 }
 0xcec   :  { %v1454_v31 = vsel %vm82_vm0, %v4007_v30, 0.0 }
 0xced   :  { %1455 = vadd.xlane.f32.xlu2 %v1454_v31 }
 0xd30   :  { %v1453_v2 = vpop.xlane.xlu0 %1452 }
 0xd31   :  { %v1457_v32 = vmul.f32 %v1453_v2, %v3491_v16 }
 0xd33   :  { %v1459_v47 = vsub.f32 %v4002_v61, %v1457_v32 }
 0xd35   :  { %v1461_v34 = vmul.f32 %v1459_v47, %v1459_v47  ;;  %v1496_v38 = vmul.f32 %v3131_v37, %v1459_v47 }
 0xd37   :  { %v1463_v5 = vsel %vm82_vm0, %v1461_v34, 0.0 }
 0xd38   :  { %1464 = vadd.xlane.f32.xlu0 %v1463_v5 }
 0xd60   :  { %v1456_v6 = vpop.xlane.xlu2 %1455 }
 0xd61   :  { %v1458_v8 = vmul.f32 %v1456_v6, %v3491_v16 }
 0xd63   :  { %v1460_v50 = vsub.f32 %v4007_v30, %v1458_v8 }
 0xd65   :  { %v1462_v9 = vmul.f32 %v1460_v50, %v1460_v50  ;;  %v1497_v55 = vmul.f32 %v3131_v37, %v1460_v50 }
 0xd67   :  { %v1466_v7 = vsel %vm82_vm0, %v1462_v9, 0.0 }
 0xd68   :  { %1467 = vadd.xlane.f32.xlu2 %v1466_v7 }
 0xdab   :  { %v1465_v14 = vpop.xlane.xlu0 %1464 }
 0xdac   :  { %v1469_v15 = vmul.f32 0.032258064, %v1465_v14 }
 0xdae   :  { %3232 = vrsqrt.f32 %v1469_v15  ;;  %vm1478_vm3 = vcmp.eq.f32.partialorder %v1469_v15, inf  ;;  %v1481_v35 = vand.u32 2147483648, %v1469_v15  ;;  %vm1480_vm4 = vcmp.eq.f32.partialorder %v1469_v15, 0.0 }
 0xdb4   :  { %v3233_v18 = vpop.eup %3232 }
 0xdb5   :  { %v1472_v4 = vmul.f32 %v3233_v18, %v1469_v15 }
 0xdb7   :  { %v1473_v20 = vmul.f32 %v3233_v18, %v1472_v4 }
 0xdb9   :  { %v1474_v21 = vmul.f32 0.5, %v1473_v20  ;;  %v3332_v20 = vld [vmem:[%s4513_s2 + $0x20] sm:$0xff] }
 0xdbb   :  { %v1475_v22 = vsub.f32 1.5, %v1474_v21 }
 0xdbd   :  { %v1476_v19 = vmul.f32 %v3233_v18, %v1475_v22 }
 0xdbf   :  { %v1477_v17 = vmul.f32 %v1476_v19, %v1469_v15 }
 0xdc1   :  { %v1479_v28 = vsel %vm1478_vm3, %v1469_v15, %v1477_v17 }
 0xdc2   :  { %v1482_v36 = vsel %vm1480_vm4, %v1481_v35, %v1479_v28  ;;  %v3333_v35 = vld [vmem:[%s4513_s2 + $0x28] sm:$0xff] }
 0xdc3   :  { %v1498_v23 = vadd.f32 1e-06, %v1482_v36 }
 0xdc5   :  { %3234 = vrcp.f32 %v1498_v23 }
 0xdcb   :  { %v3235_v40 = vpop.eup %3234 }
 0xdcc   :  { %v1502_v41 = vmul.f32 %v3235_v40, %v1496_v38 }
 0xdce   :  { %v1505_v42 = vadd.f32 %v3132_v29, %v1502_v41 }
 0xdd0   :  { %2879 = vmatmul.msk.f32.vlgmr.msra.gmra.mxu0 %vm82_vm0, %v1505_v42 }
 0xddb   :  { %v1468_v25 = vpop.xlane.xlu2 %1467 }
 0xddc   :  { %v1470_v43 = vmul.f32 0.032258064, %v1468_v25 }
 0xdde   :  { %3236 = vrsqrt.f32 %v1470_v43  ;;  %vm1490_vm5 = vcmp.eq.f32.partialorder %v1470_v43, inf  ;;  %v1493_v49 = vand.u32 2147483648, %v1470_v43  ;;  %vm1492_vm9 = vcmp.eq.f32.partialorder %v1470_v43, 0.0 }
 0xde4   :  { %v3237_v63 = vpop.eup %3236 }
 0xde5   :  { %v1484_v24 = vmul.f32 %v3237_v63, %v1470_v43 }
 0xde7   :  { %v1485_v44 = vmul.f32 %v3237_v63, %v1484_v24  ;;  %v3335_v24 = vld [vmem:[%s4513_s2 + $0x38] sm:$0xff] }
 0xde9   :  { %v1486_v45 = vmul.f32 0.5, %v1485_v44 }
 0xdeb   :  { %v1487_v46 = vsub.f32 1.5, %v1486_v45 }
 0xded   :  { %v1488_v48 = vmul.f32 %v3237_v63, %v1487_v46 }
 0xdef   :  { %v1489_v39 = vmul.f32 %v1488_v48, %v1470_v43 }
 0xdf1   :  { %v1491_v52 = vsel %vm1490_vm5, %v1470_v43, %v1489_v39  ;;  %v3336_v39 = vld [vmem:[%s4513_s2] sm:$0xff] }
 0xdf2   :  { %v1494_v53 = vsel %vm1492_vm9, %v1493_v49, %v1491_v52 }
 0xdf3   :  { %v1499_v54 = vadd.f32 1e-06, %v1494_v53 }
 0xdf5   :  { %3238 = vrcp.f32 %v1499_v54  ;;  %v3337_v54 = vld [vmem:[%s4513_s2 + $0x18] sm:$0xff] }
 0xdfb   :  { %v3239_v51 = vpop.eup %3238 }
 0xdfc   :  { %v1503_v56 = vmul.f32 %v3239_v51, %v1497_v55 }
 0xdfe   :  { %v1506_v57 = vadd.f32 %v3132_v29, %v1503_v56  ;;  %v3334_v29 = vld [vmem:[%s4513_s2 + $0x30] sm:$0xff] }
 0xdff   :  { %v3338_v56 = vld [vmem:[%s4513_s2 + $0x10] sm:$0xff] }
 0xe00   :  { %2880 = vmatmul.msk.f32.gmra.mxu0 %vm82_vm0, %v1506_v57 }
 0xe4d   :  { %v1538_v60 = vpop.f32.mrf.mxu0 }
 0xe4e   :  { %v4059_v1 = vadd.f32 %v4056_v58, %v1538_v60 }
 0xe50   :  { %1585 = vrot.lane.b32.xlu1 %v4059_v1, %s3381_s30 }
 0xe58   :  { %1624 = vrot.lane.b32.xlu1 %v4059_v1, %s3385_s14 }
 0xe60   :  { %1620 = vrot.lane.b32.xlu1 %v4059_v1, %s3384_s13 }
 0xe7d   :  { %v1541_v3 = vpop.f32.mrf.mxu0 }
 0xe7e   :  { %v4068_v0 = vadd.f32 %v4056_v58, %v1541_v3 }
 0xe80   :  { %1626 = vrot.lane.b32.xlu2 %v4068_v0, %s3385_s14  ;;  %1587 = vrot.lane.b32.xlu0 %v4068_v0, %s3381_s30 }
 0xe81   :  { %1622 = vrot.lane.b32.xlu1 %v4068_v0, %s3384_s13 }
 0xe88   :  { %1665 = vrot.lane.b32.xlu2 %v4068_v0, %s3380_s29  ;;  %1581 = vrot.lane.b32.xlu0 %v4059_v1, %s3383_s12 }
 0xe89   :  { %1661 = vrot.lane.b32.xlu1 %v4068_v0, %s3382_s11 }
 0xe90   :  { %1663 = vrot.lane.b32.xlu2 %v4059_v1, %s3380_s29  ;;  %1583 = vrot.lane.b32.xlu0 %v4068_v0, %s3383_s12 }
 0xe98   :  { %1548 = vrot.lane.b32.xlu2 %v4068_v0, %s3379_s0  ;;  %1659 = vrot.lane.b32.xlu0 %v4059_v1, %s3382_s11 }
 0xea0   :  { %1546 = vrot.lane.b32.xlu0 %v4059_v1, %s3379_s0 }
 0xec2   :  { %v1586_v33 = vpop.permute.xlu1 %1585 }
 0xeca   :  { %v1625_v31 = vpop.permute.xlu1 %1624 }
 0xed2   :  { %v1621_v32 = vpop.permute.xlu1 %1620 }
 0xeda   :  { %v1627_v2 = vpop.permute.xlu2 %1626 }
 0xedb   :  { %2889 = vmatpush.xpose.msk.msrb.mxu3 %vm271_vm6, %v1627_v2 }
 0xedf   :  { %2890 = vmatpush.xpose.msk.msrb.mxu3 %vm271_vm6, %v1625_v31  ;;  %v3339_v31 = vld [vmem:[%s4513_s2 + $0x8] sm:$0xff]  ;;  %s4525_s2 = smov 56  }
 0xee2   :  { %v1666_v47 = vpop.permute.xlu2 %1665  ;;  %2891 = vmatmul.msk.f32.vlgmr.msrb.gmra.mxu3 %vm271_vm6, %v1621_v32 }
 0xee3   :  { %2893 = vmatpush.xpose.msk.msrb.mxu0 %vm271_vm6, %v1666_v47 }
 0xeea   :  { %v1664_v34 = vpop.permute.xlu2 %1663 }
 0xeeb   :  { %2894 = vmatpush.xpose.msk.msrb.mxu0 %vm271_vm6, %v1664_v34 }
 0xef2   :  { %v1588_v5 = vpop.permute.xlu0 %1587  ;;  %v1549_v6 = vpop.permute.xlu2 %1548 }
 0xef3   :  { %v1623_v8 = vpop.permute.xlu1 %1622  ;;  %2881 = vmatpush.xpose.msk.msra.mxu1 %vm271_vm6, %v1549_v6  ;;  %2885 = vmatpush.xpose.msk.msrb.mxu2 %vm271_vm6, %v1588_v5 }
 0xef4   :  { %2892 = vmatmul.msk.f32.gmra.mxu3 %vm271_vm6, %v1623_v8 }
 0xef7   :  { %2886 = vmatpush.xpose.msk.msrb.mxu2 %vm271_vm6, %v1586_v33 }
 0xefa   :  { %v1582_v50 = vpop.permute.xlu0 %1581 }
 0xefb   :  { %2887 = vmatmul.msk.f32.vlgmr.msrb.gmra.mxu2 %vm271_vm6, %v1582_v50  ;;  %v1662_v14 = vpop.permute.xlu1 %1661 }
 0xf02   :  { %v1584_v9 = vpop.permute.xlu0 %1583 }
 0xf03   :  { %2888 = vmatmul.msk.f32.gmra.mxu2 %vm271_vm6, %v1584_v9 }
 0xf0a   :  { %v1660_v7 = vpop.permute.xlu0 %1659 }
 0xf0b   :  { %2895 = vmatmul.msk.f32.vlgmr.msrb.gmra.mxu0 %vm271_vm6, %v1660_v7 }
 0xf12   :  { %v1547_v15 = vpop.permute.xlu0 %1546 }
 0xf13   :  { %2882 = vmatpush.xpose.msk.msra.mxu1 %vm271_vm6, %v1547_v15  ;;  %2896 = vmatmul.msk.f32.gmra.mxu0 %vm271_vm6, %v1662_v14 }
 0xf16   :  { %2883 = vmatmul.msk.f32.vlgmr.msra.gmra.mxu1 %vm271_vm6, %v4059_v1 }
 0xf1e   :  { %2884 = vmatmul.msk.f32.gmra.mxu1 %vm271_vm6, %v4068_v0 }
 0xf65   :  { %v1653_v18 = vpop.f32.mrf.mxu3 }
 0xf66   :  { %v1702_v4 = vmul.f32 0.35355338, %v1653_v18 }
 0xf68   :  { %v1710_v21 = vadd.f32 %v3332_v20, %v1702_v4 }
 0xf6a   :  { %v1726_v22 = vsel %vm436_vm7, %v1710_v21, -inf }
 0xf6b   :  { %1727 = vmax.xlane.f32.xlu2 %v1726_v22 }
 0xf77   :  { %v1656_v19 = vpop.f32.mrf.mxu3 }
 0xf78   :  { %v1703_v17 = vmul.f32 0.35355338, %v1656_v19 }
 0xf7a   :  { %v4117_v28 = vadd.f32 %v3333_v35, %v1703_v17 }
 0xf7c   :  { %v1729_v36 = vsel %vm436_vm7, %v4117_v28, -inf }
 0xf7d   :  { %1730 = vmax.xlane.f32.xlu2 %v1729_v36 }
 0xf7e   :  { %v1614_v23 = vpop.f32.mrf.mxu2 }
 0xf7f   :  { %v1700_v52 = vmul.f32 0.35355338, %v1614_v23 }
 0xf81   :  { %v1708_v57 = vadd.f32 %v3338_v56, %v1700_v52 }
 0xf83   :  { %v1720_v33 = vsel %vm436_vm7, %v1708_v57, -inf }
 0xf86   :  { %v1617_v43 = vpop.f32.mrf.mxu2 }
 0xf87   :  { %v1701_v46 = vmul.f32 0.35355338, %v1617_v43 }
 0xf88   :  { %v1692_v37 = vpop.f32.mrf.mxu0 }
 0xf89   :  { %v1704_v38 = vmul.f32 0.35355338, %v1692_v37  ;;  %v1709_v55 = vadd.f32 %v3337_v54, %v1701_v46 }
 0xf8b   :  { %v1712_v40 = vadd.f32 %v3334_v29, %v1704_v38  ;;  %v1723_v3 = vsel %vm436_vm7, %v1709_v55, -inf  ;;  %v3072_v29 = vpack.i.bf16 %v4059_v1, %v4068_v0 }
 0xf8d   :  { %v1732_v41 = vsel %vm436_vm7, %v1712_v40, -inf }
 0xf8e   :  { %1733 = vmax.xlane.f32.xlu1 %v1732_v41 }
 0xf90   :  { %v1695_v42 = vpop.f32.mrf.mxu0 }
 0xf91   :  { %v1705_v25 = vmul.f32 0.35355338, %v1695_v42 }
 0xf93   :  { %v1575_v63 = vpop.f32.mrf.mxu1  ;;  %v4128_v44 = vadd.f32 %v3335_v24, %v1705_v25 }
 0xf94   :  { %v1698_v45 = vmul.f32 0.35355338, %v1575_v63 }
 0xf95   :  { %v1735_v48 = vsel %vm436_vm7, %v4128_v44, -inf }
 0xf96   :  { %1736 = vmax.xlane.f32.xlu0 %v1735_v48  ;;  %v1706_v49 = vadd.f32 %v3336_v39, %v1698_v45 }
 0xf98   :  { %v1714_v53 = vsel %vm436_vm7, %v1706_v49, -inf }
 0xf99   :  { %1715 = vmax.xlane.f32.xlu1 %v1714_v53 }
 0xf9b   :  { %v1578_v51 = vpop.f32.mrf.mxu1 }
 0xf9c   :  { %v1699_v60 = vmul.f32 0.35355338, %v1578_v51 }
 0xf9e   :  { %1724 = vmax.xlane.f32.xlu0 %v1723_v3  ;;  %v1707_v2 = vadd.f32 %v3339_v31, %v1699_v60  ;;  %v4197_v3 = vld [vmem:[%s4515_s4 + $0x78] sm:$0xff] }
 0xfa0   :  { %v1717_v32 = vsel %vm436_vm7, %v1707_v2, -inf }
 0xfa1   :  { %1721 = vmax.xlane.f32.xlu1 %v1720_v33 }
 0xfa6   :  { %1718 = vmax.xlane.f32.xlu0 %v1717_v32 }
 0xfde   :  { %v1728_v47 = vpop.xlane.xlu2 %1727 }
 0xfdf   :  { %v1742_v6 = vsub.f32 %v1710_v21, %v1728_v47 }
 0xfe1   :  { %v1754_v50 = vmul.f32 1.442695, %v1742_v6 }
0x1001   :  { %v1734_v34 = vpop.xlane.xlu1 %1733 }
0x1002   :  { %v1744_v5 = vsub.f32 %v1712_v40, %v1734_v34  ;;  %v1731_v40 = vpop.xlane.xlu2 %1730 }
0x1003   :  { %v1743_v41 = vsub.f32 %v4117_v28, %v1731_v40 }
0x1004   :  { %v1758_v8 = vmul.f32 1.442695, %v1744_v5  ;;  %v4204_v5 = vld [vmem:[%s4515_s4 + $0x68] sm:$0xff] }
0x1005   :  { %v1756_v25 = vmul.f32 1.442695, %v1743_v41 }
0x1006   :  { %3240 = vpow2.f32 %v1758_v8 }
0x1007   :  { %3242 = vpow2.f32 %v1754_v50 }
0x1009   :  { %v1737_v9 = vpop.xlane.xlu0 %1736 }
0x100a   :  { %v1745_v63 = vsub.f32 %v4128_v44, %v1737_v9  ;;  %v4213_v9 = vld [vmem:[%s4515_s4 + $0x58] sm:$0xff] }
0x100c   :  { %v4148_v7 = vpop.eup %3240  ;;  %v1716_v14 = vpop.xlane.xlu1 %1715  ;;  %v1760_v24 = vmul.f32 1.442695, %v1745_v63 }
0x100d   :  { %v1780_v15 = vsel %vm436_vm7, %v4148_v7, 0.0  ;;  %v4152_v4 = vpop.eup %3242  ;;  %v1738_v42 = vsub.f32 %v1706_v49, %v1716_v14 }
0x100e   :  { %1781 = vadd.xlane.f32.xlu1 %v1780_v15  ;;  %v1774_v21 = vsel %vm436_vm7, %v4152_v4, 0.0 }
0x100f   :  { %v1746_v43 = vmul.f32 1.442695, %v1738_v42 }
0x1011   :  { %v1725_v18 = vpop.xlane.xlu0 %1724 }
0x1012   :  { %v1741_v20 = vsub.f32 %v1709_v55, %v1725_v18 }
0x1014   :  { %v1752_v22 = vmul.f32 1.442695, %v1741_v20  ;;  %v1722_v19 = vpop.xlane.xlu1 %1721 }
0x1015   :  { %v1740_v17 = vsub.f32 %v1708_v57, %v1722_v19 }
0x1016   :  { %3244 = vpow2.f32 %v1752_v22  ;;  %1775 = vadd.xlane.f32.xlu1 %v1774_v21 }
0x1017   :  { %v1750_v35 = vmul.f32 1.442695, %v1740_v17 }
0x1019   :  { %3246 = vpow2.f32 %v1750_v35  ;;  %v1719_v48 = vpop.xlane.xlu0 %1718 }
0x101a   :  { %3248 = vpow2.f32 %v1756_v25  ;;  %v1739_v39 = vsub.f32 %v1707_v2, %v1719_v48 }
0x101b   :  { %3250 = vpow2.f32 %v1746_v43 }
0x101c   :  { %v4156_v36 = vpop.eup %3244  ;;  %3252 = vpow2.f32 %v1760_v24  ;;  %v1748_v49 = vmul.f32 1.442695, %v1739_v39 }
0x101d   :  { %v1771_v23 = vsel %vm436_vm7, %v4156_v36, 0.0 }
0x101e   :  { %1772 = vadd.xlane.f32.xlu0 %v1771_v23  ;;  %3254 = vpow2.f32 %v1748_v49 }
0x101f   :  { %v3247_v37 = vpop.eup %3246 }
0x1020   :  { %v1768_v38 = vsel %vm436_vm7, %v3247_v37, 0.0  ;;  %v4168_v45 = vpop.eup %3248 }
0x1021   :  { %1769 = vadd.xlane.f32.xlu2 %v1768_v38  ;;  %v4170_v1 = vpop.eup %3250  ;;  %v1777_v0 = vsel %vm436_vm7, %v4168_v45, 0.0 }
0x1022   :  { %v1762_v28 = vsel %vm436_vm7, %v4170_v1, 0.0  ;;  %v4176_v46 = vpop.eup %3252 }
0x1023   :  { %v1783_v44 = vsel %vm436_vm7, %v4176_v46, 0.0 }
0x1024   :  { %v4189_v54 = vpop.eup %3254 }
0x1025   :  { %v1765_v51 = vsel %vm436_vm7, %v4189_v54, 0.0 }
0x102f   :  { %3073 = vrot.lane.b32.xlu1 %v3072_v29, %s3386_s17 }
0x1032   :  { %3068 = vrot.lane.b32.xlu0 %v3072_v29, %s3388_s19 }
0x1039   :  { %3063 = vrot.lane.b32.xlu2 %v3072_v29, %s4525_s2 }
0x1059   :  { %1778 = vadd.xlane.f32.xlu1 %v1777_v0 }
0x105c   :  { %1763 = vadd.xlane.f32.xlu0 %v1762_v28 }
0x1062   :  { %1784 = vadd.xlane.f32.xlu2 %v1783_v44 }
0x1072   :  { %3078 = vrot.lane.b32.xlu1 %v3072_v29, %s3389_s20 }
0x107a   :  { %3083 = vrot.lane.b32.xlu2 %v3082_v59, %s3390_s21 }
0x1081   :  { %v1782_v52 = vpop.xlane.xlu1 %1781 }
0x1082   :  { %3088 = vrot.lane.b32.xlu2 %v3087_v13, %s3390_s21 }
0x1089   :  { %v1776_v55 = vpop.xlane.xlu1 %1775 }
0x1091   :  { %v1773_v12 = vpop.xlane.xlu0 %1772 }
0x1094   :  { %v1770_v53 = vpop.xlane.xlu2 %1769 }
0x1095   :  { %3256 = vrcp.f32 %v1770_v53 }
0x1096   :  { %3258 = vrcp.f32 %v1782_v52 }
0x1097   :  { %3260 = vrcp.f32 %v1776_v55 }
0x1098   :  { %3262 = vrcp.f32 %v1773_v12 }
0x109b   :  { %v3257_v59 = vpop.eup %3256 }
0x109c   :  { %1766 = vadd.xlane.f32.xlu1 %v1765_v51  ;;  %v3064_v11 = vpop.permute.xlu2 %3063  ;;  %v1796_v13 = vmul.f32 %v3257_v59, %v3247_v37  ;;  %v3259_v57 = vpop.eup %3258 }
0x109d   :  { %v3065_v26 = vunpack.i.l.bf16 %v3064_v11  ;;  %v3066_v10 = vunpack.i.h.bf16 %v3064_v11  ;;  %v3261_v33 = vpop.eup %3260  ;;  %v1800_v47 = vmul.f32 %v3259_v57, %v4148_v7  ;;  %v4221_v7 = vld [vmem:[%s4515_s4 + $0x48] sm:$0xff]  ;;  %s4526_s4 = smov 16  }
0x109e   :  { %v3263_v32 = vpop.eup %3262  ;;  %v1798_v8 = vmul.f32 %v3261_v33, %v4152_v4 }
0x109f   :  { %1863 = vmatpush.msra.mxu2 %v3065_v26  ;;  %v1797_v50 = vmul.f32 %v3263_v32, %v4156_v36 }
0x10a1   :  { %1864 = vmatpush.msra.mxu2 %v3066_v10  ;;  %v3074_v56 = vpop.permute.xlu1 %3073 }
0x10a2   :  { %v3075_v60 = vunpack.i.l.bf16 %v3074_v56  ;;  %2899 = vmatmul.msk.f32.vlgmr.msra.gmra.mxu2 %vm436_vm7, %v1796_v13  ;;  %v3076_v31 = vunpack.i.h.bf16 %v3074_v56 }
0x10a3   :  { %2099 = vmatpush.msrb.mxu2 %v4197_v3 }
0x10a4   :  { %v3069_v2 = vpop.permute.xlu0 %3068  ;;  %1933 = vmatpush.msra.mxu0 %v3075_v60 }
0x10a5   :  { %v3070_v34 = vunpack.i.l.bf16 %v3069_v2  ;;  %2100 = vmatpush.msrb.mxu2 %v4204_v5  ;;  %v3071_v6 = vunpack.i.h.bf16 %v3069_v2 }
0x10a6   :  { %1934 = vmatpush.msra.mxu0 %v3076_v31 }
0x10a7   :  { %1898 = vmatpush.msra.mxu3 %v3070_v34  ;;  %2903 = vmatmul.msk.f32.vlgmr.msra.gmra.mxu0 %vm436_vm7, %v1800_v47  ;;  %v4261_v47 = vld [vmem:[%s4518_s7 + $0x4] ss:$0 sm:$0xff] }
0x10a8   :  { %2101 = vmatpush.msrb.mxu2 %v4213_v9 }
0x10a9   :  { %1899 = vmatpush.msra.mxu3 %v3071_v6 }
0x10aa   :  { %2900 = vmatmul.msk.f32.gmra.mxu2 %vm436_vm7, %v1797_v50  ;;  %2901 = vmatmul.msk.f32.vlgmr.msra.gmra.mxu3 %vm436_vm7, %v1798_v8 }
0x10ab   :  { %2102 = vmatpush.msrb.mxu2 %v4221_v7 }
0x10cc   :  { %v1779_v14 = vpop.xlane.xlu1 %1778 }
0x10cd   :  { %3264 = vrcp.f32 %v1779_v14 }
0x10cf   :  { %v1764_v22 = vpop.xlane.xlu0 %1763 }
0x10d3   :  { %v3265_v15 = vpop.eup %3264 }
0x10d4   :  { %v1799_v18 = vmul.f32 %v3265_v15, %v4168_v45 }
0x10d5   :  { %v1785_v4 = vpop.xlane.xlu2 %1784 }
0x10d6   :  { %3266 = vrcp.f32 %v1785_v4  ;;  %2902 = vmatmul.msk.f32.gmra.mxu3 %vm436_vm7, %v1799_v18 }
0x10d7   :  { %3268 = vrcp.f32 %v1764_v22 }
0x10dc   :  { %v3267_v20 = vpop.eup %3266 }
0x10dd   :  { %v1801_v19 = vmul.f32 %v3267_v20, %v4176_v46  ;;  %v3269_v21 = vpop.eup %3268  ;;  %v3084_v43 = vpop.permute.xlu2 %3083 }
0x10de   :  { %v1794_v23 = vmul.f32 %v3269_v21, %v4170_v1  ;;  %v3086_v63 = vunpack.i.h.bf16 %v3084_v43  ;;  %v3085_v24 = vunpack.i.l.bf16 %v3084_v43  ;;  %v3135_v43 = vld [vmem:[%s4519_s8 + $0xa] ss:$0 sm:$0xff] }
0x10df   :  { %2904 = vmatmul.msk.f32.gmra.mxu0 %vm436_vm7, %v1801_v19 }
0x10e4   :  { %v3079_v17 = vpop.permute.xlu1 %3078 }
0x10e5   :  { %v3080_v35 = vunpack.i.l.bf16 %v3079_v17  ;;  %v3081_v36 = vunpack.i.h.bf16 %v3079_v17  ;;  %v3089_v45 = vpop.permute.xlu2 %3088 }
0x10e6   :  { %v3091_v1 = vunpack.i.h.bf16 %v3089_v45  ;;  %v3090_v0 = vunpack.i.l.bf16 %v3089_v45 }
0x10e7   :  { %1828 = vmatpush.msrb.mxu1 %v3080_v35 }
0x10e9   :  { %1829 = vmatpush.msrb.mxu1 %v3081_v36 }
0x10ea   :  { %2897 = vmatmul.msk.f32.vlgmr.msrb.gmra.mxu1 %vm436_vm7, %v1794_v23 }
0x10eb   :  { %2009 = vmatpush.msra.mxu1 %v3085_v24  ;;  %v3136_v24 = vld [vmem:[%s4519_s8 + $0xb] ss:$0 sm:$0xff] }
0x10ed   :  { %2010 = vmatpush.msra.mxu1 %v3086_v63 }
0x10ef   :  { %2011 = vmatpush.msra.mxu1 %v3090_v0 }
0x10f1   :  { %2012 = vmatpush.msra.mxu1 %v3091_v1 }
0x110f   :  { %v1767_v37 = vpop.xlane.xlu1 %1766 }
0x1110   :  { %3270 = vrcp.f32 %v1767_v37 }
0x1116   :  { %v3271_v38 = vpop.eup %3270 }
0x1117   :  { %v1795_v29 = vmul.f32 %v3271_v38, %v4189_v54 }
0x1119   :  { %2898 = vmatmul.msk.f32.gmra.mxu1 %vm436_vm7, %v1795_v29 }
0x1124   :  { %v1936_v40 = vpop.f32.mrf.mxu0 }
0x1125   :  { %v1866_v41 = vpop.f32.mrf.mxu2  ;;  %1960 = vrot.lane.b32.xlu1 %v1936_v40, %s3391_s22 }
0x1126   :  { %1944 = vrot.lane.b32.xlu0 %v1866_v41, %s3392_s23 }
0x112d   :  { %v1869_v42 = vpop.f32.mrf.mxu2  ;;  %v1901_v25 = vpop.f32.mrf.mxu3 }
0x112e   :  { %1946 = vrot.lane.b32.xlu2 %v1869_v42, %s3392_s23  ;;  %1952 = vrot.lane.b32.xlu0 %v1901_v25, %s4526_s4 }
0x1159   :  { %v1904_v28 = vpop.f32.mrf.mxu3 }
0x115a   :  { %1954 = vrot.lane.b32.xlu0 %v1904_v28, %s4526_s4 }
0x115c   :  { %v1939_v46 = vpop.f32.mrf.mxu0 }
0x115d   :  { %1962 = vrot.lane.b32.xlu2 %v1939_v46, %s3391_s22 }
0x1162   :  { %1988 = vrot.lane.b32.xlu0 %v4056_v58, %s3390_s21 }
0x1167   :  { %v1831_v48 = vpop.f32.mrf.mxu1 }
0x1188   :  { %v1947_v55 = vpop.permute.xlu2 %1946 }
0x1196   :  { %v1834_v51 = vpop.f32.mrf.mxu1 }
0x1197   :  { %v1961_v52 = vpop.permute.xlu1 %1960  ;;  %v1967_v12 = vsel %vm271_vm6, %v1834_v51, %v1947_v55 }
0x1198   :  { %v1945_v44 = vpop.permute.xlu0 %1944 }
0x1199   :  { %v1966_v39 = vsel %vm271_vm6, %v1831_v48, %v1945_v44 }
0x11a0   :  { %v1953_v49 = vpop.permute.xlu0 %1952 }
0x11a1   :  { %v1968_v53 = vsel %vm436_vm7, %v1966_v39, %v1953_v49 }
0x11a2   :  { %v1970_v54 = vsel %vm693_vm8, %v1968_v53, %v1961_v52 }
0x11a3   :  { %2905 = vmatmul.msk.f32.vlgmr.msra.gmra.mxu1 %vm82_vm0, %v1970_v54 }
0x11b7   :  { %v1963_v59 = vpop.permute.xlu2 %1962 }
0x11cc   :  { %v1955_v11 = vpop.permute.xlu0 %1954 }
0x11cd   :  { %v1969_v58 = vsel %vm436_vm7, %v1967_v12, %v1955_v11 }
0x11ce   :  { %v1971_v26 = vsel %vm693_vm8, %v1969_v58, %v1963_v59 }
0x11cf   :  { %2906 = vmatmul.msk.f32.gmra.mxu1 %vm82_vm0, %v1971_v26 }
0x11d4   :  { %v1989_v10 = vpop.permute.xlu0 %1988 }
0x1220   :  { %v2014_v13 = vpop.f32.mrf.mxu1 }
0x1221   :  { %v2015_v56 = vadd.f32 %v2014_v13, %v1989_v10 }
0x1223   :  { %v4249_v57 = vadd.f32 %v2015_v56, %v4002_v61 }
0x1225   :  { %v2024_v60 = vsel %vm82_vm0, %v4249_v57, 0.0 }
0x1226   :  { %2025 = vadd.xlane.f32.xlu2 %v2024_v60 }
0x124c   :  { %v2017_v33 = vpop.f32.mrf.mxu1 }
0x124d   :  { %v2018_v31 = vadd.f32 %v2017_v33, %v1989_v10 }
0x124f   :  { %v4254_v2 = vadd.f32 %v2018_v31, %v4007_v30 }
0x1251   :  { %v2027_v32 = vsel %vm82_vm0, %v4254_v2, 0.0 }
0x1252   :  { %2028 = vadd.xlane.f32.xlu0 %v2027_v32 }
0x1266   :  { %137 = vrot.lane.b32.xlu0 %v4261_v47, %s3379_s0 }
0x1299   :  { %v2026_v61 = vpop.xlane.xlu2 %2025 }
0x129a   :  { %v2030_v34 = vmul.f32 %v2026_v61, %v3491_v16 }
0x129c   :  { %v2032_v6 = vsub.f32 %v4249_v57, %v2030_v34 }
0x129e   :  { %v2034_v8 = vmul.f32 %v2032_v6, %v2032_v6  ;;  %v2069_v63 = vmul.f32 %v3135_v43, %v2032_v6 }
0x12a0   :  { %v2036_v30 = vsel %vm82_vm0, %v2034_v8, 0.0 }
0x12a1   :  { %2037 = vadd.xlane.f32.xlu1 %v2036_v30 }
0x12c5   :  { %v2029_v50 = vpop.xlane.xlu0 %2028 }
0x12c6   :  { %v2031_v14 = vmul.f32 %v2029_v50, %v3491_v16 }
0x12c8   :  { %v4270_v15 = vsub.f32 %v4254_v2, %v2031_v14 }
0x12ca   :  { %v2035_v18 = vmul.f32 %v4270_v15, %v4270_v15  ;;  %v2070_v60 = vmul.f32 %v3135_v43, %v4270_v15 }
0x12cc   :  { %v2039_v4 = vsel %vm82_vm0, %v2035_v18, 0.0 }
0x12cd   :  { %2040 = vadd.xlane.f32.xlu2 %v2039_v4  ;;  %v3344_v4 = vld [vmem:[%s4514_s3] sm:$0xff] }
0x12d8   :  { %v138_v20 = vpop.permute.xlu0 %137 }
0x12d9   :  { %v158_v22 = vadd.f32 %v3637_v62, %v138_v20  ;;  %v161_v19 = vadd.f32 %v3656_v27, %v138_v20 }
0x12db   :  { %2190 = vrot.lane.b32.xlu0 %v161_v19, %s3384_s13  ;;  %2911 = vmatpush.xpose.msk.msrb.mxu3 %vm271_vm6, %v161_v19  ;;  %v4279_v17 = vpack.i.bf16 %v158_v22, %v161_v19 }
0x12dc   :  { %2227 = vrot.lane.b32.xlu1 %v158_v22, %s3382_s11 }
0x12df   :  { %2912 = vmatpush.xpose.msk.msrb.mxu3 %vm271_vm6, %v158_v22 }
0x12e4   :  { %2149 = vrot.lane.b32.xlu1 %v158_v22, %s3383_s12 }
0x12e5   :  { %2229 = vrot.lane.b32.xlu2 %v161_v19, %s3382_s11 }
0x12ed   :  { %2151 = vrot.lane.b32.xlu2 %v161_v19, %s3383_s12 }
0x12f5   :  { %2188 = vrot.lane.b32.xlu2 %v158_v22, %s3384_s13 }
0x1314   :  { %v2038_v62 = vpop.xlane.xlu1 %2037 }
0x1315   :  { %v2042_v27 = vmul.f32 0.032258064, %v2038_v62 }
0x1317   :  { %3272 = vrsqrt.f32 %v2042_v27  ;;  %vm2051_vm10 = vcmp.eq.f32.partialorder %v2042_v27, inf  ;;  %v2054_v40 = vand.u32 2147483648, %v2042_v27  ;;  %vm2053_vm11 = vcmp.eq.f32.partialorder %v2042_v27, 0.0 }
0x131d   :  { %v3273_v21 = vpop.eup %3272 }
0x131e   :  { %v2045_v35 = vmul.f32 %v3273_v21, %v2042_v27 }
0x1320   :  { %v2046_v36 = vmul.f32 %v3273_v21, %v2045_v35 }
0x1322   :  { %v2047_v23 = vmul.f32 0.5, %v2046_v36  ;;  %v3345_v36 = vld [vmem:[%s4514_s3 + $0x20] sm:$0xff] }
0x1324   :  { %v2048_v37 = vsub.f32 1.5, %v2047_v23 }
0x1326   :  { %v2049_v38 = vmul.f32 %v3273_v21, %v2048_v37 }
0x1328   :  { %v2050_v29 = vmul.f32 %v2049_v38, %v2042_v27 }
0x132a   :  { %v2052_v41 = vsel %vm2051_vm10, %v2042_v27, %v2050_v29 }
0x132b   :  { %v2055_v42 = vsel %vm2053_vm11, %v2054_v40, %v2052_v41  ;;  %v3346_v40 = vld [vmem:[%s4514_s3 + $0x10] sm:$0xff] }
0x132c   :  { %v2071_v25 = vadd.f32 1e-06, %v2055_v42 }
0x132e   :  { %3274 = vrcp.f32 %v2071_v25 }
0x1334   :  { %v3275_v45 = vpop.eup %3274 }
0x1335   :  { %v2075_v1 = vmul.f32 %v3275_v45, %v2069_v63  ;;  %v3347_v63 = vld [vmem:[%s4514_s3 + $0x30] sm:$0xff] }
0x1337   :  { %v2078_v0 = vadd.f32 %v3136_v24, %v2075_v1 }
0x1339   :  { %2909 = vmatmul.msk.f32.vlgmr.msrb.gmra.mxu2 %vm82_vm0, %v2078_v0 }
0x1340   :  { %v2041_v28 = vpop.xlane.xlu2 %2040 }
0x1341   :  { %v2043_v46 = vmul.f32 0.032258064, %v2041_v28  ;;  %v3348_v28 = vld [vmem:[%s4514_s3 + $0x28] sm:$0xff] }
0x1343   :  { %3276 = vrsqrt.f32 %v2043_v46  ;;  %vm2063_vm12 = vcmp.eq.f32.partialorder %v2043_v46, inf  ;;  %v2066_v59 = vand.u32 2147483648, %v2043_v46  ;;  %vm2065_vm13 = vcmp.eq.f32.partialorder %v2043_v46, 0.0 }
0x1348   :  { %v2230_v44 = vpop.permute.xlu2 %2229 }
0x1349   :  { %v3277_v48 = vpop.eup %3276  ;;  %2923 = vmatpush.xpose.msk.msra.mxu2 %vm271_vm6, %v2230_v44 }
0x134a   :  { %v2057_v39 = vmul.f32 %v3277_v48, %v2043_v46 }
0x134c   :  { %v2058_v49 = vmul.f32 %v3277_v48, %v2057_v39 }
0x134d   :  { %v2191_v52 = vpop.permute.xlu0 %2190 }
0x134e   :  { %v2228_v53 = vpop.permute.xlu1 %2227  ;;  %2919 = vmatpush.xpose.msk.msrb.mxu1 %vm271_vm6, %v2191_v52  ;;  %v2059_v54 = vmul.f32 0.5, %v2058_v49  ;;  %v3349_v52 = vld [vmem:[%s4514_s3 + $0x38] sm:$0xff] }
0x134f   :  { %2924 = vmatpush.xpose.msk.msra.mxu2 %vm271_vm6, %v2228_v53 }
0x1350   :  { %v2152_v55 = vpop.permute.xlu2 %2151  ;;  %v2060_v51 = vsub.f32 1.5, %v2059_v54 }
0x1351   :  { %2915 = vmatpush.xpose.msk.msrb.mxu0 %vm271_vm6, %v2152_v55 }
0x1352   :  { %v2061_v12 = vmul.f32 %v3277_v48, %v2060_v51  ;;  %v3350_v51 = vld [vmem:[%s4514_s3 + $0x18] sm:$0xff] }
0x1354   :  { %v2062_v11 = vmul.f32 %v2061_v12, %v2043_v46 }
0x1356   :  { %v2150_v58 = vpop.permute.xlu1 %2149  ;;  %v2064_v26 = vsel %vm2063_vm12, %v2043_v46, %v2062_v11 }
0x1357   :  { %2916 = vmatpush.xpose.msk.msrb.mxu0 %vm271_vm6, %v2150_v58  ;;  %v2067_v10 = vsel %vm2065_vm13, %v2066_v59, %v2064_v26  ;;  %v3351_v26 = vld [vmem:[%s4514_s3 + $0x8] sm:$0xff] }
0x1358   :  { %v2189_v13 = vpop.permute.xlu2 %2188  ;;  %v2072_v56 = vadd.f32 1e-06, %v2067_v10 }
0x1359   :  { %2920 = vmatpush.xpose.msk.msrb.mxu1 %vm271_vm6, %v2189_v13 }
0x135a   :  { %3278 = vrcp.f32 %v2072_v56 }
0x1360   :  { %v3279_v33 = vpop.eup %3278 }
0x1361   :  { %v2076_v31 = vmul.f32 %v3279_v33, %v2070_v60 }
0x1363   :  { %v2079_v32 = vadd.f32 %v3136_v24, %v2076_v31 }
0x1365   :  { %2910 = vmatmul.msk.f32.gmra.mxu2 %vm82_vm0, %v2079_v32 }
0x13bc   :  { %v2104_v61 = vpop.f32.mrf.mxu2 }
0x13bd   :  { %v2105_v34 = vadd.f32 %v4261_v47, %v2104_v61 }
0x13bf   :  { %2184 = vrot.lane.b32.xlu2 %v2105_v34, %s3384_s13  ;;  %2145 = vrot.lane.b32.xlu1 %v2105_v34, %s3383_s12 }
0x13c0   :  { %2223 = vrot.lane.b32.xlu0 %v2105_v34, %s3382_s11  ;;  %2913 = vmatmul.msk.f32.vlgmr.msrb.gmra.mxu3 %vm271_vm6, %v2105_v34 }
0x13e8   :  { %v2107_v6 = vpop.f32.mrf.mxu2 }
0x13e9   :  { %v2108_v8 = vadd.f32 %v4261_v47, %v2107_v6 }
0x13eb   :  { %2186 = vrot.lane.b32.xlu1 %v2108_v8, %s3384_s13  ;;  %2225 = vrot.lane.b32.xlu0 %v2108_v8, %s3382_s11  ;;  %s3395_s11 = smov 128  }
0x13ec   :  { %2914 = vmatmul.msk.f32.gmra.mxu3 %vm271_vm6, %v2108_v8 }
0x13f3   :  { %2147 = vrot.lane.b32.xlu0 %v2108_v8, %s3383_s12 }
0x1419   :  { %v2185_v30 = vpop.permute.xlu2 %2184 }
0x141a   :  { %2921 = vmatmul.msk.f32.vlgmr.msrb.gmra.mxu1 %vm271_vm6, %v2185_v30 }
0x1431   :  { %v2146_v50 = vpop.permute.xlu1 %2145 }
0x1432   :  { %v2224_v14 = vpop.permute.xlu0 %2223  ;;  %2917 = vmatmul.msk.f32.vlgmr.msrb.gmra.mxu0 %vm271_vm6, %v2146_v50 }
0x1433   :  { %2925 = vmatmul.msk.f32.vlgmr.msra.gmra.mxu2 %vm271_vm6, %v2224_v14 }
0x1443   :  { %v2139_v15 = vpop.f32.mrf.mxu3 }
0x1444   :  { %v2262_v18 = vmul.f32 0.35355338, %v2139_v15 }
0x1446   :  { %v4318_v20 = vadd.f32 %v3344_v4, %v2262_v18 }
0x1448   :  { %v2278_v22 = vsel %vm436_vm7, %v4318_v20, -inf }
0x1449   :  { %2279 = vmax.xlane.f32.xlu2 %v2278_v22 }
0x145d   :  { %v2187_v19 = vpop.permute.xlu1 %2186  ;;  %v2226_v62 = vpop.permute.xlu0 %2225 }
0x145e   :  { %2922 = vmatmul.msk.f32.gmra.mxu1 %vm271_vm6, %v2187_v19  ;;  %2926 = vmatmul.msk.f32.gmra.mxu2 %vm271_vm6, %v2226_v62 }
0x1465   :  { %v2148_v27 = vpop.permute.xlu0 %2147 }
0x1466   :  { %2918 = vmatmul.msk.f32.gmra.mxu0 %vm271_vm6, %v2148_v27 }
0x146f   :  { %v2142_v55 = vpop.f32.mrf.mxu3 }
0x1470   :  { %v2263_v59 = vmul.f32 0.35355338, %v2142_v55 }
0x1472   :  { %v4352_v10 = vadd.f32 %v3351_v26, %v2263_v59 }
0x1474   :  { %v2281_v13 = vsel %vm436_vm7, %v4352_v10, -inf }
0x1497   :  { %v2217_v21 = vpop.f32.mrf.mxu1 }
0x1498   :  { %v2266_v35 = vmul.f32 0.35355338, %v2217_v21 }
0x149a   :  { %v2274_v23 = vadd.f32 %v3345_v36, %v2266_v35 }
0x149c   :  { %v2290_v37 = vsel %vm436_vm7, %v2274_v23, -inf }
0x149d   :  { %2291 = vmax.xlane.f32.xlu1 %v2290_v37 }
0x14af   :  { %v2178_v38 = vpop.f32.mrf.mxu0 }
0x14b0   :  { %v2264_v29 = vmul.f32 0.35355338, %v2178_v38 }
0x14b2   :  { %v2272_v41 = vadd.f32 %v3346_v40, %v2264_v29 }
0x14b4   :  { %v2284_v42 = vsel %vm436_vm7, %v2272_v41, -inf }
0x14b5   :  { %2285 = vmax.xlane.f32.xlu0 %v2284_v42 }
0x14b6   :  { %v2256_v25 = vpop.f32.mrf.mxu2 }
0x14b7   :  { %v2268_v43 = vmul.f32 0.35355338, %v2256_v25 }
0x14b9   :  { %v2276_v24 = vadd.f32 %v3347_v63, %v2268_v43 }
0x14bb   :  { %v2296_v45 = vsel %vm436_vm7, %v2276_v24, -inf }
0x14bc   :  { %2297 = vmax.xlane.f32.xlu2 %v2296_v45  ;;  %v2280_v61 = vpop.xlane.xlu2 %2279 }
0x14bd   :  { %v2302_v19 = vsub.f32 %v4318_v20, %v2280_v61 }
0x14bf   :  { %v2310_v62 = vmul.f32 1.442695, %v2302_v19 }
0x14db   :  { %v2220_v1 = vpop.f32.mrf.mxu1 }
0x14dc   :  { %v2267_v0 = vmul.f32 0.35355338, %v2220_v1 }
0x14de   :  { %v2275_v46 = vadd.f32 %v3348_v28, %v2267_v0 }
0x14e0   :  { %v2293_v44 = vsel %vm436_vm7, %v2275_v46, -inf }
0x14e1   :  { %v2259_v48 = vpop.f32.mrf.mxu2  ;;  %2294 = vmax.xlane.f32.xlu1 %v2293_v44 }
0x14e2   :  { %v2269_v39 = vmul.f32 0.35355338, %v2259_v48 }
0x14e3   :  { %v2181_v49 = vpop.f32.mrf.mxu0 }
0x14e4   :  { %v2277_v53 = vadd.f32 %v3349_v52, %v2269_v39  ;;  %v2265_v54 = vmul.f32 0.35355338, %v2181_v49 }
0x14e6   :  { %v2273_v12 = vadd.f32 %v3350_v51, %v2265_v54  ;;  %v2299_v11 = vsel %vm436_vm7, %v2277_v53, -inf }
0x14e7   :  { %2300 = vmax.xlane.f32.xlu2 %v2299_v11 }
0x14e8   :  { %v2287_v58 = vsel %vm436_vm7, %v2273_v12, -inf }
0x14e9   :  { %2288 = vmax.xlane.f32.xlu0 %v2287_v58 }
0x14f1   :  { %2282 = vmax.xlane.f32.xlu0 %v2281_v13 }
0x1510   :  { %v2292_v56 = vpop.xlane.xlu1 %2291 }
0x1511   :  { %v2306_v60 = vsub.f32 %v2274_v23, %v2292_v56 }
0x1513   :  { %v2318_v33 = vmul.f32 1.442695, %v2306_v60 }
0x1515   :  { %3280 = vpow2.f32 %v2318_v33  ;;  %v3117_v33 = vpack.i.bf16 %v4221_v7, %v4213_v9 }
0x151b   :  { %v4356_v31 = vpop.eup %3280 }
0x151c   :  { %v2338_v32 = vsel %vm436_vm7, %v4356_v31, 0.0 }
0x151d   :  { %2339 = vadd.xlane.f32.xlu0 %v2338_v32 }
0x1528   :  { %v2286_v34 = vpop.xlane.xlu0 %2285 }
0x1529   :  { %v2304_v6 = vsub.f32 %v2272_v41, %v2286_v34 }
0x152b   :  { %v2314_v8 = vmul.f32 1.442695, %v2304_v6 }
0x152d   :  { %3282 = vpow2.f32 %v2314_v8 }
0x152f   :  { %v2298_v30 = vpop.xlane.xlu2 %2297 }
0x1530   :  { %v2308_v50 = vsub.f32 %v2276_v24, %v2298_v30 }
0x1531   :  { %3098 = vrot.lane.b32.xlu0 %v4279_v17, %s3381_s30 }
0x1532   :  { %v2322_v14 = vmul.f32 1.442695, %v2308_v50 }
0x1533   :  { %v3283_v15 = vpop.eup %3282 }
0x1534   :  { %3284 = vpow2.f32 %v2322_v14  ;;  %v2332_v18 = vsel %vm436_vm7, %v3283_v15, 0.0 }
0x1535   :  { %2333 = vadd.xlane.f32.xlu2 %v2332_v18  ;;  %3286 = vpow2.f32 %v2310_v62 }
0x153a   :  { %v4363_v4 = vpop.eup %3284 }
0x153b   :  { %v2344_v22 = vsel %vm436_vm7, %v4363_v4, 0.0  ;;  %v4372_v27 = vpop.eup %3286 }
0x153c   :  { %2345 = vadd.xlane.f32.xlu1 %v2344_v22  ;;  %v2326_v21 = vsel %vm436_vm7, %v4372_v27, 0.0 }
0x154d   :  { %3103 = vrot.lane.b32.xlu2 %v4279_v17, %s3385_s14 }
0x1554   :  { %v2295_v38 = vpop.xlane.xlu1 %2294 }
0x1555   :  { %3093 = vrot.lane.b32.xlu1 %v4279_v17, %s3380_s29  ;;  %v2307_v29 = vsub.f32 %v2275_v46, %v2295_v38 }
0x1557   :  { %v2320_v41 = vmul.f32 1.442695, %v2307_v29 }
0x155a   :  { %v2301_v37 = vpop.xlane.xlu2 %2300 }
0x155b   :  { %2327 = vadd.xlane.f32.xlu0 %v2326_v21  ;;  %v2309_v20 = vsub.f32 %v2277_v53, %v2301_v37 }
0x155c   :  { %v2289_v35 = vpop.xlane.xlu0 %2288 }
0x155d   :  { %v2305_v36 = vsub.f32 %v2273_v12, %v2289_v35  ;;  %v2324_v40 = vmul.f32 1.442695, %v2309_v20 }
0x155f   :  { %v2316_v23 = vmul.f32 1.442695, %v2305_v36 }
0x1561   :  { %3288 = vpow2.f32 %v2316_v23 }
0x1562   :  { %3290 = vpow2.f32 %v2324_v40 }
0x1563   :  { %3292 = vpow2.f32 %v2320_v41 }
0x1564   :  { %v2283_v1 = vpop.xlane.xlu0 %2282 }
0x1565   :  { %v2303_v39 = vsub.f32 %v4352_v10, %v2283_v1 }
0x1567   :  { %v3289_v42 = vpop.eup %3288  ;;  %v2312_v55 = vmul.f32 1.442695, %v2303_v39 }
0x1568   :  { %v2335_v25 = vsel %vm436_vm7, %v3289_v42, 0.0  ;;  %v3291_v43 = vpop.eup %3290 }
0x1569   :  { %v4377_v63 = vpop.eup %3292  ;;  %v2347_v24 = vsel %vm436_vm7, %v3291_v43, 0.0 }
0x156a   :  { %v2341_v45 = vsel %vm436_vm7, %v4377_v63, 0.0 }
0x156f   :  { %3118 = vrot.lane.b32.xlu0 %v3117_v33, %s3390_s21 }
0x1576   :  { %2336 = vadd.xlane.f32.xlu2 %v2335_v25 }
0x157e   :  { %2348 = vadd.xlane.f32.xlu2 %v2347_v24 }
0x157f   :  { %2342 = vadd.xlane.f32.xlu1 %v2341_v45 }
0x1590   :  { %v2340_v0 = vpop.xlane.xlu0 %2339 }
0x1596   :  { %3108 = vrot.lane.b32.xlu2 %v4279_v17, %s3379_s0 }
0x15a3   :  { %v3099_v28 = vpop.permute.xlu0 %3098 }
0x15a4   :  { %v3100_v46 = vunpack.i.l.bf16 %v3099_v28  ;;  %v3101_v44 = vunpack.i.h.bf16 %v3099_v28 }
0x15a6   :  { %2427 = vmatpush.msra.mxu0 %v3100_v46 }
0x15a8   :  { %2428 = vmatpush.msra.mxu0 %v3101_v44  ;;  %v2334_v48 = vpop.xlane.xlu2 %2333 }
0x15a9   :  { %3294 = vrcp.f32 %v2334_v48 }
0x15aa   :  { %3296 = vrcp.f32 %v2340_v0 }
0x15ab   :  { %3298 = vpow2.f32 %v2312_v55 }
0x15af   :  { %v3295_v49 = vpop.eup %3294  ;;  %v2346_v58 = vpop.xlane.xlu1 %2345 }
0x15b0   :  { %v2360_v52 = vmul.f32 %v3295_v49, %v3283_v15  ;;  %v3104_v53 = vpop.permute.xlu2 %3103  ;;  %v3297_v54 = vpop.eup %3296  ;;  %3300 = vrcp.f32 %v2346_v58 }
0x15b1   :  { %v3105_v51 = vunpack.i.l.bf16 %v3104_v53  ;;  %v3106_v17 = vunpack.i.h.bf16 %v3104_v53  ;;  %v2362_v12 = vmul.f32 %v3297_v54, %v4356_v31  ;;  %v3299_v11 = vpop.eup %3298  ;;  %v3112_v31 = vpack.i.bf16 %v4204_v5, %v4197_v3 }
0x15b2   :  { %2929 = vmatmul.msk.f32.vlgmr.msra.gmra.mxu0 %vm436_vm7, %v2360_v52  ;;  %v2329_v59 = vsel %vm436_vm7, %v3299_v11, 0.0 }
0x15b3   :  { %2462 = vmatpush.msra.mxu1 %v3105_v51  ;;  %3113 = vrot.lane.b32.xlu1 %v3112_v31, %s3390_s21 }
0x15b5   :  { %2463 = vmatpush.msra.mxu1 %v3106_v17 }
0x15b6   :  { %2931 = vmatmul.msk.f32.vlgmr.msra.gmra.mxu1 %vm436_vm7, %v2362_v12  ;;  %v3301_v10 = vpop.eup %3300 }
0x15b7   :  { %v2364_v60 = vmul.f32 %v3301_v10, %v4363_v4 }
0x15bf   :  { %2330 = vadd.xlane.f32.xlu2 %v2329_v59 }
0x15c7   :  { %v3094_v26 = vpop.permute.xlu1 %3093 }
0x15c8   :  { %v3095_v13 = vunpack.i.l.bf16 %v3094_v26  ;;  %v3096_v56 = vunpack.i.h.bf16 %v3094_v26 }
0x15ca   :  { %2497 = vmatpush.msrb.mxu2 %v3095_v13 }
0x15cc   :  { %2498 = vmatpush.msrb.mxu2 %v3096_v56 }
0x15cd   :  { %2933 = vmatmul.msk.f32.vlgmr.msrb.gmra.mxu2 %vm436_vm7, %v2364_v60 }
0x15ce   :  { %v2328_v34 = vpop.xlane.xlu0 %2327 }
0x15e1   :  { %v3119_v38 = vpop.permute.xlu0 %3118 }
0x15e2   :  { %v3120_v20 = vunpack.i.l.bf16 %v3119_v38  ;;  %v3121_v29 = vunpack.i.h.bf16 %v3119_v38 }
0x15e9   :  { %v2337_v32 = vpop.xlane.xlu2 %2336 }
0x15ea   :  { %3302 = vrcp.f32 %v2337_v32  ;;  %v2942_v32 = vld [vmem:[%s4516_s5 + $0x38] sm:$0xff] }
0x15eb   :  { %2667 = vmatpush.msrb.mxu0 %v2942_v32 }
0x15f0   :  { %v3303_v61 = vpop.eup %3302 }
0x15f1   :  { %v2349_v6 = vpop.xlane.xlu2 %2348  ;;  %v2361_v8 = vmul.f32 %v3303_v61, %v3289_v42  ;;  %v2941_v61 = vld [vmem:[%s4516_s5 + $0x30] sm:$0xff] }
0x15f2   :  { %v2343_v30 = vpop.xlane.xlu1 %2342  ;;  %3304 = vrcp.f32 %v2349_v6  ;;  %2668 = vmatpush.msrb.mxu0 %v2941_v61  ;;  %v2939_v6 = vld [vmem:[%s4516_s5 + $0x20] sm:$0xff] }
0x15f3   :  { %3306 = vrcp.f32 %v2343_v30  ;;  %2930 = vmatmul.msk.f32.gmra.mxu0 %vm436_vm7, %v2361_v8 }
0x15f4   :  { %3308 = vrcp.f32 %v2328_v34  ;;  %v2940_v34 = vld [vmem:[%s4516_s5 + $0x28] sm:$0xff] }
0x15f5   :  { %2669 = vmatpush.msrb.mxu0 %v2940_v34 }
0x15f7   :  { %2670 = vmatpush.msrb.mxu0 %v2939_v6 }
0x15f8   :  { %v3305_v9 = vpop.eup %3304 }
0x15f9   :  { %v3307_v7 = vpop.eup %3306  ;;  %v3109_v50 = vpop.permute.xlu2 %3108  ;;  %v2365_v3 = vmul.f32 %v3305_v9, %v3291_v43 }
0x15fa   :  { %v3309_v5 = vpop.eup %3308  ;;  %v3110_v14 = vunpack.i.l.bf16 %v3109_v50  ;;  %v2363_v15 = vmul.f32 %v3307_v7, %v4377_v63  ;;  %v3111_v18 = vunpack.i.h.bf16 %v3109_v50 }
0x15fb   :  { %2934 = vmatmul.msk.f32.gmra.mxu2 %vm436_vm7, %v2365_v3  ;;  %v2358_v4 = vmul.f32 %v3309_v5, %v4372_v27 }
0x15fc   :  { %2932 = vmatmul.msk.f32.gmra.mxu1 %vm436_vm7, %v2363_v15  ;;  %2392 = vmatpush.msra.mxu3 %v3110_v14 }
0x15fe   :  { %2393 = vmatpush.msra.mxu3 %v3111_v18 }
0x15ff   :  { %2927 = vmatmul.msk.f32.vlgmr.msra.gmra.mxu3 %vm436_vm7, %v2358_v4 }
0x1625   :  { %v3114_v23 = vpop.permute.xlu1 %3113 }
0x1626   :  { %v3116_v27 = vunpack.i.h.bf16 %v3114_v23  ;;  %v3115_v37 = vunpack.i.l.bf16 %v3114_v23 }
0x1628   :  { %2569 = vmatpush.msrb.mxu3 %v3115_v37 }
0x162a   :  { %2570 = vmatpush.msrb.mxu3 %v3116_v27 }
0x162c   :  { %2571 = vmatpush.msrb.mxu3 %v3120_v20  ;;  %v2953_v20 = vld [vmem:[%s4517_s6 + $0x78] sm:$0xff] }
0x162d   :  { %2703 = vmatpush.msrb.mxu1 %v2953_v20  ;;  %v3141_v20 = vld [vmem:[%s4520_s9 + $0x1] ss:$0 sm:$0xff] }
0x162e   :  { %2572 = vmatpush.msrb.mxu3 %v3121_v29  ;;  %v2952_v29 = vld [vmem:[%s4517_s6 + $0x70] sm:$0xff] }
0x162f   :  { %v2430_v22 = vpop.f32.mrf.mxu0  ;;  %2704 = vmatpush.msrb.mxu1 %v2952_v29 }
0x1630   :  { %2508 = vrot.lane.b32.xlu0 %v2430_v22, %s3392_s23 }
0x1632   :  { %v2331_v19 = vpop.xlane.xlu2 %2330 }
0x1633   :  { %3310 = vrcp.f32 %v2331_v19  ;;  %v2465_v62 = vpop.f32.mrf.mxu1 }
0x1634   :  { %2516 = vrot.lane.b32.xlu1 %v2465_v62, %s4526_s4  ;;  %v3137_v62 = vld [vmem:[%s4519_s8 + $0xc] ss:$0 sm:$0xff] }
0x1639   :  { %v3311_v21 = vpop.eup %3310 }
0x163a   :  { %v2359_v35 = vmul.f32 %v3311_v21, %v3299_v11 }
0x163c   :  { %2928 = vmatmul.msk.f32.gmra.mxu3 %vm436_vm7, %v2359_v35  ;;  %v3138_v35 = vld [vmem:[%s4519_s8 + $0xd] ss:$0 sm:$0xff] }
0x1650   :  { %v2500_v36 = vpop.f32.mrf.mxu2 }
0x1651   :  { %2524 = vrot.lane.b32.xlu2 %v2500_v36, %s3391_s22 }
0x1670   :  { %v2433_v40 = vpop.f32.mrf.mxu0 }
0x1671   :  { %2510 = vrot.lane.b32.xlu0 %v2433_v40, %s3392_s23  ;;  %v3139_v40 = vld [vmem:[%s4518_s7 + $0x5] ss:$0 sm:$0xff] }
0x1679   :  { %v2468_v41 = vpop.f32.mrf.mxu1 }
0x167a   :  { %2518 = vrot.lane.b32.xlu1 %v2468_v41, %s4526_s4  ;;  %v2951_v41 = vld [vmem:[%s4517_s6 + $0x68] sm:$0xff] }
0x167b   :  { %2705 = vmatpush.msrb.mxu1 %v2951_v41 }
0x167e   :  { %v2503_v42 = vpop.f32.mrf.mxu2 }
0x167f   :  { %2526 = vrot.lane.b32.xlu0 %v2503_v42, %s3391_s22 }
0x1682   :  { %2548 = vrot.lane.b32.xlu1 %v4261_v47, %s3390_s21  ;;  %v2395_v63 = vpop.f32.mrf.mxu3 }
0x16a2   :  { %v2509_v25 = vpop.permute.xlu0 %2508 }
0x16a3   :  { %v2530_v24 = vsel %vm271_vm6, %v2395_v63, %v2509_v25  ;;  %v2950_v25 = vld [vmem:[%s4517_s6 + $0x60] sm:$0xff]  ;;  %v2949_v63 = vld [vmem:[%s4517_s6 + $0x58] sm:$0xff] }
0x16a4   :  { %2706 = vmatpush.msrb.mxu1 %v2950_v25 }
0x16a6   :  { %v2517_v43 = vpop.permute.xlu1 %2516  ;;  %2707 = vmatpush.msrb.mxu1 %v2949_v63 }
0x16a7   :  { %v2532_v45 = vsel %vm436_vm7, %v2530_v24, %v2517_v43 }
0x16ab   :  { %v2525_v1 = vpop.permute.xlu2 %2524 }
0x16ac   :  { %v2534_v0 = vsel %vm693_vm8, %v2532_v45, %v2525_v1 }
0x16ad   :  { %2935 = vmatmul.msk.f32.vlgmr.msrb.gmra.mxu3 %vm82_vm0, %v2534_v0 }
0x16bf   :  { %v2398_v44 = vpop.f32.mrf.mxu3 }
0x16e3   :  { %v2511_v28 = vpop.permute.xlu0 %2510 }
0x16e4   :  { %v2531_v48 = vsel %vm271_vm6, %v2398_v44, %v2511_v28 }
0x16ec   :  { %v2519_v46 = vpop.permute.xlu1 %2518 }
0x16ed   :  { %v2533_v39 = vsel %vm436_vm7, %v2531_v48, %v2519_v46 }
0x16f1   :  { %v2527_v47 = vpop.permute.xlu0 %2526 }
0x16f2   :  { %v2535_v49 = vsel %vm693_vm8, %v2533_v39, %v2527_v47 }
0x16f3   :  { %2936 = vmatmul.msk.f32.gmra.mxu3 %vm82_vm0, %v2535_v49 }
0x16f4   :  { %v2549_v52 = vpop.permute.xlu1 %2548 }
0x1730   :  { %v2574_v53 = vpop.f32.mrf.mxu3 }
0x1731   :  { %v2575_v54 = vadd.f32 %v2574_v53, %v2549_v52 }
0x1733   :  { %v4421_v55 = vadd.f32 %v2575_v54, %v4249_v57  ;;  %v2948_v54 = vld [vmem:[%s4517_s6 + $0x50] sm:$0xff] }
0x1734   :  { %2708 = vmatpush.msrb.mxu1 %v2948_v54 }
0x1735   :  { %v2584_v51 = vsel %vm82_vm0, %v4421_v55, 0.0 }
0x1736   :  { %2585 = vadd.xlane.f32.xlu0 %v2584_v51  ;;  %v2947_v51 = vld [vmem:[%s4517_s6 + $0x48] sm:$0xff] }
0x1737   :  { %2709 = vmatpush.msrb.mxu1 %v2947_v51 }
0x1776   :  { %v2577_v17 = vpop.f32.mrf.mxu3 }
0x1777   :  { %v2578_v12 = vadd.f32 %v2577_v17, %v2549_v52  ;;  %v2946_v17 = vld [vmem:[%s4517_s6 + $0x40] sm:$0xff] }
0x1778   :  { %2710 = vmatpush.msrb.mxu1 %v2946_v17 }
0x1779   :  { %v4426_v11 = vadd.f32 %v2578_v12, %v4254_v2 }
0x177b   :  { %v2587_v59 = vsel %vm82_vm0, %v4426_v11, 0.0 }
0x177c   :  { %2588 = vadd.xlane.f32.xlu1 %v2587_v59 }
0x1795   :  { %2720 = vrot.lane.b32.xlu1 %v3139_v40, %s3389_s20 }
0x17a9   :  { %v2586_v58 = vpop.xlane.xlu0 %2585 }
0x17aa   :  { %v2590_v26 = vmul.f32 %v2586_v58, %v3491_v16 }
0x17ac   :  { %v2592_v10 = vsub.f32 %v4421_v55, %v2590_v26 }
0x17ae   :  { %v2594_v57 = vmul.f32 %v2592_v10, %v2592_v10  ;;  %v2629_v21 = vmul.f32 %v3137_v62, %v2592_v10 }
0x17b0   :  { %v2596_v13 = vsel %vm82_vm0, %v2594_v57, 0.0 }
0x17b1   :  { %2597 = vadd.xlane.f32.xlu2 %v2596_v13 }
0x17ef   :  { %v2589_v56 = vpop.xlane.xlu1 %2588 }
0x17f0   :  { %v2591_v60 = vmul.f32 %v2589_v56, %v3491_v16 }
0x17f2   :  { %v4435_v33 = vsub.f32 %v4426_v11, %v2591_v60 }
0x17f4   :  { %v2595_v2 = vmul.f32 %v4435_v33, %v4435_v33  ;;  %v2630_v47 = vmul.f32 %v3137_v62, %v4435_v33 }
0x17f6   :  { %v2599_v31 = vsel %vm82_vm0, %v2595_v2, 0.0 }
0x17f7   :  { %2600 = vadd.xlane.f32.xlu0 %v2599_v31 }
0x1807   :  { %v2721_v56 = vpop.permute.xlu1 %2720 }
0x1824   :  { %v2598_v8 = vpop.xlane.xlu2 %2597 }
0x1825   :  { %v2602_v30 = vmul.f32 0.032258064, %v2598_v8 }
0x1827   :  { %3312 = vrsqrt.f32 %v2602_v30  ;;  %vm2611_vm6 = vcmp.eq.f32.partialorder %v2602_v30, inf  ;;  %v2614_v18 = vand.u32 2147483648, %v2602_v30  ;;  %vm2613_vm7 = vcmp.eq.f32.partialorder %v2602_v30, 0.0 }
0x182d   :  { %v3313_v9 = vpop.eup %3312 }
0x182e   :  { %v2605_v7 = vmul.f32 %v3313_v9, %v2602_v30 }
0x1830   :  { %v2606_v50 = vmul.f32 %v3313_v9, %v2605_v7 }
0x1832   :  { %v2607_v3 = vmul.f32 0.5, %v2606_v50 }
0x1834   :  { %v2608_v5 = vsub.f32 1.5, %v2607_v3 }
0x1836   :  { %v2609_v14 = vmul.f32 %v3313_v9, %v2608_v5 }
0x1838   :  { %v2610_v15 = vmul.f32 %v2609_v14, %v2602_v30 }
0x183a   :  { %v2612_v4 = vsel %vm2611_vm6, %v2602_v30, %v2610_v15 }
0x183b   :  { %v2615_v22 = vsel %vm2613_vm7, %v2614_v18, %v2612_v4 }
0x183c   :  { %v2631_v19 = vadd.f32 1e-06, %v2615_v22 }
0x183e   :  { %3314 = vrcp.f32 %v2631_v19 }
0x1844   :  { %v3315_v36 = vpop.eup %3314 }
0x1845   :  { %v2635_v23 = vmul.f32 %v3315_v36, %v2629_v21 }
0x1847   :  { %v2638_v27 = vadd.f32 %v3138_v35, %v2635_v23 }
0x1849   :  { %2944 = vmatmul.msk.f32.vlgmr.msrb.gmra.mxu0 %vm82_vm0, %v2638_v27 }
0x186a   :  { %v2601_v37 = vpop.xlane.xlu0 %2600 }
0x186b   :  { %v2603_v38 = vmul.f32 0.032258064, %v2601_v37  ;;  %v3140_v37 = vld [vmem:[%s4520_s9] ss:$0 sm:$0xff]  ;;  %s3394_s9 = smov [#allocation2]  }
0x186c   :  { %s2789_s22 = sshll.u32 %s3394_s9, 4  ;;  %s2790_s22 = int_to_ptr.vmem [resolvable:$true] %s2789_s22 }
0x186d   :  { %3316 = vrsqrt.f32 %v2603_v38  ;;  %vm2623_vm8 = vcmp.eq.f32.partialorder %v2603_v38, inf  ;;  %v2626_v46 = vand.u32 2147483648, %v2603_v38  ;;  %vm2625_vm14 = vcmp.eq.f32.partialorder %v2603_v38, 0.0 }
0x1873   :  { %v3317_v42 = vpop.eup %3316 }
0x1874   :  { %v2617_v43 = vmul.f32 %v3317_v42, %v2603_v38 }
0x1876   :  { %v2618_v24 = vmul.f32 %v3317_v42, %v2617_v43 }
0x1878   :  { %v2619_v45 = vmul.f32 0.5, %v2618_v24 }
0x187a   :  { %v2620_v1 = vsub.f32 1.5, %v2619_v45 }
0x187c   :  { %v2621_v0 = vmul.f32 %v3317_v42, %v2620_v1 }
0x187e   :  { %v2622_v28 = vmul.f32 %v2621_v0, %v2603_v38 }
0x1880   :  { %v2624_v44 = vsel %vm2623_vm8, %v2603_v38, %v2622_v28 }
0x1881   :  { %v2627_v48 = vsel %vm2625_vm14, %v2626_v46, %v2624_v44 }
0x1882   :  { %v2632_v39 = vadd.f32 1e-06, %v2627_v48 }
0x1884   :  { %3318 = vrcp.f32 %v2632_v39 }
0x188a   :  { %v3319_v49 = vpop.eup %3318 }
0x188b   :  { %v2636_v52 = vmul.f32 %v3319_v49, %v2630_v47 }
0x188d   :  { %v2639_v53 = vadd.f32 %v3138_v35, %v2636_v52 }
0x188f   :  { %2945 = vmatmul.msk.f32.gmra.mxu0 %vm82_vm0, %v2639_v53 }
0x18c6   :  { %v2672_v12 = vpop.f32.mrf.mxu0 }
0x18c7   :  { %v2673_v59 = vadd.f32 %v3139_v40, %v2672_v12 }
0x18c9   :  { %v2678_v58 = vmax.f32 %v2673_v59, 0.0 }
0x18cb   :  { %2954 = vmatmul.msk.f32.vlgmr.msrb.gmra.mxu1 %vm1411_vm2, %v2678_v58 }
0x190c   :  { %v2675_v26 = vpop.f32.mrf.mxu0 }
0x190d   :  { %v2676_v10 = vadd.f32 %v3139_v40, %v2675_v26 }
0x190f   :  { %v2679_v57 = vmax.f32 %v2676_v10, 0.0 }
0x1911   :  { %2955 = vmatmul.msk.f32.gmra.mxu1 %vm1411_vm2, %v2679_v57 }
0x1948   :  { %v2712_v13 = vpop.f32.mrf.mxu1 }
0x1949   :  { %v2718_v60 = vadd.f32 %v2712_v13, %v4421_v55 }
0x194b   :  { %v2723_v33 = vadd.f32 %v2721_v56, %v2718_v60 }
0x194d   :  { %v2727_v2 = vsel %vm82_vm0, %v2723_v33, 0.0 }
0x194e   :  { %2728 = vadd.xlane.f32.xlu2 %v2727_v2 }
0x198e   :  { %v2715_v31 = vpop.f32.mrf.mxu1 }
0x198f   :  { %v2719_v32 = vadd.f32 %v2715_v31, %v4426_v11 }
0x1991   :  { %v2724_v61 = vadd.f32 %v2721_v56, %v2719_v32 }
0x1993   :  { %v2730_v34 = vsel %vm82_vm0, %v2724_v61, 0.0 }
0x1994   :  { %2731 = vadd.xlane.f32.xlu0 %v2730_v34 }
0x19c1   :  { %v2729_v6 = vpop.xlane.xlu2 %2728 }
0x19c2   :  { %v2733_v8 = vmul.f32 %v2729_v6, %v3491_v16 }
0x19c4   :  { %v2735_v30 = vsub.f32 %v2723_v33, %v2733_v8 }
0x19c6   :  { %v2737_v9 = vmul.f32 %v2735_v30, %v2735_v30  ;;  %v2772_v38 = vmul.f32 %v3140_v37, %v2735_v30 }
0x19c8   :  { %v2739_v7 = vsel %vm82_vm0, %v2737_v9, 0.0 }
0x19c9   :  { %2740 = vadd.xlane.f32.xlu2 %v2739_v7 }
0x1a07   :  { %v2732_v55 = vpop.xlane.xlu0 %2731 }
0x1a08   :  { %v2734_v50 = vmul.f32 %v2732_v55, %v3491_v16 }
0x1a0a   :  { %v2736_v3 = vsub.f32 %v2724_v61, %v2734_v50 }
0x1a0c   :  { %v2738_v5 = vmul.f32 %v2736_v3, %v2736_v3  ;;  %v2773_v47 = vmul.f32 %v3140_v37, %v2736_v3 }
0x1a0e   :  { %v2742_v14 = vsel %vm82_vm0, %v2738_v5, 0.0 }
0x1a0f   :  { %2743 = vadd.xlane.f32.xlu0 %v2742_v14 }
0x1a3c   :  { %v2741_v11 = vpop.xlane.xlu2 %2740 }
0x1a3d   :  { %v2745_v15 = vmul.f32 0.032258064, %v2741_v11 }
0x1a3f   :  { %3320 = vrsqrt.f32 %v2745_v15  ;;  %vm2754_vm15 = vcmp.eq.f32.partialorder %v2745_v15, inf  ;;  %v2757_v36 = vand.u32 2147483648, %v2745_v15  ;;  %vm2756_vm1 = vcmp.eq.f32.partialorder %v2745_v15, 0.0 }
0x1a45   :  { %v3321_v18 = vpop.eup %3320 }
0x1a46   :  { %v2748_v4 = vmul.f32 %v3321_v18, %v2745_v15 }
0x1a48   :  { %v2749_v22 = vmul.f32 %v3321_v18, %v2748_v4 }
0x1a4a   :  { %v2750_v19 = vmul.f32 0.5, %v2749_v22 }
0x1a4c   :  { %v2751_v62 = vsub.f32 1.5, %v2750_v19 }
0x1a4e   :  { %v2752_v21 = vmul.f32 %v3321_v18, %v2751_v62 }
0x1a50   :  { %v2753_v35 = vmul.f32 %v2752_v21, %v2745_v15 }
0x1a52   :  { %v2755_v23 = vsel %vm2754_vm15, %v2745_v15, %v2753_v35 }
0x1a53   :  { %v2758_v16 = vsel %vm2756_vm1, %v2757_v36, %v2755_v23 }
0x1a54   :  { %v2774_v27 = vadd.f32 1e-06, %v2758_v16 }
0x1a56   :  { %3322 = vrcp.f32 %v2774_v27 }
0x1a5c   :  { %v3323_v29 = vpop.eup %3322 }
0x1a5d   :  { %v2778_v40 = vmul.f32 %v3323_v29, %v2772_v38 }
0x1a5f   :  { %v2781_v41 = vadd.f32 %v3141_v20, %v2778_v40 }
0x1a61   :  { %2783 = vst.msk [vmem:[#allocation2] sm:$0xff] %vm82_vm0, %v2781_v41 }
0x1a82   :  { %v2744_v42 = vpop.xlane.xlu0 %2743 }
0x1a83   :  { %v2746_v25 = vmul.f32 0.032258064, %v2744_v42 }
0x1a85   :  { %3324 = vrsqrt.f32 %v2746_v25  ;;  %vm2766_vm2 = vcmp.eq.f32.partialorder %v2746_v25, inf  ;;  %v2769_v46 = vand.u32 2147483648, %v2746_v25  ;;  %vm2768_vm3 = vcmp.eq.f32.partialorder %v2746_v25, 0.0 }
0x1a8b   :  { %v3325_v43 = vpop.eup %3324 }
0x1a8c   :  { %v2760_v63 = vmul.f32 %v3325_v43, %v2746_v25 }
0x1a8e   :  { %v2761_v24 = vmul.f32 %v3325_v43, %v2760_v63 }
0x1a90   :  { %v2762_v45 = vmul.f32 0.5, %v2761_v24 }
0x1a92   :  { %v2763_v1 = vsub.f32 1.5, %v2762_v45 }
0x1a94   :  { %v2764_v0 = vmul.f32 %v3325_v43, %v2763_v1 }
0x1a96   :  { %v2765_v28 = vmul.f32 %v2764_v0, %v2746_v25 }
0x1a98   :  { %v2767_v44 = vsel %vm2766_vm2, %v2746_v25, %v2765_v28 }
0x1a99   :  { %v2770_v48 = vsel %vm2768_vm3, %v2769_v46, %v2767_v44 }
0x1a9a   :  { %v2775_v39 = vadd.f32 1e-06, %v2770_v48 }
0x1a9c   :  { %3326 = vrcp.f32 %v2775_v39 }
0x1aa2   :  { %v3327_v49 = vpop.eup %3326 }
0x1aa3   :  { %v2779_v52 = vmul.f32 %v3327_v49, %v2773_v47 }
0x1aa5   :  { %v2782_v53 = vadd.f32 %v3141_v20, %v2779_v52 }
0x1aa7   :  { %2784 = vst.msk [vmem:[#allocation2 + $0x8] sm:$0xff] %vm82_vm0, %v2782_v53 }
0x1aa8   :  { %2797 = dma.vmem_to_hbm [thread:$0]  %s2790_s22, 256, %s2792_s25, [#allocation3], %s3395_s11, %s3395_s11, %s3392_s23  }
0x1aa9   :  { %3376 = dma.done.wait [#allocation3], 256  }
0x1aaa   :  { %3377 = vsyncadd [#allocation3], 4294967040 }
0x1aab   :  { %2802 = vsyncpa [#allocation3], 1 }

</bundles_post_ra>
